<compile_context>
chip_gen: v7x
topology: tpu7x:2x2x1
jax: 0.10.0
libtpu: 0.0.40
codegen_flags: <defaults>
</compile_context>

<pallas_src>
import functools

import jax
import jax.numpy as jnp
from jax.experimental import pallas as pl
from jax.experimental.pallas import tpu as pltpu

num_classes = 10
_BN_EPS = 1e-5


# ---------------------------------------------------------------------------
# Pallas kernels
# ---------------------------------------------------------------------------

def _matmul_kernel(x_ref, w_ref, o_ref):
    o_ref[...] = jnp.dot(x_ref[...], w_ref[...], preferred_element_type=jnp.float32)


def pallas_matmul(x, w):
    """(M, K) @ (K, N) -> (M, N) f32.  Used for the merged 1x1-input head GEMM."""
    M, K = x.shape
    _, N = w.shape
    return pl.pallas_call(
        _matmul_kernel,
        out_shape=jax.ShapeDtypeStruct((M, N), jnp.float32),
        grid=(1,),
        in_specs=[pl.BlockSpec((M, K), lambda i: (0, 0)),
                  pl.BlockSpec((K, N), lambda i: (0, 0))],
        out_specs=pl.BlockSpec((M, N), lambda i: (0, 0)),
    )(x, w)


def _deconv_s2_kernel(x_ref, w_ref, o_ref, *rest, H, W, Cin, Cout, act, with_stats):
    """Subpixel ConvTranspose2d(k=4, s=2, p=1) for one batch element.

    x_ref : (1, Lp, Cin)       flattened zero-padded input (rows of width W+2)
    w_ref : (9*Cin, 4*Cout)    per-tap weights, phase-major columns
    o_ref : (1, H*(W+2), 4*Cout)  raw output (junk columns where n >= W, zeroed)
    rest  : optional (1, 2, 4*Cout) per-column [sum, sum_sq] partial BN stats
    """
    Wp = W + 2
    Mr = H * Wp
    N = 4 * Cout
    acc = jnp.zeros((Mr, N), jnp.float32)
    for dh in range(3):
        for dw in range(3):
            t = dh * 3 + dw
            start = dh * Wp + dw
            patch = x_ref[0, start:start + Mr, :]          # (Mr, Cin) bf16
            wt = w_ref[t * Cin:(t + 1) * Cin, :]           # (Cin, 4*Cout) bf16
            acc = acc + jnp.dot(patch, wt, preferred_element_type=jnp.float32)

    # zero the "halo junk" rows (flattened column index >= W) so they never
    # pollute the BN statistics; the wrapper slices them away afterwards.
    rid = jax.lax.broadcasted_iota(jnp.int32, (Mr, 1), 0)
    valid = (rid % Wp) < W
    acc = jnp.where(valid, acc, 0.0)

    if act == "tanh":
        y = jnp.tanh(acc)
    else:
        y = acc
    o_ref[0] = y.astype(o_ref.dtype)

    if with_stats:
        s_ref = rest[0]
        col_sum = jnp.sum(acc, axis=0, keepdims=True)
        col_sq = jnp.sum(acc * acc, axis=0, keepdims=True)
        s_ref[0] = jnp.concatenate([col_sum, col_sq], axis=0)


def pallas_deconv_s2(x2, wm, *, H, W, Cin, Cout, act, with_stats):
    B, Lp, _ = x2.shape
    Mr = H * (W + 2)
    N = 4 * Cout
    kern = functools.partial(_deconv_s2_kernel, H=H, W=W, Cin=Cin, Cout=Cout,
                             act=act, with_stats=with_stats)
    out_shape = [jax.ShapeDtypeStruct((B, Mr, N), jnp.float32)]
    out_specs = [pl.BlockSpec((1, Mr, N), lambda b: (b, 0, 0))]
    if with_stats:
        out_shape.append(jax.ShapeDtypeStruct((B, 2, N), jnp.float32))
        out_specs.append(pl.BlockSpec((1, 2, N), lambda b: (b, 0, 0)))
    return pl.pallas_call(
        kern,
        out_shape=tuple(out_shape) if with_stats else out_shape[0],
        grid=(B,),
        in_specs=[pl.BlockSpec((1, Lp, Cin), lambda b: (b, 0, 0)),
                  pl.BlockSpec((9 * Cin, N), lambda b: (0, 0))],
        out_specs=tuple(out_specs) if with_stats else out_specs[0],
        compiler_params=pltpu.CompilerParams(dimension_semantics=("parallel",)),
    )(x2, wm)


def _affine_act_kernel(x_ref, s_ref, b_ref, o_ref, *, act):
    y = x_ref[0].astype(jnp.float32) * s_ref[...] + b_ref[...]
    if act == "relu":
        y = jnp.maximum(y, 0.0)
    elif act == "tanh":
        y = jnp.tanh(y)
    o_ref[0] = y.astype(o_ref.dtype)


def pallas_affine_act(x3, scale_cols, shift_cols, *, act, out_dtype):
    """Per-column affine (folded BatchNorm) + activation over (B, L, C)."""
    B, L, C = x3.shape
    kern = functools.partial(_affine_act_kernel, act=act)
    return pl.pallas_call(
        kern,
        out_shape=jax.ShapeDtypeStruct((B, L, C), out_dtype),
        grid=(B,),
        in_specs=[pl.BlockSpec((1, L, C), lambda b: (b, 0, 0)),
                  pl.BlockSpec((1, C), lambda b: (0, 0)),
                  pl.BlockSpec((1, C), lambda b: (0, 0))],
        out_specs=pl.BlockSpec((1, L, C), lambda b: (b, 0, 0)),
        compiler_params=pltpu.CompilerParams(dimension_semantics=("parallel",)),
    )(x3, scale_cols.reshape(1, C).astype(jnp.float32),
      shift_cols.reshape(1, C).astype(jnp.float32))


# ---------------------------------------------------------------------------
# Weight preparation (PyTorch ConvTranspose2d layout -> GEMM-ready matrices)
# ---------------------------------------------------------------------------

def _build_head_weight(w_img, w_lab):
    """Merged block-diagonal weight for the two 1x1-spatial head branches.

    w_img: (nz, Cg, 4, 4), w_lab: (num_classes, Cg, 4, 4)
    returns (nz + num_classes, 16 * 2*Cg), column layout (kh, kw, [img_ch|lab_ch]).
    """
    wi = jnp.transpose(w_img, (0, 2, 3, 1))                      # (nz, 4, 4, Cg)
    wl = jnp.transpose(w_lab, (0, 2, 3, 1))                      # (ncls, 4, 4, Cg)
    wi_full = jnp.concatenate([wi, jnp.zeros_like(wi)], axis=-1)  # (nz, 4, 4, 2Cg)
    wl_full = jnp.concatenate([jnp.zeros_like(wl), wl], axis=-1)  # (ncls, 4, 4, 2Cg)
    w = jnp.concatenate([wi_full, wl_full], axis=0)
    return w.reshape(w.shape[0], -1)


def _build_deconv_weight(w_ct):
    """Subpixel weight matrix for ConvTranspose2d(k=4, s=2, p=1).

    w_ct: (Cin, Cout, 4, 4)  ->  (9*Cin, 4*Cout), tap-major rows (dh, dw),
    phase-major columns (r, c, co).  Output phase (r, c) at block (m, n) reads
    padded input pixel (m-1+dh, n-1+dw) with kernel tap (kh, kw) = (r-2dh+3, c-2dw+3).
    """
    Cin, Cout = w_ct.shape[0], w_ct.shape[1]
    taps = []
    for dh in range(3):
        for dw in range(3):
            cols = []
            for r in range(2):
                for c in range(2):
                    kh = r - 2 * dh + 3
                    kw = c - 2 * dw + 3
                    if 0 <= kh <= 3 and 0 <= kw <= 3:
                        cols.append(w_ct[:, :, kh, kw])
                    else:
                        cols.append(jnp.zeros((Cin, Cout), w_ct.dtype))
            taps.append(jnp.concatenate(cols, axis=1))            # (Cin, 4*Cout)
    return jnp.concatenate(taps, axis=0)                          # (9*Cin, 4*Cout)


# ---------------------------------------------------------------------------
# Layer wrappers (pad / pixel-shuffle layout plumbing + tiny BN-stat glue)
# ---------------------------------------------------------------------------

def _pad_and_flatten(h):
    """NHWC -> (B, (H+3)*(W+2), Cin): pad 1 (top/left/right), 2 (bottom), flatten."""
    B, H, W, Cin = h.shape
    xp = jnp.pad(h, ((0, 0), (1, 2), (1, 1), (0, 0)))
    return xp.reshape(B, (H + 3) * (W + 2), Cin)


def _pixel_shuffle(raw, B, H, W, Cout):
    """(B, H*(W+2), 4*Cout) raw GEMM output -> (B, 2H, 2W, Cout) NHWC."""
    y = raw.reshape(B, H, W + 2, 2, 2, Cout)[:, :, :W]
    return jnp.transpose(y, (0, 1, 3, 2, 4, 5)).reshape(B, 2 * H, 2 * W, Cout)


def _deconv_bn_relu_layer(h, wm, gamma, beta):
    B, H, W, Cin = h.shape
    Cout = wm.shape[1] // 4
    x2 = _pad_and_flatten(h)
    raw, stats = pallas_deconv_s2(x2, wm, H=H, W=W, Cin=Cin, Cout=Cout,
                                  act=None, with_stats=True)
    # fold per-column partial stats (sum, sum_sq) into per-channel scale/shift
    n = B * H * W * 4
    csum = jnp.sum(stats[:, 0, :], axis=0).reshape(4, Cout).sum(axis=0)
    csq = jnp.sum(stats[:, 1, :], axis=0).reshape(4, Cout).sum(axis=0)
    mean = csum / n
    var = csq / n - mean * mean                       # biased (training-mode) var
    scale_c = gamma * jax.lax.rsqrt(var + _BN_EPS)
    shift_c = beta - mean * scale_c
    y = pallas_affine_act(raw, jnp.tile(scale_c, 4), jnp.tile(shift_c, 4),
                          act="relu", out_dtype=jnp.bfloat16)
    return _pixel_shuffle(y, B, H, W, Cout)


def _deconv_tanh_layer(h, wm):
    B, H, W, Cin = h.shape
    Cout = wm.shape[1] // 4
    x2 = _pad_and_flatten(h)
    raw = pallas_deconv_s2(x2, wm, H=H, W=W, Cin=Cin, Cout=Cout,
                           act="tanh", with_stats=False)
    return _pixel_shuffle(raw, B, H, W, Cout)


# ---------------------------------------------------------------------------
# Generator parameters + forward
# ---------------------------------------------------------------------------

def init_generator_params(key, nz, ngf, nc):
    ks = jax.random.split(key, 5)
    std = 0.02  # DCGAN-style init
    return {
        "w_img": jax.random.normal(ks[0], (nz, ngf * 8, 4, 4), jnp.float32) * std,
        "w_lab": jax.random.normal(ks[1], (num_classes, ngf * 8, 4, 4), jnp.float32) * std,
        "w1": jax.random.normal(ks[2], (ngf * 16, ngf * 8, 4, 4), jnp.float32) * std,
        "w2": jax.random.normal(ks[3], (ngf * 8, ngf * 4, 4, 4), jnp.float32) * std,
        "w3": jax.random.normal(ks[4], (ngf * 4, nc, 4, 4), jnp.float32) * std,
        # BatchNorm affine params (PyTorch default: gamma=1, beta=0)
        "g_img": jnp.ones((ngf * 8,), jnp.float32), "b_img": jnp.zeros((ngf * 8,), jnp.float32),
        "g_lab": jnp.ones((ngf * 8,), jnp.float32), "b_lab": jnp.zeros((ngf * 8,), jnp.float32),
        "g1": jnp.ones((ngf * 8,), jnp.float32), "b1": jnp.zeros((ngf * 8,), jnp.float32),
        "g2": jnp.ones((ngf * 4,), jnp.float32), "b2": jnp.zeros((ngf * 4,), jnp.float32),
    }


def prepare_params(p):
    """One-time conversion of PyTorch-layout weights to GEMM-ready bf16 matrices."""
    return {
        "w_head": _build_head_weight(p["w_img"], p["w_lab"]).astype(jnp.bfloat16),
        "w1m": _build_deconv_weight(p["w1"]).astype(jnp.bfloat16),
        "w2m": _build_deconv_weight(p["w2"]).astype(jnp.bfloat16),
        "w3m": _build_deconv_weight(p["w3"]).astype(jnp.bfloat16),
        "g_head": jnp.concatenate([p["g_img"], p["g_lab"]]),
        "b_head": jnp.concatenate([p["b_img"], p["b_lab"]]),
        "g1": p["g1"], "b1": p["b1"], "g2": p["g2"], "b2": p["b2"],
    }


def generator_forward(prep, image_nchw, label_nchw):
    B = image_nchw.shape[0]
    # merged head GEMM: concat (image | label) along K against block-diag weight
    x = jnp.concatenate(
        [image_nchw.reshape(B, -1), label_nchw.reshape(B, -1)], axis=1
    ).astype(jnp.bfloat16)                                       # (B, nz + num_classes)

    w_head = prep["w_head"]                                      # (K, 16 * 2*ngf*8)
    C0 = w_head.shape[1] // 16                                   # 2 * ngf * 8
    y = pallas_matmul(x, w_head)                                 # (B, 16*C0) f32

    # BN(+ReLU) over the 2*ngf*8 concatenated channels (per-channel stats are
    # identical to normalizing each 1x1-branch separately, as in the reference).
    y3 = y.reshape(B, 16, C0)
    mean = jnp.mean(y3, axis=(0, 1))
    var = jnp.mean(jnp.square(y3), axis=(0, 1)) - jnp.square(mean)
    scale = prep["g_head"] * jax.lax.rsqrt(var + _BN_EPS)
    shift = prep["b_head"] - mean * scale
    h = pallas_affine_act(y.reshape(B, 1, 16 * C0),
                          jnp.tile(scale, 16), jnp.tile(shift, 16),
                          act="relu", out_dtype=jnp.bfloat16)
    h = h.reshape(B, 4, 4, C0)                                   # NHWC, == torch.cat(dim=1)

    # self.main
    h = _deconv_bn_relu_layer(h, prep["w1m"], prep["g1"], prep["b1"])   # (B, 8, 8, ngf*8)
    h = _deconv_bn_relu_layer(h, prep["w2m"], prep["g2"], prep["b2"])   # (B, 16, 16, ngf*4)
    h = _deconv_tanh_layer(h, prep["w3m"])                              # (B, 32, 32, nc) f32

    return jnp.transpose(h, (0, 3, 1, 2))                               # back to NCHW


# ---------------------------------------------------------------------------
# Main
# ---------------------------------------------------------------------------

if __name__ == "__main__":
    B, nz, ngf, nc = 2, 16, 4, 3

    key = jax.random.PRNGKey(0)
    k_params, k_img, k_lab = jax.random.split(key, 3)

    params = init_generator_params(k_params, nz, ngf, nc)
    prep = prepare_params(params)

    image = jax.random.normal(k_img, (B, nz, 1, 1), jnp.float32)
    label = jax.random.normal(k_lab, (B, num_classes, 1, 1), jnp.float32)

    fwd = jax.jit(generator_forward)
    out = jax.block_until_ready(fwd(prep, image, label))

    assert out.shape == (B, nc, 32, 32), out.shape
    assert bool(jnp.all(jnp.isfinite(out)))
    assert bool(jnp.all(jnp.abs(out) <= 1.0 + 1e-6))  # tanh output range

    print("KERNEL_OK")
</pallas_src>

<mosaic_0001>
module attributes {stable_mosaic.version = 11 : i64} {
  func.func @_matmul_kernel(%arg0: i32, %arg1: memref<2x26xbf16, #tpu.memory_space<vmem>>, %arg2: memref<26x1024xbf16, #tpu.memory_space<vmem>>, %arg3: memref<2x1024xf32, #tpu.memory_space<vmem>>) attributes {dimension_semantics = [#tpu.dimension_semantics<arbitrary>], iteration_bounds = array<i64: 1>, scalar_prefetch = 0 : i64, scratch_operands = 0 : i64, tpu.core_type = #tpu.core_type<tc>, window_params = [{pipeline_mode = #tpu.pipeline_mode<synchronous>, transform_indices = @transform_0, window_bounds = array<i64: 2, 26>}, {pipeline_mode = #tpu.pipeline_mode<synchronous>, transform_indices = @transform_1, window_bounds = array<i64: 26, 1024>}, {pipeline_mode = #tpu.pipeline_mode<synchronous>, transform_indices = @transform_2, window_bounds = array<i64: 2, 1024>}]} {
    %c0 = arith.constant 0 : index
    %c0_0 = arith.constant 0 : index
    %0 = vector.load %arg1[%c0, %c0_0] : memref<2x26xbf16, #tpu.memory_space<vmem>>, vector<2x26xbf16>
    %c0_1 = arith.constant 0 : index
    %c0_2 = arith.constant 0 : index
    %1 = vector.load %arg2[%c0_1, %c0_2] : memref<26x1024xbf16, #tpu.memory_space<vmem>>, vector<26x1024xbf16>
    %cst = arith.constant dense<0.000000e+00> : vector<2x1024xf32>
    %2 = tpu.matmul %0, %1, %cst {dimension_numbers = #tpu.dot_dimension_numbers<[1], [0], [0], [1], [0, 0, 1, 1], [], []>} : vector<2x26xbf16>, vector<26x1024xbf16>, vector<2x1024xf32> -> vector<2x1024xf32>
    %c0_3 = arith.constant 0 : index
    %c0_4 = arith.constant 0 : index
    %3 = vector.load %arg3[%c0_3, %c0_4] : memref<2x1024xf32, #tpu.memory_space<vmem>>, vector<2x1024xf32>
    tpu.vector_store %arg3[%c0_3, %c0_4], %2 {strides = array<i32>} : memref<2x1024xf32, #tpu.memory_space<vmem>>, vector<2x1024xf32>,
    return
  }
  func.func @transform_0(%arg0: i32) -> (i32, i32) {
    %c0_i32 = arith.constant 0 : i32
    %c0_i32_0 = arith.constant 0 : i32
    %c0_i32_1 = arith.constant 0 : i32
    return %c0_i32, %c0_i32_0 : i32, i32
  }
  func.func @transform_1(%arg0: i32) -> (i32, i32) {
    %c0_i32 = arith.constant 0 : i32
    %c0_i32_0 = arith.constant 0 : i32
    %c0_i32_1 = arith.constant 0 : i32
    return %c0_i32, %c0_i32_0 : i32, i32
  }
  func.func @transform_2(%arg0: i32) -> (i32, i32) {
    %c0_i32 = arith.constant 0 : i32
    %c0_i32_0 = arith.constant 0 : i32
    %c0_i32_1 = arith.constant 0 : i32
    return %c0_i32, %c0_i32_0 : i32, i32
  }
}

module attributes {stable_mosaic.version = 11 : i64} {
  func.func @_affine_act_kernel(%arg0: i32, %arg1: memref<1x1x1024xf32, #tpu.memory_space<vmem>>, %arg2: memref<1x1024xf32, #tpu.memory_space<vmem>>, %arg3: memref<1x1024xf32, #tpu.memory_space<vmem>>, %arg4: memref<1x1x1024xbf16, #tpu.memory_space<vmem>>) attributes {dimension_semantics = [#tpu.dimension_semantics<parallel>], iteration_bounds = array<i64: 2>, scalar_prefetch = 0 : i64, scratch_operands = 0 : i64, tpu.core_type = #tpu.core_type<tc>, window_params = [{transform_indices = @transform_0, window_bounds = array<i64: 1, 1, 1024>}, {pipeline_mode = #tpu.pipeline_mode<synchronous>, transform_indices = @transform_1, window_bounds = array<i64: 1, 1024>}, {pipeline_mode = #tpu.pipeline_mode<synchronous>, transform_indices = @transform_2, window_bounds = array<i64: 1, 1024>}, {transform_indices = @transform_3, window_bounds = array<i64: 1, 1, 1024>}]} {
    %c0 = arith.constant 0 : index
    %c0_0 = arith.constant 0 : index
    %c0_1 = arith.constant 0 : index
    %0 = vector.load %arg1[%c0, %c0_0, %c0_1] : memref<1x1x1024xf32, #tpu.memory_space<vmem>>, vector<1x1x1024xf32>
    %1 = vector.shape_cast %0 : vector<1x1x1024xf32> to vector<1x1024xf32>
    %c0_2 = arith.constant 0 : index
    %c0_3 = arith.constant 0 : index
    %2 = vector.load %arg2[%c0_2, %c0_3] : memref<1x1024xf32, #tpu.memory_space<vmem>>, vector<1x1024xf32>
    %3 = arith.mulf %1, %2 : vector<1x1024xf32>
    %c0_4 = arith.constant 0 : index
    %c0_5 = arith.constant 0 : index
    %4 = vector.load %arg3[%c0_4, %c0_5] : memref<1x1024xf32, #tpu.memory_space<vmem>>, vector<1x1024xf32>
    %5 = arith.addf %3, %4 : vector<1x1024xf32>
    %cst = arith.constant 0.000000e+00 : f32
    %6 = vector.broadcast %cst : f32 to vector<1x1024xf32>
    %7 = arith.maximumf %5, %6 : vector<1x1024xf32>
    %8 = arith.truncf %7 : vector<1x1024xf32> to vector<1x1024xbf16>
    %c0_6 = arith.constant 0 : index
    %c0_7 = arith.constant 0 : index
    %c0_8 = arith.constant 0 : index
    %9 = vector.load %arg4[%c0_6, %c0_7, %c0_8] : memref<1x1x1024xbf16, #tpu.memory_space<vmem>>, vector<1x1x1024xbf16>
    %10 = vector.shape_cast %9 : vector<1x1x1024xbf16> to vector<1x1024xbf16>
    %11 = vector.shape_cast %8 : vector<1x1024xbf16> to vector<1x1x1024xbf16>
    tpu.vector_store %arg4[%c0_6, %c0_7, %c0_8], %11 {strides = array<i32>} : memref<1x1x1024xbf16, #tpu.memory_space<vmem>>, vector<1x1x1024xbf16>,
    return
  }
  func.func @transform_0(%arg0: i32) -> (i32, i32, i32) {
    %c0_i32 = arith.constant 0 : i32
    %c0_i32_0 = arith.constant 0 : i32
    %c0_i32_1 = arith.constant 0 : i32
    return %arg0, %c0_i32, %c0_i32_0 : i32, i32, i32
  }
  func.func @transform_1(%arg0: i32) -> (i32, i32) {
    %c0_i32 = arith.constant 0 : i32
    %c0_i32_0 = arith.constant 0 : i32
    %c0_i32_1 = arith.constant 0 : i32
    return %c0_i32, %c0_i32_0 : i32, i32
  }
  func.func @transform_2(%arg0: i32) -> (i32, i32) {
    %c0_i32 = arith.constant 0 : i32
    %c0_i32_0 = arith.constant 0 : i32
    %c0_i32_1 = arith.constant 0 : i32
    return %c0_i32, %c0_i32_0 : i32, i32
  }
  func.func @transform_3(%arg0: i32) -> (i32, i32, i32) {
    %c0_i32 = arith.constant 0 : i32
    %c0_i32_0 = arith.constant 0 : i32
    %c0_i32_1 = arith.constant 0 : i32
    return %arg0, %c0_i32, %c0_i32_0 : i32, i32, i32
  }
}

module attributes {stable_mosaic.version = 11 : i64} {
  func.func @_deconv_s2_kernel(%arg0: i32, %arg1: memref<1x42x64xbf16, #tpu.memory_space<vmem>>, %arg2: memref<576x128xbf16, #tpu.memory_space<vmem>>, %arg3: memref<1x24x128xf32, #tpu.memory_space<vmem>>, %arg4: memref<1x2x128xf32, #tpu.memory_space<vmem>>) attributes {dimension_semantics = [#tpu.dimension_semantics<parallel>], iteration_bounds = array<i64: 2>, scalar_prefetch = 0 : i64, scratch_operands = 0 : i64, tpu.core_type = #tpu.core_type<tc>, window_params = [{transform_indices = @transform_0, window_bounds = array<i64: 1, 42, 64>}, {pipeline_mode = #tpu.pipeline_mode<synchronous>, transform_indices = @transform_1, window_bounds = array<i64: 576, 128>}, {transform_indices = @transform_2, window_bounds = array<i64: 1, 24, 128>}, {transform_indices = @transform_3, window_bounds = array<i64: 1, 2, 128>}]} {
    %cst = arith.constant 0.000000e+00 : f32
    %0 = vector.broadcast %cst : f32 to vector<24x128xf32>
    %c0 = arith.constant 0 : index
    %c0_0 = arith.constant 0 : index
    %c0_1 = arith.constant 0 : index
    %1 = vector.load %arg1[%c0, %c0_0, %c0_1] : memref<1x42x64xbf16, #tpu.memory_space<vmem>>, vector<1x24x64xbf16>
    %2 = vector.shape_cast %1 : vector<1x24x64xbf16> to vector<24x64xbf16>
    %c0_2 = arith.constant 0 : index
    %c0_3 = arith.constant 0 : index
    %3 = vector.load %arg2[%c0_2, %c0_3] : memref<576x128xbf16, #tpu.memory_space<vmem>>, vector<64x128xbf16>
    %cst_4 = arith.constant dense<0.000000e+00> : vector<24x128xf32>
    %4 = tpu.matmul %2, %3, %cst_4 {dimension_numbers = #tpu.dot_dimension_numbers<[1], [0], [0], [1], [0, 0, 1, 1], [], []>} : vector<24x64xbf16>, vector<64x128xbf16>, vector<24x128xf32> -> vector<24x128xf32>
    %5 = arith.addf %0, %4 : vector<24x128xf32>
    %c0_5 = arith.constant 0 : index
    %c1 = arith.constant 1 : index
    %c0_6 = arith.constant 0 : index
    %6 = vector.load %arg1[%c0_5, %c1, %c0_6] : memref<1x42x64xbf16, #tpu.memory_space<vmem>>, vector<1x24x64xbf16>
    %7 = vector.shape_cast %6 : vector<1x24x64xbf16> to vector<24x64xbf16>
    %c64 = arith.constant 64 : index
    %c0_7 = arith.constant 0 : index
    %8 = vector.load %arg2[%c64, %c0_7] : memref<576x128xbf16, #tpu.memory_space<vmem>>, vector<64x128xbf16>
    %cst_8 = arith.constant dense<0.000000e+00> : vector<24x128xf32>
    %9 = tpu.matmul %7, %8, %cst_8 {dimension_numbers = #tpu.dot_dimension_numbers<[1], [0], [0], [1], [0, 0, 1, 1], [], []>} : vector<24x64xbf16>, vector<64x128xbf16>, vector<24x128xf32> -> vector<24x128xf32>
    %10 = arith.addf %5, %9 : vector<24x128xf32>
    %c0_9 = arith.constant 0 : index
    %c2 = arith.constant 2 : index
    %c0_10 = arith.constant 0 : index
    %11 = vector.load %arg1[%c0_9, %c2, %c0_10] : memref<1x42x64xbf16, #tpu.memory_space<vmem>>, vector<1x24x64xbf16>
    %12 = vector.shape_cast %11 : vector<1x24x64xbf16> to vector<24x64xbf16>
    %c128 = arith.constant 128 : index
    %c0_11 = arith.constant 0 : index
    %13 = vector.load %arg2[%c128, %c0_11] : memref<576x128xbf16, #tpu.memory_space<vmem>>, vector<64x128xbf16>
    %cst_12 = arith.constant dense<0.000000e+00> : vector<24x128xf32>
    %14 = tpu.matmul %12, %13, %cst_12 {dimension_numbers = #tpu.dot_dimension_numbers<[1], [0], [0], [1], [0, 0, 1, 1], [], []>} : vector<24x64xbf16>, vector<64x128xbf16>, vector<24x128xf32> -> vector<24x128xf32>
    %15 = arith.addf %10, %14 : vector<24x128xf32>
    %c0_13 = arith.constant 0 : index
    %c6 = arith.constant 6 : index
    %c0_14 = arith.constant 0 : index
    %16 = vector.load %arg1[%c0_13, %c6, %c0_14] : memref<1x42x64xbf16, #tpu.memory_space<vmem>>, vector<1x24x64xbf16>
    %17 = vector.shape_cast %16 : vector<1x24x64xbf16> to vector<24x64xbf16>
    %c192 = arith.constant 192 : index
    %c0_15 = arith.constant 0 : index
    %18 = vector.load %arg2[%c192, %c0_15] : memref<576x128xbf16, #tpu.memory_space<vmem>>, vector<64x128xbf16>
    %cst_16 = arith.constant dense<0.000000e+00> : vector<24x128xf32>
    %19 = tpu.matmul %17, %18, %cst_16 {dimension_numbers = #tpu.dot_dimension_numbers<[1], [0], [0], [1], [0, 0, 1, 1], [], []>} : vector<24x64xbf16>, vector<64x128xbf16>, vector<24x128xf32> -> vector<24x128xf32>
    %20 = arith.addf %15, %19 : vector<24x128xf32>
    %c0_17 = arith.constant 0 : index
    %c7 = arith.constant 7 : index
    %c0_18 = arith.constant 0 : index
    %21 = vector.load %arg1[%c0_17, %c7, %c0_18] : memref<1x42x64xbf16, #tpu.memory_space<vmem>>, vector<1x24x64xbf16>
    %22 = vector.shape_cast %21 : vector<1x24x64xbf16> to vector<24x64xbf16>
    %c256 = arith.constant 256 : index
    %c0_19 = arith.constant 0 : index
    %23 = vector.load %arg2[%c256, %c0_19] : memref<576x128xbf16, #tpu.memory_space<vmem>>, vector<64x128xbf16>
    %cst_20 = arith.constant dense<0.000000e+00> : vector<24x128xf32>
    %24 = tpu.matmul %22, %23, %cst_20 {dimension_numbers = #tpu.dot_dimension_numbers<[1], [0], [0], [1], [0, 0, 1, 1], [], []>} : vector<24x64xbf16>, vector<64x128xbf16>, vector<24x128xf32> -> vector<24x128xf32>
    %25 = arith.addf %20, %24 : vector<24x128xf32>
    %c0_21 = arith.constant 0 : index
    %c8 = arith.constant 8 : index
    %c0_22 = arith.constant 0 : index
    %26 = vector.load %arg1[%c0_21, %c8, %c0_22] : memref<1x42x64xbf16, #tpu.memory_space<vmem>>, vector<1x24x64xbf16>
    %27 = vector.shape_cast %26 : vector<1x24x64xbf16> to vector<24x64xbf16>
    %c320 = arith.constant 320 : index
    %c0_23 = arith.constant 0 : index
    %28 = vector.load %arg2[%c320, %c0_23] : memref<576x128xbf16, #tpu.memory_space<vmem>>, vector<64x128xbf16>
    %cst_24 = arith.constant dense<0.000000e+00> : vector<24x128xf32>
    %29 = tpu.matmul %27, %28, %cst_24 {dimension_numbers = #tpu.dot_dimension_numbers<[1], [0], [0], [1], [0, 0, 1, 1], [], []>} : vector<24x64xbf16>, vector<64x128xbf16>, vector<24x128xf32> -> vector<24x128xf32>
    %30 = arith.addf %25, %29 : vector<24x128xf32>
    %c0_25 = arith.constant 0 : index
    %c12 = arith.constant 12 : index
    %c0_26 = arith.constant 0 : index
    %31 = vector.load %arg1[%c0_25, %c12, %c0_26] : memref<1x42x64xbf16, #tpu.memory_space<vmem>>, vector<1x24x64xbf16>
    %32 = vector.shape_cast %31 : vector<1x24x64xbf16> to vector<24x64xbf16>
    %c384 = arith.constant 384 : index
    %c0_27 = arith.constant 0 : index
    %33 = vector.load %arg2[%c384, %c0_27] : memref<576x128xbf16, #tpu.memory_space<vmem>>, vector<64x128xbf16>
    %cst_28 = arith.constant dense<0.000000e+00> : vector<24x128xf32>
    %34 = tpu.matmul %32, %33, %cst_28 {dimension_numbers = #tpu.dot_dimension_numbers<[1], [0], [0], [1], [0, 0, 1, 1], [], []>} : vector<24x64xbf16>, vector<64x128xbf16>, vector<24x128xf32> -> vector<24x128xf32>
    %35 = arith.addf %30, %34 : vector<24x128xf32>
    %c0_29 = arith.constant 0 : index
    %c13 = arith.constant 13 : index
    %c0_30 = arith.constant 0 : index
    %36 = vector.load %arg1[%c0_29, %c13, %c0_30] : memref<1x42x64xbf16, #tpu.memory_space<vmem>>, vector<1x24x64xbf16>
    %37 = vector.shape_cast %36 : vector<1x24x64xbf16> to vector<24x64xbf16>
    %c448 = arith.constant 448 : index
    %c0_31 = arith.constant 0 : index
    %38 = vector.load %arg2[%c448, %c0_31] : memref<576x128xbf16, #tpu.memory_space<vmem>>, vector<64x128xbf16>
    %cst_32 = arith.constant dense<0.000000e+00> : vector<24x128xf32>
    %39 = tpu.matmul %37, %38, %cst_32 {dimension_numbers = #tpu.dot_dimension_numbers<[1], [0], [0], [1], [0, 0, 1, 1], [], []>} : vector<24x64xbf16>, vector<64x128xbf16>, vector<24x128xf32> -> vector<24x128xf32>
    %40 = arith.addf %35, %39 : vector<24x128xf32>
    %c0_33 = arith.constant 0 : index
    %c14 = arith.constant 14 : index
    %c0_34 = arith.constant 0 : index
    %41 = vector.load %arg1[%c0_33, %c14, %c0_34] : memref<1x42x64xbf16, #tpu.memory_space<vmem>>, vector<1x24x64xbf16>
    %42 = vector.shape_cast %41 : vector<1x24x64xbf16> to vector<24x64xbf16>
    %c512 = arith.constant 512 : index
    %c0_35 = arith.constant 0 : index
    %43 = vector.load %arg2[%c512, %c0_35] : memref<576x128xbf16, #tpu.memory_space<vmem>>, vector<64x128xbf16>
    %cst_36 = arith.constant dense<0.000000e+00> : vector<24x128xf32>
    %44 = tpu.matmul %42, %43, %cst_36 {dimension_numbers = #tpu.dot_dimension_numbers<[1], [0], [0], [1], [0, 0, 1, 1], [], []>} : vector<24x64xbf16>, vector<64x128xbf16>, vector<24x128xf32> -> vector<24x128xf32>
    %45 = arith.addf %40, %44 : vector<24x128xf32>
    %46 = tpu.iota {dimensions = array<i32: 0>} : vector<24x1xi32>
    %c6_i32 = arith.constant 6 : i32
    %c0_i32 = arith.constant 0 : i32
    %47 = arith.cmpi eq, %c6_i32, %c0_i32 : i32
    %c1_i32 = arith.constant 1 : i32
    %48 = arith.select %47, %c1_i32, %c6_i32 : i32
    %49 = vector.broadcast %48 : i32 to vector<24x1xi32>
    %50 = arith.remsi %46, %49 : vector<24x1xi32>
    %c0_i32_37 = arith.constant 0 : i32
    %51 = vector.broadcast %c0_i32_37 : i32 to vector<24x1xi32>
    %52 = arith.cmpi ne, %50, %51 : vector<24x1xi32>
    %c0_i32_38 = arith.constant 0 : i32
    %53 = vector.broadcast %c0_i32_38 : i32 to vector<24x1xi32>
    %54 = arith.cmpi slt, %50, %53 : vector<24x1xi32>
    %c0_i32_39 = arith.constant 0 : i32
    %55 = arith.cmpi slt, %48, %c0_i32_39 : i32
    %56 = vector.broadcast %55 : i1 to vector<24x1xi1>
    %57 = vector.broadcast %56 : vector<24x1xi1> to vector<24x1xi1>
    %58 = arith.xori %54, %57 : vector<24x1xi1>
    %59 = arith.andi %58, %52 : vector<24x1xi1>
    %60 = vector.broadcast %48 : i32 to vector<24x1xi32>
    %61 = arith.addi %50, %60 : vector<24x1xi32>
    %62 = arith.select %59, %61, %50 : vector<24x1xi1>, vector<24x1xi32>
    %c4_i32 = arith.constant 4 : i32
    %63 = vector.broadcast %c4_i32 : i32 to vector<24x1xi32>
    %64 = arith.cmpi slt, %62, %63 : vector<24x1xi32>
    %cst_40 = arith.constant 0.000000e+00 : f32
    %65 = vector.shape_cast %64 : vector<24x1xi1> to vector<24x1xi1>
    %66 = vector.broadcast %65 : vector<24x1xi1> to vector<24x128xi1>
    %67 = vector.broadcast %cst_40 : f32 to vector<24x128xf32>
    %68 = arith.select %66, %45, %67 : vector<24x128xi1>, vector<24x128xf32>
    %c0_41 = arith.constant 0 : index
    %c0_42 = arith.constant 0 : index
    %c0_43 = arith.constant 0 : index
    %69 = vector.load %arg3[%c0_41, %c0_42, %c0_43] : memref<1x24x128xf32, #tpu.memory_space<vmem>>, vector<1x24x128xf32>
    %70 = vector.shape_cast %69 : vector<1x24x128xf32> to vector<24x128xf32>
    %71 = vector.shape_cast %68 : vector<24x128xf32> to vector<1x24x128xf32>
    tpu.vector_store %arg3[%c0_41, %c0_42, %c0_43], %71 {strides = array<i32>} : memref<1x24x128xf32, #tpu.memory_space<vmem>>, vector<1x24x128xf32>,
    %cst_44 = arith.constant dense<0.000000e+00> : vector<128xf32>
    %72 = vector.multi_reduction <add>, %68, %cst_44 [0] : vector<24x128xf32> to vector<128xf32>
    %73 = vector.shape_cast %72 : vector<128xf32> to vector<1x128xf32>
    %74 = arith.mulf %68, %68 : vector<24x128xf32>
    %cst_45 = arith.constant dense<0.000000e+00> : vector<128xf32>
    %75 = vector.multi_reduction <add>, %74, %cst_45 [0] : vector<24x128xf32> to vector<128xf32>
    %76 = vector.shape_cast %75 : vector<128xf32> to vector<1x128xf32>
    %77 = tpu.concatenate %73, %76 in 0 : vector<1x128xf32>, vector<1x128xf32> -> vector<2x128xf32>
    %c0_46 = arith.constant 0 : index
    %c0_47 = arith.constant 0 : index
    %c0_48 = arith.constant 0 : index
    %78 = vector.load %arg4[%c0_46, %c0_47, %c0_48] : memref<1x2x128xf32, #tpu.memory_space<vmem>>, vector<1x2x128xf32>
    %79 = vector.shape_cast %78 : vector<1x2x128xf32> to vector<2x128xf32>
    %80 = vector.shape_cast %77 : vector<2x128xf32> to vector<1x2x128xf32>
    tpu.vector_store %arg4[%c0_46, %c0_47, %c0_48], %80 {strides = array<i32>} : memref<1x2x128xf32, #tpu.memory_space<vmem>>, vector<1x2x128xf32>,
    return
  }
  func.func @transform_0(%arg0: i32) -> (i32, i32, i32) {
    %c0_i32 = arith.constant 0 : i32
    %c0_i32_0 = arith.constant 0 : i32
    %c0_i32_1 = arith.constant 0 : i32
    return %arg0, %c0_i32, %c0_i32_0 : i32, i32, i32
  }
  func.func @transform_1(%arg0: i32) -> (i32, i32) {
    %c0_i32 = arith.constant 0 : i32
    %c0_i32_0 = arith.constant 0 : i32
    %c0_i32_1 = arith.constant 0 : i32
    return %c0_i32, %c0_i32_0 : i32, i32
  }
  func.func @transform_2(%arg0: i32) -> (i32, i32, i32) {
    %c0_i32 = arith.constant 0 : i32
    %c0_i32_0 = arith.constant 0 : i32
    %c0_i32_1 = arith.constant 0 : i32
    return %arg0, %c0_i32, %c0_i32_0 : i32, i32, i32
  }
  func.func @transform_3(%arg0: i32) -> (i32, i32, i32) {
    %c0_i32 = arith.constant 0 : i32
    %c0_i32_0 = arith.constant 0 : i32
    %c0_i32_1 = arith.constant 0 : i32
    return %arg0, %c0_i32, %c0_i32_0 : i32, i32, i32
  }
}

module attributes {stable_mosaic.version = 11 : i64} {
  func.func @_affine_act_kernel(%arg0: i32, %arg1: memref<1x24x128xf32, #tpu.memory_space<vmem>>, %arg2: memref<1x128xf32, #tpu.memory_space<vmem>>, %arg3: memref<1x128xf32, #tpu.memory_space<vmem>>, %arg4: memref<1x24x128xbf16, #tpu.memory_space<vmem>>) attributes {dimension_semantics = [#tpu.dimension_semantics<parallel>], iteration_bounds = array<i64: 2>, scalar_prefetch = 0 : i64, scratch_operands = 0 : i64, tpu.core_type = #tpu.core_type<tc>, window_params = [{transform_indices = @transform_0, window_bounds = array<i64: 1, 24, 128>}, {pipeline_mode = #tpu.pipeline_mode<synchronous>, transform_indices = @transform_1, window_bounds = array<i64: 1, 128>}, {pipeline_mode = #tpu.pipeline_mode<synchronous>, transform_indices = @transform_2, window_bounds = array<i64: 1, 128>}, {transform_indices = @transform_3, window_bounds = array<i64: 1, 24, 128>}]} {
    %c0 = arith.constant 0 : index
    %c0_0 = arith.constant 0 : index
    %c0_1 = arith.constant 0 : index
    %0 = vector.load %arg1[%c0, %c0_0, %c0_1] : memref<1x24x128xf32, #tpu.memory_space<vmem>>, vector<1x24x128xf32>
    %1 = vector.shape_cast %0 : vector<1x24x128xf32> to vector<24x128xf32>
    %c0_2 = arith.constant 0 : index
    %c0_3 = arith.constant 0 : index
    %2 = vector.load %arg2[%c0_2, %c0_3] : memref<1x128xf32, #tpu.memory_space<vmem>>, vector<1x128xf32>
    %3 = vector.broadcast %2 : vector<1x128xf32> to vector<24x128xf32>
    %4 = arith.mulf %1, %3 : vector<24x128xf32>
    %c0_4 = arith.constant 0 : index
    %c0_5 = arith.constant 0 : index
    %5 = vector.load %arg3[%c0_4, %c0_5] : memref<1x128xf32, #tpu.memory_space<vmem>>, vector<1x128xf32>
    %6 = vector.broadcast %5 : vector<1x128xf32> to vector<24x128xf32>
    %7 = arith.addf %4, %6 : vector<24x128xf32>
    %cst = arith.constant 0.000000e+00 : f32
    %8 = vector.broadcast %cst : f32 to vector<24x128xf32>
    %9 = arith.maximumf %7, %8 : vector<24x128xf32>
    %10 = arith.truncf %9 : vector<24x128xf32> to vector<24x128xbf16>
    %c0_6 = arith.constant 0 : index
    %c0_7 = arith.constant 0 : index
    %c0_8 = arith.constant 0 : index
    %11 = vector.load %arg4[%c0_6, %c0_7, %c0_8] : memref<1x24x128xbf16, #tpu.memory_space<vmem>>, vector<1x24x128xbf16>
    %12 = vector.shape_cast %11 : vector<1x24x128xbf16> to vector<24x128xbf16>
    %13 = vector.shape_cast %10 : vector<24x128xbf16> to vector<1x24x128xbf16>
    tpu.vector_store %arg4[%c0_6, %c0_7, %c0_8], %13 {strides = array<i32>} : memref<1x24x128xbf16, #tpu.memory_space<vmem>>, vector<1x24x128xbf16>,
    return
  }
  func.func @transform_0(%arg0: i32) -> (i32, i32, i32) {
    %c0_i32 = arith.constant 0 : i32
    %c0_i32_0 = arith.constant 0 : i32
    %c0_i32_1 = arith.constant 0 : i32
    return %arg0, %c0_i32, %c0_i32_0 : i32, i32, i32
  }
  func.func @transform_1(%arg0: i32) -> (i32, i32) {
    %c0_i32 = arith.constant 0 : i32
    %c0_i32_0 = arith.constant 0 : i32
    %c0_i32_1 = arith.constant 0 : i32
    return %c0_i32, %c0_i32_0 : i32, i32
  }
  func.func @transform_2(%arg0: i32) -> (i32, i32) {
    %c0_i32 = arith.constant 0 : i32
    %c0_i32_0 = arith.constant 0 : i32
    %c0_i32_1 = arith.constant 0 : i32
    return %c0_i32, %c0_i32_0 : i32, i32
  }
  func.func @transform_3(%arg0: i32) -> (i32, i32, i32) {
    %c0_i32 = arith.constant 0 : i32
    %c0_i32_0 = arith.constant 0 : i32
    %c0_i32_1 = arith.constant 0 : i32
    return %arg0, %c0_i32, %c0_i32_0 : i32, i32, i32
  }
}

module attributes {stable_mosaic.version = 11 : i64} {
  func.func @_affine_act_kernel(%arg0: i32, %arg1: memref<1x80x64xf32, #tpu.memory_space<vmem>>, %arg2: memref<1x64xf32, #tpu.memory_space<vmem>>, %arg3: memref<1x64xf32, #tpu.memory_space<vmem>>, %arg4: memref<1x80x64xbf16, #tpu.memory_space<vmem>>) attributes {dimension_semantics = [#tpu.dimension_semantics<parallel>], iteration_bounds = array<i64: 2>, scalar_prefetch = 0 : i64, scratch_operands = 0 : i64, tpu.core_type = #tpu.core_type<tc>, window_params = [{transform_indices = @transform_0, window_bounds = array<i64: 1, 80, 64>}, {pipeline_mode = #tpu.pipeline_mode<synchronous>, transform_indices = @transform_1, window_bounds = array<i64: 1, 64>}, {pipeline_mode = #tpu.pipeline_mode<synchronous>, transform_indices = @transform_2, window_bounds = array<i64: 1, 64>}, {transform_indices = @transform_3, window_bounds = array<i64: 1, 80, 64>}]} {
    %c0 = arith.constant 0 : index
    %c0_0 = arith.constant 0 : index
    %c0_1 = arith.constant 0 : index
    %0 = vector.load %arg1[%c0, %c0_0, %c0_1] : memref<1x80x64xf32, #tpu.memory_space<vmem>>, vector<1x80x64xf32>
    %1 = vector.shape_cast %0 : vector<1x80x64xf32> to vector<80x64xf32>
    %c0_2 = arith.constant 0 : index
    %c0_3 = arith.constant 0 : index
    %2 = vector.load %arg2[%c0_2, %c0_3] : memref<1x64xf32, #tpu.memory_space<vmem>>, vector<1x64xf32>
    %3 = vector.broadcast %2 : vector<1x64xf32> to vector<80x64xf32>
    %4 = arith.mulf %1, %3 : vector<80x64xf32>
    %c0_4 = arith.constant 0 : index
    %c0_5 = arith.constant 0 : index
    %5 = vector.load %arg3[%c0_4, %c0_5] : memref<1x64xf32, #tpu.memory_space<vmem>>, vector<1x64xf32>
    %6 = vector.broadcast %5 : vector<1x64xf32> to vector<80x64xf32>
    %7 = arith.addf %4, %6 : vector<80x64xf32>
    %cst = arith.constant 0.000000e+00 : f32
    %8 = vector.broadcast %cst : f32 to vector<80x64xf32>
    %9 = arith.maximumf %7, %8 : vector<80x64xf32>
    %10 = arith.truncf %9 : vector<80x64xf32> to vector<80x64xbf16>
    %c0_6 = arith.constant 0 : index
    %c0_7 = arith.constant 0 : index
    %c0_8 = arith.constant 0 : index
    %11 = vector.load %arg4[%c0_6, %c0_7, %c0_8] : memref<1x80x64xbf16, #tpu.memory_space<vmem>>, vector<1x80x64xbf16>
    %12 = vector.shape_cast %11 : vector<1x80x64xbf16> to vector<80x64xbf16>
    %13 = vector.shape_cast %10 : vector<80x64xbf16> to vector<1x80x64xbf16>
    tpu.vector_store %arg4[%c0_6, %c0_7, %c0_8], %13 {strides = array<i32>} : memref<1x80x64xbf16, #tpu.memory_space<vmem>>, vector<1x80x64xbf16>,
    return
  }
  func.func @transform_0(%arg0: i32) -> (i32, i32, i32) {
    %c0_i32 = arith.constant 0 : i32
    %c0_i32_0 = arith.constant 0 : i32
    %c0_i32_1 = arith.constant 0 : i32
    return %arg0, %c0_i32, %c0_i32_0 : i32, i32, i32
  }
  func.func @transform_1(%arg0: i32) -> (i32, i32) {
    %c0_i32 = arith.constant 0 : i32
    %c0_i32_0 = arith.constant 0 : i32
    %c0_i32_1 = arith.constant 0 : i32
    return %c0_i32, %c0_i32_0 : i32, i32
  }
  func.func @transform_2(%arg0: i32) -> (i32, i32) {
    %c0_i32 = arith.constant 0 : i32
    %c0_i32_0 = arith.constant 0 : i32
    %c0_i32_1 = arith.constant 0 : i32
    return %c0_i32, %c0_i32_0 : i32, i32
  }
  func.func @transform_3(%arg0: i32) -> (i32, i32, i32) {
    %c0_i32 = arith.constant 0 : i32
    %c0_i32_0 = arith.constant 0 : i32
    %c0_i32_1 = arith.constant 0 : i32
    return %arg0, %c0_i32, %c0_i32_0 : i32, i32, i32
  }
}

module attributes {stable_mosaic.version = 11 : i64} {
  func.func @_deconv_s2_kernel(%arg0: i32, %arg1: memref<1x110x32xbf16, #tpu.memory_space<vmem>>, %arg2: memref<288x64xbf16, #tpu.memory_space<vmem>>, %arg3: memref<1x80x64xf32, #tpu.memory_space<vmem>>, %arg4: memref<1x2x64xf32, #tpu.memory_space<vmem>>) attributes {dimension_semantics = [#tpu.dimension_semantics<parallel>], iteration_bounds = array<i64: 2>, scalar_prefetch = 0 : i64, scratch_operands = 0 : i64, tpu.core_type = #tpu.core_type<tc>, window_params = [{transform_indices = @transform_0, window_bounds = array<i64: 1, 110, 32>}, {pipeline_mode = #tpu.pipeline_mode<synchronous>, transform_indices = @transform_1, window_bounds = array<i64: 288, 64>}, {transform_indices = @transform_2, window_bounds = array<i64: 1, 80, 64>}, {transform_indices = @transform_3, window_bounds = array<i64: 1, 2, 64>}]} {
    %cst = arith.constant 0.000000e+00 : f32
    %0 = vector.broadcast %cst : f32 to vector<80x64xf32>
    %c0 = arith.constant 0 : index
    %c0_0 = arith.constant 0 : index
    %c0_1 = arith.constant 0 : index
    %1 = vector.load %arg1[%c0, %c0_0, %c0_1] : memref<1x110x32xbf16, #tpu.memory_space<vmem>>, vector<1x80x32xbf16>
    %2 = vector.shape_cast %1 : vector<1x80x32xbf16> to vector<80x32xbf16>
    %c0_2 = arith.constant 0 : index
    %c0_3 = arith.constant 0 : index
    %3 = vector.load %arg2[%c0_2, %c0_3] : memref<288x64xbf16, #tpu.memory_space<vmem>>, vector<32x64xbf16>
    %cst_4 = arith.constant dense<0.000000e+00> : vector<80x64xf32>
    %4 = tpu.matmul %2, %3, %cst_4 {dimension_numbers = #tpu.dot_dimension_numbers<[1], [0], [0], [1], [0, 0, 1, 1], [], []>} : vector<80x32xbf16>, vector<32x64xbf16>, vector<80x64xf32> -> vector<80x64xf32>
    %5 = arith.addf %0, %4 : vector<80x64xf32>
    %c0_5 = arith.constant 0 : index
    %c1 = arith.constant 1 : index
    %c0_6 = arith.constant 0 : index
    %6 = vector.load %arg1[%c0_5, %c1, %c0_6] : memref<1x110x32xbf16, #tpu.memory_space<vmem>>, vector<1x80x32xbf16>
    %7 = vector.shape_cast %6 : vector<1x80x32xbf16> to vector<80x32xbf16>
    %c32 = arith.constant 32 : index
    %c0_7 = arith.constant 0 : index
    %8 = vector.load %arg2[%c32, %c0_7] : memref<288x64xbf16, #tpu.memory_space<vmem>>, vector<32x64xbf16>
    %cst_8 = arith.constant dense<0.000000e+00> : vector<80x64xf32>
    %9 = tpu.matmul %7, %8, %cst_8 {dimension_numbers = #tpu.dot_dimension_numbers<[1], [0], [0], [1], [0, 0, 1, 1], [], []>} : vector<80x32xbf16>, vector<32x64xbf16>, vector<80x64xf32> -> vector<80x64xf32>
    %10 = arith.addf %5, %9 : vector<80x64xf32>
    %c0_9 = arith.constant 0 : index
    %c2 = arith.constant 2 : index
    %c0_10 = arith.constant 0 : index
    %11 = vector.load %arg1[%c0_9, %c2, %c0_10] : memref<1x110x32xbf16, #tpu.memory_space<vmem>>, vector<1x80x32xbf16>
    %12 = vector.shape_cast %11 : vector<1x80x32xbf16> to vector<80x32xbf16>
    %c64 = arith.constant 64 : index
    %c0_11 = arith.constant 0 : index
    %13 = vector.load %arg2[%c64, %c0_11] : memref<288x64xbf16, #tpu.memory_space<vmem>>, vector<32x64xbf16>
    %cst_12 = arith.constant dense<0.000000e+00> : vector<80x64xf32>
    %14 = tpu.matmul %12, %13, %cst_12 {dimension_numbers = #tpu.dot_dimension_numbers<[1], [0], [0], [1], [0, 0, 1, 1], [], []>} : vector<80x32xbf16>, vector<32x64xbf16>, vector<80x64xf32> -> vector<80x64xf32>
    %15 = arith.addf %10, %14 : vector<80x64xf32>
    %c0_13 = arith.constant 0 : index
    %c10 = arith.constant 10 : index
    %c0_14 = arith.constant 0 : index
    %16 = vector.load %arg1[%c0_13, %c10, %c0_14] : memref<1x110x32xbf16, #tpu.memory_space<vmem>>, vector<1x80x32xbf16>
    %17 = vector.shape_cast %16 : vector<1x80x32xbf16> to vector<80x32xbf16>
    %c96 = arith.constant 96 : index
    %c0_15 = arith.constant 0 : index
    %18 = vector.load %arg2[%c96, %c0_15] : memref<288x64xbf16, #tpu.memory_space<vmem>>, vector<32x64xbf16>
    %cst_16 = arith.constant dense<0.000000e+00> : vector<80x64xf32>
    %19 = tpu.matmul %17, %18, %cst_16 {dimension_numbers = #tpu.dot_dimension_numbers<[1], [0], [0], [1], [0, 0, 1, 1], [], []>} : vector<80x32xbf16>, vector<32x64xbf16>, vector<80x64xf32> -> vector<80x64xf32>
    %20 = arith.addf %15, %19 : vector<80x64xf32>
    %c0_17 = arith.constant 0 : index
    %c11 = arith.constant 11 : index
    %c0_18 = arith.constant 0 : index
    %21 = vector.load %arg1[%c0_17, %c11, %c0_18] : memref<1x110x32xbf16, #tpu.memory_space<vmem>>, vector<1x80x32xbf16>
    %22 = vector.shape_cast %21 : vector<1x80x32xbf16> to vector<80x32xbf16>
    %c128 = arith.constant 128 : index
    %c0_19 = arith.constant 0 : index
    %23 = vector.load %arg2[%c128, %c0_19] : memref<288x64xbf16, #tpu.memory_space<vmem>>, vector<32x64xbf16>
    %cst_20 = arith.constant dense<0.000000e+00> : vector<80x64xf32>
    %24 = tpu.matmul %22, %23, %cst_20 {dimension_numbers = #tpu.dot_dimension_numbers<[1], [0], [0], [1], [0, 0, 1, 1], [], []>} : vector<80x32xbf16>, vector<32x64xbf16>, vector<80x64xf32> -> vector<80x64xf32>
    %25 = arith.addf %20, %24 : vector<80x64xf32>
    %c0_21 = arith.constant 0 : index
    %c12 = arith.constant 12 : index
    %c0_22 = arith.constant 0 : index
    %26 = vector.load %arg1[%c0_21, %c12, %c0_22] : memref<1x110x32xbf16, #tpu.memory_space<vmem>>, vector<1x80x32xbf16>
    %27 = vector.shape_cast %26 : vector<1x80x32xbf16> to vector<80x32xbf16>
    %c160 = arith.constant 160 : index
    %c0_23 = arith.constant 0 : index
    %28 = vector.load %arg2[%c160, %c0_23] : memref<288x64xbf16, #tpu.memory_space<vmem>>, vector<32x64xbf16>
    %cst_24 = arith.constant dense<0.000000e+00> : vector<80x64xf32>
    %29 = tpu.matmul %27, %28, %cst_24 {dimension_numbers = #tpu.dot_dimension_numbers<[1], [0], [0], [1], [0, 0, 1, 1], [], []>} : vector<80x32xbf16>, vector<32x64xbf16>, vector<80x64xf32> -> vector<80x64xf32>
    %30 = arith.addf %25, %29 : vector<80x64xf32>
    %c0_25 = arith.constant 0 : index
    %c20 = arith.constant 20 : index
    %c0_26 = arith.constant 0 : index
    %31 = vector.load %arg1[%c0_25, %c20, %c0_26] : memref<1x110x32xbf16, #tpu.memory_space<vmem>>, vector<1x80x32xbf16>
    %32 = vector.shape_cast %31 : vector<1x80x32xbf16> to vector<80x32xbf16>
    %c192 = arith.constant 192 : index
    %c0_27 = arith.constant 0 : index
    %33 = vector.load %arg2[%c192, %c0_27] : memref<288x64xbf16, #tpu.memory_space<vmem>>, vector<32x64xbf16>
    %cst_28 = arith.constant dense<0.000000e+00> : vector<80x64xf32>
    %34 = tpu.matmul %32, %33, %cst_28 {dimension_numbers = #tpu.dot_dimension_numbers<[1], [0], [0], [1], [0, 0, 1, 1], [], []>} : vector<80x32xbf16>, vector<32x64xbf16>, vector<80x64xf32> -> vector<80x64xf32>
    %35 = arith.addf %30, %34 : vector<80x64xf32>
    %c0_29 = arith.constant 0 : index
    %c21 = arith.constant 21 : index
    %c0_30 = arith.constant 0 : index
    %36 = vector.load %arg1[%c0_29, %c21, %c0_30] : memref<1x110x32xbf16, #tpu.memory_space<vmem>>, vector<1x80x32xbf16>
    %37 = vector.shape_cast %36 : vector<1x80x32xbf16> to vector<80x32xbf16>
    %c224 = arith.constant 224 : index
    %c0_31 = arith.constant 0 : index
    %38 = vector.load %arg2[%c224, %c0_31] : memref<288x64xbf16, #tpu.memory_space<vmem>>, vector<32x64xbf16>
    %cst_32 = arith.constant dense<0.000000e+00> : vector<80x64xf32>
    %39 = tpu.matmul %37, %38, %cst_32 {dimension_numbers = #tpu.dot_dimension_numbers<[1], [0], [0], [1], [0, 0, 1, 1], [], []>} : vector<80x32xbf16>, vector<32x64xbf16>, vector<80x64xf32> -> vector<80x64xf32>
    %40 = arith.addf %35, %39 : vector<80x64xf32>
    %c0_33 = arith.constant 0 : index
    %c22 = arith.constant 22 : index
    %c0_34 = arith.constant 0 : index
    %41 = vector.load %arg1[%c0_33, %c22, %c0_34] : memref<1x110x32xbf16, #tpu.memory_space<vmem>>, vector<1x80x32xbf16>
    %42 = vector.shape_cast %41 : vector<1x80x32xbf16> to vector<80x32xbf16>
    %c256 = arith.constant 256 : index
    %c0_35 = arith.constant 0 : index
    %43 = vector.load %arg2[%c256, %c0_35] : memref<288x64xbf16, #tpu.memory_space<vmem>>, vector<32x64xbf16>
    %cst_36 = arith.constant dense<0.000000e+00> : vector<80x64xf32>
    %44 = tpu.matmul %42, %43, %cst_36 {dimension_numbers = #tpu.dot_dimension_numbers<[1], [0], [0], [1], [0, 0, 1, 1], [], []>} : vector<80x32xbf16>, vector<32x64xbf16>, vector<80x64xf32> -> vector<80x64xf32>
    %45 = arith.addf %40, %44 : vector<80x64xf32>
    %46 = tpu.iota {dimensions = array<i32: 0>} : vector<80x1xi32>
    %c10_i32 = arith.constant 10 : i32
    %c0_i32 = arith.constant 0 : i32
    %47 = arith.cmpi eq, %c10_i32, %c0_i32 : i32
    %c1_i32 = arith.constant 1 : i32
    %48 = arith.select %47, %c1_i32, %c10_i32 : i32
    %49 = vector.broadcast %48 : i32 to vector<80x1xi32>
    %50 = arith.remsi %46, %49 : vector<80x1xi32>
    %c0_i32_37 = arith.constant 0 : i32
    %51 = vector.broadcast %c0_i32_37 : i32 to vector<80x1xi32>
    %52 = arith.cmpi ne, %50, %51 : vector<80x1xi32>
    %c0_i32_38 = arith.constant 0 : i32
    %53 = vector.broadcast %c0_i32_38 : i32 to vector<80x1xi32>
    %54 = arith.cmpi slt, %50, %53 : vector<80x1xi32>
    %c0_i32_39 = arith.constant 0 : i32
    %55 = arith.cmpi slt, %48, %c0_i32_39 : i32
    %56 = vector.broadcast %55 : i1 to vector<80x1xi1>
    %57 = vector.broadcast %56 : vector<80x1xi1> to vector<80x1xi1>
    %58 = arith.xori %54, %57 : vector<80x1xi1>
    %59 = arith.andi %58, %52 : vector<80x1xi1>
    %60 = vector.broadcast %48 : i32 to vector<80x1xi32>
    %61 = arith.addi %50, %60 : vector<80x1xi32>
    %62 = arith.select %59, %61, %50 : vector<80x1xi1>, vector<80x1xi32>
    %c8_i32 = arith.constant 8 : i32
    %63 = vector.broadcast %c8_i32 : i32 to vector<80x1xi32>
    %64 = arith.cmpi slt, %62, %63 : vector<80x1xi32>
    %cst_40 = arith.constant 0.000000e+00 : f32
    %65 = vector.shape_cast %64 : vector<80x1xi1> to vector<80x1xi1>
    %66 = vector.broadcast %65 : vector<80x1xi1> to vector<80x64xi1>
    %67 = vector.broadcast %cst_40 : f32 to vector<80x64xf32>
    %68 = arith.select %66, %45, %67 : vector<80x64xi1>, vector<80x64xf32>
    %c0_41 = arith.constant 0 : index
    %c0_42 = arith.constant 0 : index
    %c0_43 = arith.constant 0 : index
    %69 = vector.load %arg3[%c0_41, %c0_42, %c0_43] : memref<1x80x64xf32, #tpu.memory_space<vmem>>, vector<1x80x64xf32>
    %70 = vector.shape_cast %69 : vector<1x80x64xf32> to vector<80x64xf32>
    %71 = vector.shape_cast %68 : vector<80x64xf32> to vector<1x80x64xf32>
    tpu.vector_store %arg3[%c0_41, %c0_42, %c0_43], %71 {strides = array<i32>} : memref<1x80x64xf32, #tpu.memory_space<vmem>>, vector<1x80x64xf32>,
    %cst_44 = arith.constant dense<0.000000e+00> : vector<64xf32>
    %72 = vector.multi_reduction <add>, %68, %cst_44 [0] : vector<80x64xf32> to vector<64xf32>
    %73 = vector.shape_cast %72 : vector<64xf32> to vector<1x64xf32>
    %74 = arith.mulf %68, %68 : vector<80x64xf32>
    %cst_45 = arith.constant dense<0.000000e+00> : vector<64xf32>
    %75 = vector.multi_reduction <add>, %74, %cst_45 [0] : vector<80x64xf32> to vector<64xf32>
    %76 = vector.shape_cast %75 : vector<64xf32> to vector<1x64xf32>
    %77 = tpu.concatenate %73, %76 in 0 : vector<1x64xf32>, vector<1x64xf32> -> vector<2x64xf32>
    %c0_46 = arith.constant 0 : index
    %c0_47 = arith.constant 0 : index
    %c0_48 = arith.constant 0 : index
    %78 = vector.load %arg4[%c0_46, %c0_47, %c0_48] : memref<1x2x64xf32, #tpu.memory_space<vmem>>, vector<1x2x64xf32>
    %79 = vector.shape_cast %78 : vector<1x2x64xf32> to vector<2x64xf32>
    %80 = vector.shape_cast %77 : vector<2x64xf32> to vector<1x2x64xf32>
    tpu.vector_store %arg4[%c0_46, %c0_47, %c0_48], %80 {strides = array<i32>} : memref<1x2x64xf32, #tpu.memory_space<vmem>>, vector<1x2x64xf32>,
    return
  }
  func.func @transform_0(%arg0: i32) -> (i32, i32, i32) {
    %c0_i32 = arith.constant 0 : i32
    %c0_i32_0 = arith.constant 0 : i32
    %c0_i32_1 = arith.constant 0 : i32
    return %arg0, %c0_i32, %c0_i32_0 : i32, i32, i32
  }
  func.func @transform_1(%arg0: i32) -> (i32, i32) {
    %c0_i32 = arith.constant 0 : i32
    %c0_i32_0 = arith.constant 0 : i32
    %c0_i32_1 = arith.constant 0 : i32
    return %c0_i32, %c0_i32_0 : i32, i32
  }
  func.func @transform_2(%arg0: i32) -> (i32, i32, i32) {
    %c0_i32 = arith.constant 0 : i32
    %c0_i32_0 = arith.constant 0 : i32
    %c0_i32_1 = arith.constant 0 : i32
    return %arg0, %c0_i32, %c0_i32_0 : i32, i32, i32
  }
  func.func @transform_3(%arg0: i32) -> (i32, i32, i32) {
    %c0_i32 = arith.constant 0 : i32
    %c0_i32_0 = arith.constant 0 : i32
    %c0_i32_1 = arith.constant 0 : i32
    return %arg0, %c0_i32, %c0_i32_0 : i32, i32, i32
  }
}

module attributes {stable_mosaic.version = 11 : i64} {
  func.func @_deconv_s2_kernel(%arg0: i32, %arg1: memref<1x342x16xbf16, #tpu.memory_space<vmem>>, %arg2: memref<144x12xbf16, #tpu.memory_space<vmem>>, %arg3: memref<1x288x12xf32, #tpu.memory_space<vmem>>) attributes {dimension_semantics = [#tpu.dimension_semantics<parallel>], iteration_bounds = array<i64: 2>, scalar_prefetch = 0 : i64, scratch_operands = 0 : i64, tpu.core_type = #tpu.core_type<tc>, window_params = [{transform_indices = @transform_0, window_bounds = array<i64: 1, 342, 16>}, {pipeline_mode = #tpu.pipeline_mode<synchronous>, transform_indices = @transform_1, window_bounds = array<i64: 144, 12>}, {transform_indices = @transform_2, window_bounds = array<i64: 1, 288, 12>}]} {
    %cst = arith.constant 0.000000e+00 : f32
    %0 = vector.broadcast %cst : f32 to vector<288x12xf32>
    %c0 = arith.constant 0 : index
    %c0_0 = arith.constant 0 : index
    %c0_1 = arith.constant 0 : index
    %1 = vector.load %arg1[%c0, %c0_0, %c0_1] : memref<1x342x16xbf16, #tpu.memory_space<vmem>>, vector<1x288x16xbf16>
    %2 = vector.shape_cast %1 : vector<1x288x16xbf16> to vector<288x16xbf16>
    %c0_2 = arith.constant 0 : index
    %c0_3 = arith.constant 0 : index
    %3 = vector.load %arg2[%c0_2, %c0_3] : memref<144x12xbf16, #tpu.memory_space<vmem>>, vector<16x12xbf16>
    %cst_4 = arith.constant dense<0.000000e+00> : vector<288x12xf32>
    %4 = tpu.matmul %2, %3, %cst_4 {dimension_numbers = #tpu.dot_dimension_numbers<[1], [0], [0], [1], [0, 0, 1, 1], [], []>} : vector<288x16xbf16>, vector<16x12xbf16>, vector<288x12xf32> -> vector<288x12xf32>
    %5 = arith.addf %0, %4 : vector<288x12xf32>
    %c0_5 = arith.constant 0 : index
    %c1 = arith.constant 1 : index
    %c0_6 = arith.constant 0 : index
    %6 = vector.load %arg1[%c0_5, %c1, %c0_6] : memref<1x342x16xbf16, #tpu.memory_space<vmem>>, vector<1x288x16xbf16>
    %7 = vector.shape_cast %6 : vector<1x288x16xbf16> to vector<288x16xbf16>
    %c16 = arith.constant 16 : index
    %c0_7 = arith.constant 0 : index
    %8 = vector.load %arg2[%c16, %c0_7] : memref<144x12xbf16, #tpu.memory_space<vmem>>, vector<16x12xbf16>
    %cst_8 = arith.constant dense<0.000000e+00> : vector<288x12xf32>
    %9 = tpu.matmul %7, %8, %cst_8 {dimension_numbers = #tpu.dot_dimension_numbers<[1], [0], [0], [1], [0, 0, 1, 1], [], []>} : vector<288x16xbf16>, vector<16x12xbf16>, vector<288x12xf32> -> vector<288x12xf32>
    %10 = arith.addf %5, %9 : vector<288x12xf32>
    %c0_9 = arith.constant 0 : index
    %c2 = arith.constant 2 : index
    %c0_10 = arith.constant 0 : index
    %11 = vector.load %arg1[%c0_9, %c2, %c0_10] : memref<1x342x16xbf16, #tpu.memory_space<vmem>>, vector<1x288x16xbf16>
    %12 = vector.shape_cast %11 : vector<1x288x16xbf16> to vector<288x16xbf16>
    %c32 = arith.constant 32 : index
    %c0_11 = arith.constant 0 : index
    %13 = vector.load %arg2[%c32, %c0_11] : memref<144x12xbf16, #tpu.memory_space<vmem>>, vector<16x12xbf16>
    %cst_12 = arith.constant dense<0.000000e+00> : vector<288x12xf32>
    %14 = tpu.matmul %12, %13, %cst_12 {dimension_numbers = #tpu.dot_dimension_numbers<[1], [0], [0], [1], [0, 0, 1, 1], [], []>} : vector<288x16xbf16>, vector<16x12xbf16>, vector<288x12xf32> -> vector<288x12xf32>
    %15 = arith.addf %10, %14 : vector<288x12xf32>
    %c0_13 = arith.constant 0 : index
    %c18 = arith.constant 18 : index
    %c0_14 = arith.constant 0 : index
    %16 = vector.load %arg1[%c0_13, %c18, %c0_14] : memref<1x342x16xbf16, #tpu.memory_space<vmem>>, vector<1x288x16xbf16>
    %17 = vector.shape_cast %16 : vector<1x288x16xbf16> to vector<288x16xbf16>
    %c48 = arith.constant 48 : index
    %c0_15 = arith.constant 0 : index
    %18 = vector.load %arg2[%c48, %c0_15] : memref<144x12xbf16, #tpu.memory_space<vmem>>, vector<16x12xbf16>
    %cst_16 = arith.constant dense<0.000000e+00> : vector<288x12xf32>
    %19 = tpu.matmul %17, %18, %cst_16 {dimension_numbers = #tpu.dot_dimension_numbers<[1], [0], [0], [1], [0, 0, 1, 1], [], []>} : vector<288x16xbf16>, vector<16x12xbf16>, vector<288x12xf32> -> vector<288x12xf32>
    %20 = arith.addf %15, %19 : vector<288x12xf32>
    %c0_17 = arith.constant 0 : index
    %c19 = arith.constant 19 : index
    %c0_18 = arith.constant 0 : index
    %21 = vector.load %arg1[%c0_17, %c19, %c0_18] : memref<1x342x16xbf16, #tpu.memory_space<vmem>>, vector<1x288x16xbf16>
    %22 = vector.shape_cast %21 : vector<1x288x16xbf16> to vector<288x16xbf16>
    %c64 = arith.constant 64 : index
    %c0_19 = arith.constant 0 : index
    %23 = vector.load %arg2[%c64, %c0_19] : memref<144x12xbf16, #tpu.memory_space<vmem>>, vector<16x12xbf16>
    %cst_20 = arith.constant dense<0.000000e+00> : vector<288x12xf32>
    %24 = tpu.matmul %22, %23, %cst_20 {dimension_numbers = #tpu.dot_dimension_numbers<[1], [0], [0], [1], [0, 0, 1, 1], [], []>} : vector<288x16xbf16>, vector<16x12xbf16>, vector<288x12xf32> -> vector<288x12xf32>
    %25 = arith.addf %20, %24 : vector<288x12xf32>
    %c0_21 = arith.constant 0 : index
    %c20 = arith.constant 20 : index
    %c0_22 = arith.constant 0 : index
    %26 = vector.load %arg1[%c0_21, %c20, %c0_22] : memref<1x342x16xbf16, #tpu.memory_space<vmem>>, vector<1x288x16xbf16>
    %27 = vector.shape_cast %26 : vector<1x288x16xbf16> to vector<288x16xbf16>
    %c80 = arith.constant 80 : index
    %c0_23 = arith.constant 0 : index
    %28 = vector.load %arg2[%c80, %c0_23] : memref<144x12xbf16, #tpu.memory_space<vmem>>, vector<16x12xbf16>
    %cst_24 = arith.constant dense<0.000000e+00> : vector<288x12xf32>
    %29 = tpu.matmul %27, %28, %cst_24 {dimension_numbers = #tpu.dot_dimension_numbers<[1], [0], [0], [1], [0, 0, 1, 1], [], []>} : vector<288x16xbf16>, vector<16x12xbf16>, vector<288x12xf32> -> vector<288x12xf32>
    %30 = arith.addf %25, %29 : vector<288x12xf32>
    %c0_25 = arith.constant 0 : index
    %c36 = arith.constant 36 : index
    %c0_26 = arith.constant 0 : index
    %31 = vector.load %arg1[%c0_25, %c36, %c0_26] : memref<1x342x16xbf16, #tpu.memory_space<vmem>>, vector<1x288x16xbf16>
    %32 = vector.shape_cast %31 : vector<1x288x16xbf16> to vector<288x16xbf16>
    %c96 = arith.constant 96 : index
    %c0_27 = arith.constant 0 : index
    %33 = vector.load %arg2[%c96, %c0_27] : memref<144x12xbf16, #tpu.memory_space<vmem>>, vector<16x12xbf16>
    %cst_28 = arith.constant dense<0.000000e+00> : vector<288x12xf32>
    %34 = tpu.matmul %32, %33, %cst_28 {dimension_numbers = #tpu.dot_dimension_numbers<[1], [0], [0], [1], [0, 0, 1, 1], [], []>} : vector<288x16xbf16>, vector<16x12xbf16>, vector<288x12xf32> -> vector<288x12xf32>
    %35 = arith.addf %30, %34 : vector<288x12xf32>
    %c0_29 = arith.constant 0 : index
    %c37 = arith.constant 37 : index
    %c0_30 = arith.constant 0 : index
    %36 = vector.load %arg1[%c0_29, %c37, %c0_30] : memref<1x342x16xbf16, #tpu.memory_space<vmem>>, vector<1x288x16xbf16>
    %37 = vector.shape_cast %36 : vector<1x288x16xbf16> to vector<288x16xbf16>
    %c112 = arith.constant 112 : index
    %c0_31 = arith.constant 0 : index
    %38 = vector.load %arg2[%c112, %c0_31] : memref<144x12xbf16, #tpu.memory_space<vmem>>, vector<16x12xbf16>
    %cst_32 = arith.constant dense<0.000000e+00> : vector<288x12xf32>
    %39 = tpu.matmul %37, %38, %cst_32 {dimension_numbers = #tpu.dot_dimension_numbers<[1], [0], [0], [1], [0, 0, 1, 1], [], []>} : vector<288x16xbf16>, vector<16x12xbf16>, vector<288x12xf32> -> vector<288x12xf32>
    %40 = arith.addf %35, %39 : vector<288x12xf32>
    %c0_33 = arith.constant 0 : index
    %c38 = arith.constant 38 : index
    %c0_34 = arith.constant 0 : index
    %41 = vector.load %arg1[%c0_33, %c38, %c0_34] : memref<1x342x16xbf16, #tpu.memory_space<vmem>>, vector<1x288x16xbf16>
    %42 = vector.shape_cast %41 : vector<1x288x16xbf16> to vector<288x16xbf16>
    %c128 = arith.constant 128 : index
    %c0_35 = arith.constant 0 : index
    %43 = vector.load %arg2[%c128, %c0_35] : memref<144x12xbf16, #tpu.memory_space<vmem>>, vector<16x12xbf16>
    %cst_36 = arith.constant dense<0.000000e+00> : vector<288x12xf32>
    %44 = tpu.matmul %42, %43, %cst_36 {dimension_numbers = #tpu.dot_dimension_numbers<[1], [0], [0], [1], [0, 0, 1, 1], [], []>} : vector<288x16xbf16>, vector<16x12xbf16>, vector<288x12xf32> -> vector<288x12xf32>
    %45 = arith.addf %40, %44 : vector<288x12xf32>
    %46 = tpu.iota {dimensions = array<i32: 0>} : vector<288x1xi32>
    %c18_i32 = arith.constant 18 : i32
    %c0_i32 = arith.constant 0 : i32
    %47 = arith.cmpi eq, %c18_i32, %c0_i32 : i32
    %c1_i32 = arith.constant 1 : i32
    %48 = arith.select %47, %c1_i32, %c18_i32 : i32
    %49 = vector.broadcast %48 : i32 to vector<288x1xi32>
    %50 = arith.remsi %46, %49 : vector<288x1xi32>
    %c0_i32_37 = arith.constant 0 : i32
    %51 = vector.broadcast %c0_i32_37 : i32 to vector<288x1xi32>
    %52 = arith.cmpi ne, %50, %51 : vector<288x1xi32>
    %c0_i32_38 = arith.constant 0 : i32
    %53 = vector.broadcast %c0_i32_38 : i32 to vector<288x1xi32>
    %54 = arith.cmpi slt, %50, %53 : vector<288x1xi32>
    %c0_i32_39 = arith.constant 0 : i32
    %55 = arith.cmpi slt, %48, %c0_i32_39 : i32
    %56 = vector.broadcast %55 : i1 to vector<288x1xi1>
    %57 = vector.broadcast %56 : vector<288x1xi1> to vector<288x1xi1>
    %58 = arith.xori %54, %57 : vector<288x1xi1>
    %59 = arith.andi %58, %52 : vector<288x1xi1>
    %60 = vector.broadcast %48 : i32 to vector<288x1xi32>
    %61 = arith.addi %50, %60 : vector<288x1xi32>
    %62 = arith.select %59, %61, %50 : vector<288x1xi1>, vector<288x1xi32>
    %c16_i32 = arith.constant 16 : i32
    %63 = vector.broadcast %c16_i32 : i32 to vector<288x1xi32>
    %64 = arith.cmpi slt, %62, %63 : vector<288x1xi32>
    %cst_40 = arith.constant 0.000000e+00 : f32
    %65 = vector.shape_cast %64 : vector<288x1xi1> to vector<288x1xi1>
    %66 = vector.broadcast %65 : vector<288x1xi1> to vector<288x12xi1>
    %67 = vector.broadcast %cst_40 : f32 to vector<288x12xf32>
    %68 = arith.select %66, %45, %67 : vector<288x12xi1>, vector<288x12xf32>
    %69 = math.tanh %68 : vector<288x12xf32>
    %c0_41 = arith.constant 0 : index
    %c0_42 = arith.constant 0 : index
    %c0_43 = arith.constant 0 : index
    %70 = vector.load %arg3[%c0_41, %c0_42, %c0_43] : memref<1x288x12xf32, #tpu.memory_space<vmem>>, vector<1x288x12xf32>
    %71 = vector.shape_cast %70 : vector<1x288x12xf32> to vector<288x12xf32>
    %72 = vector.shape_cast %69 : vector<288x12xf32> to vector<1x288x12xf32>
    tpu.vector_store %arg3[%c0_41, %c0_42, %c0_43], %72 {strides = array<i32>} : memref<1x288x12xf32, #tpu.memory_space<vmem>>, vector<1x288x12xf32>,
    return
  }
  func.func @transform_0(%arg0: i32) -> (i32, i32, i32) {
    %c0_i32 = arith.constant 0 : i32
    %c0_i32_0 = arith.constant 0 : i32
    %c0_i32_1 = arith.constant 0 : i32
    return %arg0, %c0_i32, %c0_i32_0 : i32, i32, i32
  }
  func.func @transform_1(%arg0: i32) -> (i32, i32) {
    %c0_i32 = arith.constant 0 : i32
    %c0_i32_0 = arith.constant 0 : i32
    %c0_i32_1 = arith.constant 0 : i32
    return %c0_i32, %c0_i32_0 : i32, i32
  }
  func.func @transform_2(%arg0: i32) -> (i32, i32, i32) {
    %c0_i32 = arith.constant 0 : i32
    %c0_i32_0 = arith.constant 0 : i32
    %c0_i32_1 = arith.constant 0 : i32
    return %arg0, %c0_i32, %c0_i32_0 : i32, i32, i32
  }
}

</mosaic_0001>

<bundles_post_ra>
// kernel: tile.37
= control target key start
LH: loop header
LB: loop body
LE: loop exit
PB: predicated region body
PF: predicated region fallthrough
CT: control target
= control target key end

     0   :  { %s28_s0 = inlined_call_operand.vmem [shape: f32[64], index: 0, kind: input, shape index: {}]   ;;  %s29_s1 = inlined_call_operand.vmem [shape: f32[16,64], index: 1, kind: output, shape index: {}]  }
   0x1   :  { %v4_v0 = vld [vmem:[%s28_s0] ss:$0 sm:$0xff] }
   0x2   :  { %5 = vst [vmem:[%s29_s1] sm:$0xff] %v4_v0  ;;  %8 = vst [vmem:[%s29_s1 + $0x8] sm:$0xff] %v4_v0 }

// kernel: tile.39
= control target key start
LH: loop header
LB: loop body
LE: loop exit
PB: predicated region body
PF: predicated region fallthrough
CT: control target
= control target key end

     0   :  { %vm3_vm0 = vcmask 523264   ;;  %vm10_vm1 = vcmask 1048064   ;;  %s116_s0 = inlined_call_operand.vmem [shape: f32[16,64], index: 0, kind: input, shape index: {}]   ;;  %s117_s1 = inlined_call_operand.vmem [shape: f32[1,1024], index: 1, kind: output, shape index: {}]  }
   0x1   :  { %v66_v0 = vld [vmem:[%s116_s0 + $0x1] ss:$2 sm:$0xff]   ;;  %v2_v1 = vld [vmem:[%s116_s0] ss:$2 sm:$0xff]   ;;  %s75_s0 = smov 64  }
   0x2   :  { %8 = vrot.lane.b32.xlu0 %v66_v0, %s75_s0  ;;  %4 = vst.msk [vmem:[#allocation0] ss:$8 sm:$0xf] %vm3_vm0, %v2_v1   ;;  %5 = vst.msk [vmem:[#allocation0] ss:$8 sm:$0xf0] %vm3_vm0, %v2_v1  }
  0x74   :  { %v9_v2 = vpop.permute.xlu0 %8  }
  0x75   :  { %11 = vst.msk [vmem:[#allocation0] ss:$8 sm:$0xf] %vm10_vm1, %v9_v2   ;;  %12 = vst.msk [vmem:[#allocation0] ss:$8 sm:$0xf0] %vm10_vm1, %v9_v2  }
  0x7c   :  { %v16_v3 = vld [vmem:[#allocation0] sm:$0x1]  ;;  %v20_v4 = vld [vmem:[#allocation0 + $0x8] sm:$0x1]  ;;  %v25_v5 = vld [vmem:[#allocation0 + $0x10] sm:$0x1] }
  0x7d   :  { %18 = vst [vmem:[%s117_s1] sm:$0x1] %v16_v3  ;;  %67 = vst [vmem:[%s117_s1 + $0x1] sm:$0x1] %v20_v4  ;;  %v31_v6 = vld [vmem:[#allocation0 + $0x18] sm:$0x1] }
  0x7e   :  { %68 = vst [vmem:[%s117_s1 + $0x2] sm:$0x1] %v25_v5  ;;  %v37_v7 = vld [vmem:[#allocation0 + $0x20] sm:$0x1]  ;;  %v43_v8 = vld [vmem:[#allocation0 + $0x28] sm:$0x1] }
  0x7f   :  { %69 = vst [vmem:[%s117_s1 + $0x3] sm:$0x1] %v31_v6  ;;  %70 = vst [vmem:[%s117_s1 + $0x4] sm:$0x1] %v37_v7  ;;  %v49_v9 = vld [vmem:[#allocation0 + $0x30] sm:$0x1] }
  0x80   :  { %71 = vst [vmem:[%s117_s1 + $0x5] sm:$0x1] %v43_v8  ;;  %v55_v10 = vld [vmem:[#allocation0 + $0x38] sm:$0x1]  ;;  %72 = vst [vmem:[%s117_s1 + $0x6] sm:$0x1] %v49_v9 }
  0x81   :  { %73 = vst [vmem:[%s117_s1 + $0x7] sm:$0x1] %v55_v10 }

// kernel: tile.47
= control target key start
LH: loop header
LB: loop body
LE: loop exit
PB: predicated region body
PF: predicated region fallthrough
CT: control target
= control target key end

     0   :  { %s22_s0 = inlined_call_operand.vmem [shape: f32[32], index: 0, kind: input, shape index: {}]   ;;  %s23_s1 = inlined_call_operand.vmem [shape: f32[4,32], index: 1, kind: output, shape index: {}]  }
   0x1   :  { %v4_v0 = vld [vmem:[%s22_s0] ss:$0 sm:$0xff] }
   0x2   :  { %5 = vst [vmem:[%s23_s1] sm:$0xf] %v4_v0 }

// kernel: tile.49
= control target key start
LH: loop header
LB: loop body
LE: loop exit
PB: predicated region body
PF: predicated region fallthrough
CT: control target
= control target key end

     0   :  { %vm7_vm0 = vcmask 261120   ;;  %s37_s8 = smov 32   ;;  %s38_s9 = smov 64   ;;  %vm13_vm1 = vcmask 1048320   ;;  %vm19_vm2 = vcmask 785920   ;;  %vm25_vm3 = vcmask 523520   ;;  %s55_s0 = inlined_call_operand.vmem [shape: f32[4,32], index: 0, kind: input, shape index: {}]   ;;  %s56_s1 = inlined_call_operand.vmem [shape: f32[1,128], index: 1, kind: output, shape index: {}]  }
   0x1   :  { %v4_v0 = vld [vmem:[%s55_s0] sm:$0xf]  ;;  %s36_s0 = smov 96  }
   0x2   :  { %5 = vst [vmem:[#allocation1] sm:$0xf] %v4_v0 }
   0x9   :  { %v10_v1 = vld [vmem:[#allocation1 + $0x3] sm:$0x1]   ;;  %v22_v2 = vld [vmem:[#allocation1 + $0x1] sm:$0x1]   ;;  %v6_v3 = vld [vmem:[#allocation1] sm:$0x1]  }
   0xa   :  { %11 = vrot.lane.b32.xlu0 %v10_v1, %s36_s0  ;;  %23 = vrot.lane.b32.xlu1 %v22_v2, %s37_s8  ;;  %v16_v4 = vld [vmem:[#allocation1 + $0x2] sm:$0x1]   ;;  %8 = vst.msk [vmem:[#allocation0] sm:$0x1] %vm7_vm0, %v6_v3  }
   0xe   :  { %17 = vrot.lane.b32.xlu0 %v16_v4, %s38_s9 }
  0x7c   :  { %v12_v5 = vpop.permute.xlu0 %11   ;;  %v24_v6 = vpop.permute.xlu1 %23  }
  0x7d   :  { %14 = vst.msk [vmem:[#allocation0] sm:$0x1] %vm13_vm1, %v12_v5  }
  0x80   :  { %v18_v7 = vpop.permute.xlu0 %17  }
  0x81   :  { %20 = vst.msk [vmem:[#allocation0] sm:$0x1] %vm19_vm2, %v18_v7  }
  0x82   :  { %26 = vst.msk [vmem:[#allocation0] sm:$0x1] %vm25_vm3, %v24_v6  }
  0x89   :  { %v30_v8 = vld [vmem:[#allocation0] sm:$0x1] }
  0x8a   :  { %32 = vst [vmem:[%s56_s1] sm:$0x1] %v30_v8 }

// kernel: generator_forward.8
= control target key start
LH: loop header
LB: loop body
LE: loop exit
PB: predicated region body
PF: predicated region fallthrough
CT: control target
= control target key end

     0   :  { %s417_s12 = smov 0   ;;  %s478_s0 = inlined_call_operand.vmem [shape: f32[2,1,1024], index: 0, kind: input, shape index: {}]   ;;  %s479_s1 = inlined_call_operand.vmem [shape: f32[1,1024], index: 1, kind: input, shape index: {}]   ;;  %s480_s2 = inlined_call_operand.vmem [shape: f32[1,1024], index: 2, kind: input, shape index: {}]   ;;  %s481_s3 = inlined_call_operand.vmem [shape: bf16[2,1,1024], index: 3, kind: output, shape index: {}]  }
   0x1 LB: > { %s366_s13 = sadd.s32 4294967295, %s394_s12   ;;  %p370_p0 = scmp.ge.s32.totalorder %s394_s12, 1  ;;  %s394_s12 = sphi %s417_s12, %s13_s12  }
   0x2   : > { %p136_p1 = scmp.lt.s32.totalorder %s394_s12, 3 }
   0x4   : > { %p137_p2 = pnand %p370_p0, %p136_p1 }
   0x5   : > { %p158_p3 = scmp.lt.s32.totalorder (!%p137_p2), %s366_s13, 1  ;;  %v173_v0 = vlaneseq (!%p137_p2)  ;;  %vm279_vm0 = vcmask (!%p137_p2), 1040384   ;;  %vm280_vm1 = vsmask.f32 (!%p137_p2), 256  ;;  %vm282_vm2 = vcmask (!%p137_p2), 1041409   ;;  %v167_v2 = vld [vmem:[%s479_s1] sm:$0xff] (!%p137_p2) }
   0x6   : > { %140 = sbr.rel (%p137_p2) target bundleno = 38 (0x26), region = 32  ;;  %vm283_vm3 = vsmask.f32 (!%p137_p2), 1280  ;;  %vm427_vm4 = vmand (!%p137_p2), %vm279_vm0, %vm280_vm1  ;;  %vm286_vm5 = vcmask (!%p137_p2), 1042434   ;;  %vm287_vm6 = vsmask.f32 (!%p137_p2), 2304 }
   0x7   : > { %vm284_vm7 = vmand (!%p137_p2), %vm282_vm2, %vm283_vm3  ;;  %v174_v3 = vshrl.u32 (!%p137_p2), %v173_v0, 7  ;;  %v396_v4 = vmov (!%p137_p2), 1966171168   ;;  %vm290_vm9 = vcmask (!%p137_p2), 1043459   ;;  %vm291_vm10 = vsmask.f32 (!%p137_p2), 3328 }
   0x8   : > { %v234_v5 = vunpack.c.l.s4 (!%p137_p2), %v396_v4  ;;  %vm285_vm8 = vmor (!%p137_p2), %vm284_vm7, %vm427_vm4  ;;  %v169_v7 = vld [vmem:[%s480_s2] sm:$0xff] (!%p137_p2)  ;;  %vm294_vm13 = vcmask (!%p137_p2), 1044484   ;;  %vm295_vm14 = vsmask.f32 (!%p137_p2), 4352  ;;  %vm298_vm2 = vcmask (!%p137_p2), 1045509  }
   0x9   : > { %vm288_vm11 = vmand (!%p137_p2), %vm286_vm5, %vm287_vm6  ;;  %v175_v11 = vsub.s32 (!%p137_p2), 0, %v174_v3  ;;  %v179_v12 = vsub.s32 (!%p137_p2), 1, %v174_v3  ;;  %v183_v13 = vsub.s32 (!%p137_p2), 2, %v174_v3  ;;  %v187_v16 = vsub.s32 (!%p137_p2), 3, %v174_v3 }
   0xa   : > { %vm445_vm12 = vmor (!%p137_p2), %vm288_vm11, %vm285_vm8  ;;  %v235_v14 = vunpack.c.0.s8 (!%p137_p2), %v234_v5  ;;  %vm299_vm3 = vsmask.f32 (!%p137_p2), 5376  ;;  %v191_v17 = vsub.s32 (!%p137_p2), 4, %v174_v3  ;;  %v195_v18 = vsub.s32 (!%p137_p2), 5, %v174_v3 }
   0xb   : > { %vm449_vm15 = vmand (!%p137_p2), %vm290_vm9, %vm291_vm10  ;;  %v199_v19 = vsub.s32 (!%p137_p2), 6, %v174_v3  ;;  %v203_v20 = vsub.s32 (!%p137_p2), 7, %v174_v3  ;;  %vm302_vm6 = vcmask (!%p137_p2), 1046534   ;;  %vm303_vm7 = vsmask.f32 (!%p137_p2), 6400 }
   0xc   : > { %vm293_vm0 = vmor (!%p137_p2), %vm449_vm15, %vm445_vm12  ;;  %v238_v23 = vsub.s32 (!%p137_p2), %v235_v14, %v174_v3  ;;  %vm306_vm10 = vcmask (!%p137_p2), 1047559   ;;  %vm307_vm11 = vsmask.f32 (!%p137_p2), 7424 }
   0xd   : > { %s493_s13 = smov (!%p158_p3, %s366_s13), 1  ;;  %vm296_vm1 = vmand %vm294_vm13, %vm295_vm14 }
   0xe   : > { %s371_s14 = sshll.u32 %s493_s13, 3  ;;  %vm457_vm4 = vmor %vm296_vm1, %vm293_vm0 }
   0xf   : > { %s161_s19 = scalar_lea.vmem %s478_s0, %s371_s14  ;;  %vm461_vm5 = vmand %vm298_vm2, %vm299_vm3  ;;  %s165_s24 = scalar_lea.vmem %s481_s3, %s371_s14 }
  0x10   : > { %v166_v6 = vld [vmem:[%s161_s19] sm:$0xff]  ;;  %vm301_vm8 = vmor %vm461_vm5, %vm457_vm4 }
  0x11   : > { %v168_v9 = vmul.f32 %v167_v2, %v166_v6  ;;  %vm304_vm9 = vmand %vm302_vm6, %vm303_vm7  ;;  %v310_v45 = vld [vmem:[%s165_s24] sm:$0xff] }
  0x12   : > { %vm305_vm12 = vmor %vm304_vm9, %vm301_vm8 }
  0x13   : > { %v170_v15 = vadd.f32 %v169_v7, %v168_v9  ;;  %vm308_vm13 = vmand %vm306_vm10, %vm307_vm11 }
  0x14   : > { %vm309_vm14 = vmor %vm308_vm13, %vm305_vm12 }
  0x15   : > { %v171_v21 = vmax.f32 %v170_v15, 0.0 }
  0x17   : > { %v176_v25 = vrot.slane %v171_v21, %v175_v11  ;;  %v180_v26 = vrot.slane %v171_v21, %v179_v12  ;;  %v184_v27 = vrot.slane %v171_v21, %v183_v13  ;;  %v188_v28 = vrot.slane %v171_v21, %v187_v16 }
  0x18   : > { %v192_v29 = vrot.slane %v171_v21, %v191_v17  ;;  %v196_v30 = vrot.slane %v171_v21, %v195_v18  ;;  %v200_v31 = vrot.slane %v171_v21, %v199_v19  ;;  %v204_v32 = vrot.slane %v171_v21, %v203_v20 }
  0x19   : > { %v373_v33 = vpack.c.bf16 %v180_v26, %v176_v25  ;;  %v374_v34 = vpack.c.bf16 %v188_v28, %v184_v27 }
  0x1a   : > { %v375_v35 = vpack.c.bf16 %v196_v30, %v192_v29  ;;  %v376_v36 = vpack.c.bf16 %v204_v32, %v200_v31 }
  0x1b   : > { %v239_v37 = vrot.slane %v373_v33, %v238_v23  ;;  %v246_v38 = vrot.slane %v374_v34, %v238_v23 }
  0x1c   : > { %v253_v39 = vrot.slane %v375_v35, %v238_v23  ;;  %v260_v40 = vrot.slane %v376_v36, %v238_v23 }
  0x1d   : > { %v261_v41 = vcombine.low %v239_v37, %v246_v38 }
  0x1e   : > { %v262_v42 = vcombine.low %v253_v39, %v260_v40 }
  0x1f   : > { %v269_v43 = vrot.slane %v261_v41, %v238_v23 }
  0x20   : > { %v276_v44 = vrot.slane %v262_v42, %v238_v23 }
  0x22   : > { %v277_v46 = vcombine.low %v269_v43, %v276_v44 }
  0x24   : > { %v311_v47 = vsel %vm309_vm14, %v277_v46, %v310_v45 }
  0x25   : > { %312 = vst [vmem:[%s165_s24] sm:$0xff] %v311_v47 }
  0x26 PF: > { %s13_s12 = sadd.s32 1, %s394_s12  }
  0x27   : > { %p10_p4 = scmp.ge.s32.totalorder %s13_s12, 4  }
  0x29   :  { %12 = sbr.rel (!%p10_p4) target bundleno = 1 (0x1), region = 62 }

// kernel: generator_forward.7
= control target key start
LH: loop header
LB: loop body
LE: loop exit
PB: predicated region body
PF: predicated region fallthrough
CT: control target
= control target key end

     0   :  { %7 = vsyncpa [#allocation3], 0  ;;  %s412_s9 = smov [#allocation2]   ;;  %s465_s0 = inlined_call_operand.vmem [shape: bf16[2,26], index: 0, kind: input, shape index: {}]   ;;  %s466_s1 = inlined_call_operand.hbm [shape: bf16[26,1024], index: 1, kind: input, shape index: {}]   ;;  %s467_s2 = inlined_call_operand.vmem [shape: f32[2,1024], index: 2, kind: output, shape index: {}]  }
   0x1   :  { %s15_s10 = sshll.u32 %s412_s9, 4  ;;  %s388_s13 = scalar_lea.hbm %s466_s1, 2048  ;;  %s16_s10 = int_to_ptr.vmem [resolvable:$true] %s15_s10 }
   0x2   :  { %p389_p0 = scmp.ne.s32.totalorder %s466_s1, %s388_s13  ;;  %p392_p1 = scmp.lt.u32.totalorder %s388_s13, %s466_s1 }
   0x4   :  { %p394_p2 = pnand %p392_p1, %p389_p0 }
   0x6   :  { %397 = shalt.err (!%p394_p2)
}
   0x7   :  { %s398_s18 = scalar_lea.vmem %s16_s10, 2048  ;;  %p403_p4 = scmp.lt.s32.totalorder %s16_s10, %s16_s10 }
   0x8   :  { %p399_p3 = scmp.ne.s32.totalorder %s16_s10, %s398_s18  ;;  %p404_p5 = scmp.lt.s32.totalorder %s398_s18, %s398_s18 }
   0xa   :  { %p405_p6 = por %p404_p5, %p403_p4 }
   0xc   :  { %p406_p7 = pnand %p405_p6, %p399_p3 }
   0xe   :  { %409 = shalt.err (!%p406_p7)
}
   0xf   :  { %s413_s19 = smov 512   ;;  %s414_s20 = smov 32  }
  0x10   :  { %21 = dma.hbm_to_vmem [thread:$0]  %s466_s1, 2048, %s16_s10, [#allocation3], %s413_s19, %s413_s19, %s414_s20  }
  0x11   :  { %410 = dma.done.wait [#allocation3], 2048  }
  0x12   :  { %411 = vsyncadd [#allocation3], 4294965248  ;;  %v415_v0 = vmov 0   ;;  %v27_v1 = vld [vmem:[#allocation2] sm:$0xff]  ;;  %v28_v3 = vld [vmem:[#allocation2 + $0x8] sm:$0xff]  ;;  %vm119_vm0 = vcmask 1044480   ;;  %v321_v40 = vlaneseq }
  0x13   :  { %176 = vmatprep.mubr.bf16.mxu0 %v415_v0  ;;  %217 = vmatprep.mubr.bf16.mxu1 %v415_v0  ;;  %v31_v2 = vld [vmem:[#allocation2 + $0x20] sm:$0xff]  ;;  %v32_v5 = vld [vmem:[#allocation2 + $0x28] sm:$0xff]  ;;  %v29_v17 = vld [vmem:[#allocation2 + $0x10] sm:$0xff]  ;;  %vm115_vm1 = vcmask 211968   ;;  %v416_v38 = vmov 1983009808  }
  0x14   :  { %v360_v4 = vcombine.high %v27_v1, %v31_v2  ;;  %v359_v6 = vcombine.low %v27_v1, %v31_v2  ;;  %v35_v7 = vld [vmem:[#allocation2 + $0x40] sm:$0xff]  ;;  %v362_v9 = vcombine.high %v28_v3, %v32_v5  ;;  %v361_v10 = vcombine.low %v28_v3, %v32_v5  ;;  %v36_v12 = vld [vmem:[#allocation2 + $0x48] sm:$0xff]  ;;  %v33_v18 = vld [vmem:[#allocation2 + $0x30] sm:$0xff] }
  0x15   :  { %v39_v8 = vld [vmem:[#allocation2 + $0x60] sm:$0x11]  ;;  %v40_v13 = vld [vmem:[#allocation2 + $0x68] sm:$0x11]  ;;  %v30_v19 = vld [vmem:[#allocation2 + $0x18] sm:$0xff]  ;;  %v364_v22 = vcombine.high %v29_v17, %v33_v18  ;;  %v363_v30 = vcombine.low %v29_v17, %v33_v18  ;;  %v319_v39 = vunpack.c.l.s4 %v416_v38  ;;  %v322_v42 = vshrl.u32 %v321_v40, 7 }
  0x16   :  { %v368_v11 = vcombine.high %v35_v7, %v39_v8  ;;  %v367_v14 = vcombine.low %v35_v7, %v39_v8  ;;  %144 = vmatprep.subr.bf16.mxu0 %v360_v4  ;;  %v370_v15 = vcombine.high %v36_v12, %v40_v13  ;;  %v369_v16 = vcombine.low %v36_v12, %v40_v13  ;;  %v34_v20 = vld [vmem:[#allocation2 + $0x38] sm:$0xff]  ;;  %v37_v25 = vld [vmem:[#allocation2 + $0x50] sm:$0xff]  ;;  %v26_v29 = vld [vmem:[%s465_s0] sm:$0x1] }
  0x17   :  { %185 = vmatprep.subr.bf16.mxu1 %v362_v9  ;;  %145 = vmatpush1.bf16.msra.mxu0 %v359_v6  ;;  %v366_v24 = vcombine.high %v30_v19, %v34_v20  ;;  %v41_v26 = vld [vmem:[#allocation2 + $0x70] sm:$0x11]  ;;  %v38_v27 = vld [vmem:[#allocation2 + $0x58] sm:$0xff]  ;;  %v365_v31 = vcombine.low %v30_v19, %v34_v20  ;;  %v320_v41 = vunpack.c.0.s8 %v319_v39 }
  0x18   :  { %186 = vmatpush1.bf16.msra.mxu1 %v361_v10  ;;  %375 = vmatprep.subr.msk.bf16.mxu0 %vm119_vm0, %v368_v11  ;;  %v121_v21 = vsel %vm119_vm0, %v367_v14, 0  ;;  %v127_v23 = vsel %vm119_vm0, %v369_v16, 0  ;;  %v42_v28 = vld [vmem:[#allocation2 + $0x78] sm:$0x11]  ;;  %v372_v32 = vcombine.high %v37_v25, %v41_v26  ;;  %v371_v33 = vcombine.low %v37_v25, %v41_v26 }
  0x19   :  { %377 = vmatprep.subr.msk.bf16.mxu1 %vm119_vm0, %v370_v15  ;;  %v374_v34 = vcombine.high %v38_v27, %v42_v28  ;;  %v373_v35 = vcombine.low %v38_v27, %v42_v28  ;;  %v323_v44 = vsub.s32 %v320_v41, %v322_v42 }
  0x1a   :  { %v133_v36 = vsel %vm119_vm0, %v371_v33, 0 }
  0x1b   :  { %147 = vmatpush1.bf16.msra.mxu0 %v121_v21  ;;  %v139_v37 = vsel %vm119_vm0, %v373_v35, 0 }
  0x1c   :  { %188 = vmatpush1.bf16.msra.mxu1 %v127_v23  ;;  %226 = vmatprep.subr.bf16.mxu0 %v364_v22 }
  0x1d   :  { %267 = vmatprep.subr.bf16.mxu1 %v366_v24 }
  0x1e   :  { %376 = vmatmul.mubr.msk.bf16.vlgmr.msra.gmra.mrb[0].mxu0 %vm115_vm1, %v26_v29 }
  0x1f   :  { %378 = vmatmul.mubr.msk.bf16.vlgmr.msra.gmra.mrb[0].mxu1 %vm115_vm1, %v26_v29  ;;  %227 = vmatpush1.bf16.msra.mxu0 %v363_v30 }
  0x20   :  { %268 = vmatpush1.bf16.msra.mxu1 %v365_v31  ;;  %379 = vmatprep.subr.msk.bf16.mxu0 %vm119_vm0, %v372_v32 }
  0x21   :  { %381 = vmatprep.subr.msk.bf16.mxu1 %vm119_vm0, %v374_v34  ;;  %258 = vmatprep.mubr.bf16.mxu0 %v415_v0 }
  0x22   :  { %299 = vmatprep.mubr.bf16.mxu1 %v415_v0 }
  0x23   :  { %229 = vmatpush1.bf16.msra.mxu0 %v133_v36 }
  0x24   :  { %270 = vmatpush1.bf16.msra.mxu1 %v139_v37 }
  0x26   :  { %380 = vmatmul.mubr.msk.bf16.vlgmr.msra.gmra.mrb[4].mxu0 %vm115_vm1, %v26_v29 }
  0x27   :  { %382 = vmatmul.mubr.msk.bf16.vlgmr.msra.gmra.mrb[4].mxu1 %vm115_vm1, %v26_v29 }
  0xf1   :  { %v178_v43 = vpop.f32.mrb[0].mxu0 }
  0xf2   :  { %v219_v45 = vpop.f32.mrb[0].mxu1  ;;  %v180_v46 = vpop.f32.mrb[1].mxu0 }
  0xf3   :  { %v316_v47 = vcombine.low %v178_v43, %v180_v46  ;;  %v221_v48 = vpop.f32.mrb[1].mxu1  ;;  %v182_v49 = vpop.f32.mrb[2].mxu0 }
  0xf4   :  { %v317_v50 = vcombine.low %v219_v45, %v221_v48  ;;  %v223_v51 = vpop.f32.mrb[2].mxu1  ;;  %v183_v52 = vpop.f32.mrb[3].mxu0 }
  0xf5   :  { %v324_v53 = vrot.slane %v316_v47, %v323_v44  ;;  %v224_v54 = vpop.f32.mrb[3].mxu1 }
  0xf6   :  { %v331_v55 = vrot.slane %v317_v50, %v323_v44 }
  0xf8   :  { %v332_v56 = vcombine.low %v324_v53, %v331_v55 }
  0xf9   :  { %v260_v57 = vpop.f32.mrb[4].mxu0 }
  0xfa   :  { %352 = vst [vmem:[%s467_s2] sm:$0xff] %v332_v56  ;;  %v301_v58 = vpop.f32.mrb[4].mxu1  ;;  %v262_v59 = vpop.f32.mrb[5].mxu0 }
  0xfb   :  { %v333_v60 = vcombine.low %v260_v57, %v262_v59  ;;  %v303_v61 = vpop.f32.mrb[5].mxu1  ;;  %v264_v62 = vpop.f32.mrb[6].mxu0 }
  0xfc   :  { %v334_v63 = vcombine.low %v301_v58, %v303_v61  ;;  %v305_v0 = vpop.f32.mrb[6].mxu1  ;;  %v265_v1 = vpop.f32.mrb[7].mxu0 }
  0xfd   :  { %v341_v2 = vrot.slane %v333_v60, %v323_v44  ;;  %v306_v3 = vpop.f32.mrb[7].mxu1 }
  0xfe   :  { %v348_v4 = vrot.slane %v334_v63, %v323_v44 }
 0x100   :  { %v349_v5 = vcombine.low %v341_v2, %v348_v4 }
 0x102   :  { %353 = vst [vmem:[%s467_s2 + $0x8] sm:$0xff] %v349_v5 }
 0x103   :  { %358 = vsyncpa [#allocation3], 1 }

// kernel: generator_forward.10
= control target key start
LH: loop header
LB: loop body
LE: loop exit
PB: predicated region body
PF: predicated region fallthrough
CT: control target
= control target key end

     0   :  { %s328_s12 = smov 0   ;;  %s351_s0 = inlined_call_operand.vmem [shape: f32[2,24,128], index: 0, kind: input, shape index: {}]   ;;  %s352_s1 = inlined_call_operand.vmem [shape: f32[1,128], index: 1, kind: input, shape index: {}]   ;;  %s353_s2 = inlined_call_operand.vmem [shape: f32[1,128], index: 2, kind: input, shape index: {}]   ;;  %s354_s3 = inlined_call_operand.vmem [shape: bf16[2,24,128], index: 3, kind: output, shape index: {}]  }
   0x1 LB: > { %s268_s13 = sadd.s32 4294967295, %s306_s12   ;;  %p272_p0 = scmp.ge.s32.totalorder %s306_s12, 1  ;;  %s306_s12 = sphi %s328_s12, %s13_s12  }
   0x2   : > { %p137_p1 = scmp.lt.s32.totalorder %s306_s12, 3 }
   0x4   : > { %p138_p2 = pnand %p272_p0, %p137_p1 }
   0x5   : > { %p161_p3 = scmp.lt.s32.totalorder (!%p138_p2), %s268_s13, 1  ;;  %v275_v0 = vld [vmem:[%s352_s1] ss:$0 sm:$0xff] (!%p138_p2) }
   0x6   : > { %141 = sbr.rel (%p138_p2) target bundleno = 27 (0x1b), region = 32  ;;  %v276_v1 = vld [vmem:[%s353_s2] ss:$0 sm:$0xff] (!%p138_p2) }
   0xd   : > { %s356_s13 = smov (!%p161_p3, %s268_s13), 1 }
   0xe   : > { %s290_s14 = smul.u32 24, %s356_s13 }
   0xf   : > { %s291_s22 = smul.u32 12, %s356_s13 }
  0x10   : > { %s165_s19 = scalar_lea.vmem %s351_s0, %s290_s14 }
  0x11   : > { %v171_v2 = vld [vmem:[%s165_s19] sm:$0xff]  ;;  %v172_v3 = vld [vmem:[%s165_s19 + $0x8] sm:$0xff]  ;;  %v173_v4 = vld [vmem:[%s165_s19 + $0x10] sm:$0xff]  ;;  %s170_s25 = scalar_lea.vmem %s354_s3, %s291_s22 }
  0x12   : > { %v181_v5 = vmul.f32 %v275_v0, %v171_v2  ;;  %v182_v6 = vmul.f32 %v275_v0, %v172_v3  ;;  %v183_v7 = vmul.f32 %v275_v0, %v173_v4 }
  0x14   : > { %v191_v8 = vadd.f32 %v276_v1, %v181_v5  ;;  %v192_v9 = vadd.f32 %v276_v1, %v182_v6  ;;  %v193_v10 = vadd.f32 %v276_v1, %v183_v7 }
  0x16   : > { %v194_v11 = vmax.f32 %v191_v8, 0.0  ;;  %v195_v12 = vmax.f32 %v192_v9, 0.0  ;;  %v196_v13 = vmax.f32 %v193_v10, 0.0 }
  0x18   : > { %v288_v14 = vpack.c.bf16 %v195_v12, %v194_v11  ;;  %v284_v15 = vpack.c.bf16 %v196_v13, %v196_v13 }
  0x1a   : > { %289 = vst [vmem:[%s170_s25] sm:$0xff] %v288_v14   ;;  %212 = vst [vmem:[%s170_s25 + $0x8] sm:$0xf] %v284_v15 }
  0x1b PF: > { %s13_s12 = sadd.s32 1, %s306_s12  }
  0x1c   : > { %p10_p4 = scmp.ge.s32.totalorder %s13_s12, 4  }
  0x1e   :  { %12 = sbr.rel (!%p10_p4) target bundleno = 1 (0x1), region = 62 }

// kernel: generator_forward.9
= control target key start
LH: loop header
LB: loop body
LE: loop exit
PB: predicated region body
PF: predicated region fallthrough
CT: control target
= control target key end

     0   :  { %9 = vsyncpa [#allocation3], 0  ;;  %s1714_s12 = smov 0   ;;  %s1875_s0 = inlined_call_operand.vmem [shape: bf16[2,42,64], index: 0, kind: input, shape index: {}]   ;;  %s1876_s1 = inlined_call_operand.hbm [shape: bf16[576,128], index: 1, kind: input, shape index: {}]   ;;  %s1877_s2 = inlined_call_operand.vmem [shape: f32[2,24,128], index: 2, kind: output, shape index: {0}]   ;;  %s1878_s3 = inlined_call_operand.vmem [shape: f32[2,2,128], index: 3, kind: output, shape index: {1}]  }
   0x1 LB: > { %s1720_s13 = sadd.s32 4294967295, %s1689_s12   ;;  %p1304_p0 = scmp.ge.s32.totalorder %s1689_s12, 1  ;;  %s1689_s12 = sphi %s1714_s12, %s15_s12  }
   0x2   : > { %p119_p1 = scmp.lt.s32.totalorder %s1689_s12, 3  ;;  %s1691_s14 = smov [#allocation2]  }
   0x3   : > { %s131_s15 = sshll.u32 %s1691_s14, 4  ;;  %p1879_p3 = scmp.eq.s32.totalorder %s1720_s13, 0  ;;  %s132_s15 = int_to_ptr.vmem [resolvable:$true] %s131_s15 }
   0x4   : > { %p1724_p2 = pnand %p1304_p0, %p119_p1  ;;  %s1651_s20 = scalar_lea.hbm %s1876_s1, 4608 }
   0x5   : > { %p1652_p6 = scmp.ne.s32.totalorder %s1876_s1, %s1651_s20  ;;  %p1658_p10 = scmp.lt.u32.totalorder %s1651_s20, %s1876_s1 }
   0x6   : > { %s1881_s16 = scalar_select %p1724_p2, 1, 0 }
   0x7   : > { %p1585_p4 = pneg %p1724_p2 }
   0x9   : > { %p1733_p5 = pnand %p1879_p3, %p1585_p4 }
   0xb   : > { %p1653_p7 = pneg %p1733_p5 }
   0xd   : > { %p1654_p8 = pnand %p1653_p7, %p1652_p6 }
   0xf   : > { %p1655_p9 = pneg %p1654_p8 }
  0x11   : > { %p1660_p11 = pnand %p1658_p10, %p1655_p9 }
  0x13   : > { %1663 = shalt.err (!%p1660_p11)
}
  0x14   : > { %s1664_s25 = scalar_lea.vmem %s132_s15, 4608  ;;  %p1672_p1 = scmp.lt.s32.totalorder %s132_s15, %s132_s15 }
  0x15   : > { %p1665_p12 = scmp.ne.s32.totalorder %s132_s15, %s1664_s25  ;;  %p1673_p4 = scmp.lt.s32.totalorder %s1664_s25, %s1664_s25 }
  0x17   : > { %p1667_p13 = pnand %p1665_p12, %p1653_p7  ;;  %p1674_p3 = por %p1673_p4, %p1672_p1 }
  0x19   : > { %p1668_p0 = pneg %p1667_p13 }
  0x1b   : > { %p1675_p2 = pnand %p1674_p3, %p1668_p0 }
  0x1d   : > { %1678 = shalt.err (!%p1675_p2)
}
  0x1e   : > { %s1692_s26 = smov 64   ;;  %s1693_s27 = smov 4  }
  0x1f   : > { %1588 = dma.hbm_to_vmem [thread:$0]  (!%p1733_p5), %s1876_s1, 4608, %s132_s15, [#allocation3], %s1692_s26, %s1692_s26, %s1693_s27  }
  0x20   : > { %p1883_p6 = scmp.ne.s32.totalorder %s1881_s16, 0 }
  0x21   : > { %p1884_p8 = scmp.eq.s32.totalorder (!%p1883_p6), %s1720_s13, 0 }
  0x22   : > { %155 = sbr.rel (%p1883_p6) target bundleno = 364 (0x16c), region = 28 }
  0x29   : > { %1684 = dma.done.wait (%p1884_p8), [#allocation3], 4608   ;;  %p1885_p7 = pmov %p1884_p8 }
  0x2a   : > { %p183_p2 = scmp.lt.s32.totalorder %s1720_s13, 1  ;;  %v1602_v0 = vld [vmem:[#allocation2 + $0x20] sm:$0xff]   ;;  %v1604_v2 = vld [vmem:[#allocation2 + $0x28] sm:$0xff]   ;;  %v1606_v4 = vld [vmem:[#allocation2 + $0x30] sm:$0xff]   ;;  %vm228_vm0 = vsmask.f32 7424 }
  0x2b   : > { %1686 = vsyncadd (%p1885_p7), [#allocation3], 4294962688  ;;  %v1603_v1 = vld [vmem:[#allocation2 + $0x80] sm:$0xff]   ;;  %1435 = vmatprep.subr.bf16.mxu1 %v1602_v0  ;;  %v1605_v3 = vld [vmem:[#allocation2 + $0x88] sm:$0xff]   ;;  %vm268_vm1 = vcmask 523264   ;;  %vm413_vm3 = vcmask 1046528  }
  0x2c   : > { %s1887_s13 = smov (!%p183_p2, %s1720_s13), 1  ;;  %1483 = vmatprep.subr.bf16.mxu0 %v1603_v1  ;;  %1436 = vmatpush3.bf16.msra.mxu1 %v1602_v0  ;;  %v1607_v5 = vld [vmem:[#allocation2 + $0x90] sm:$0xff]   ;;  %v1608_v6 = vld [vmem:[#allocation2 + $0x38] sm:$0xff]   ;;  %vm611_vm2 = vsmask.f32 4352  ;;  %v1612_v22 = vld [vmem:[#allocation2] sm:$0xff]  }
  0x2d   : > { %s1574_s30 = smul.u32 24, %s1887_s13  ;;  %1484 = vmatpush3.bf16.msra.mxu0 %v1603_v1  ;;  %1437 = vmatprep.subr.bf16.mxu1 %v1604_v2  ;;  %v1609_v7 = vld [vmem:[#allocation2 + $0x98] sm:$0xff]   ;;  %v1616_v23 = vld [vmem:[#allocation2 + $0xa0] sm:$0xff]   ;;  %v1617_v38 = vld [vmem:[#allocation2 + $0x8] sm:$0xff]   ;;  %vm823_vm4 = vcmask 1045504   ;;  %vm514_vm5 = vcmask 1044480  }
  0x2e   : > { %1485 = vmatprep.subr.bf16.mxu0 %v1605_v3  ;;  %v1618_v42 = vld [vmem:[#allocation2 + $0xa8] sm:$0xff]   ;;  %v1619_v43 = vld [vmem:[#allocation2 + $0x10] sm:$0xff]   ;;  %v1621_v45 = vld [vmem:[#allocation2 + $0x18] sm:$0xff]   ;;  %vm920_vm6 = vsmask.f32 5376  ;;  %s1311_s10 = sshll.u32 %s1887_s13, 1 }
  0x2f   : > { %s1769_s6 = scalar_lea.vmem %s1875_s0, %s1574_s30  ;;  %v1620_v44 = vld [vmem:[#allocation2 + $0xb0] sm:$0xff]   ;;  %v1622_v46 = vld [vmem:[#allocation2 + $0xb8] sm:$0xff]   ;;  %v1623_v48 = vld [vmem:[#allocation2 + $0x40] sm:$0xff]   ;;  %s192_s9 = scalar_lea.vmem %s1877_s2, %s1574_s30 }
  0x30   : > { %1438 = vmatpush3.bf16.msra.mxu1 %v1604_v2  ;;  %v198_v8 = vld [vmem:[%s1769_s6] sm:$0xf]  ;;  %v1773_v9 = vld [vmem:[%s1769_s6 + $0x4] sm:$0xf]  ;;  %v1776_v10 = vld [vmem:[%s1769_s6 + $0x8] sm:$0xf]  ;;  %s196_s15 = scalar_lea.vmem %s1878_s3, %s1311_s10 }
  0x31   : > { %1486 = vmatpush3.bf16.msra.mxu0 %v1605_v3  ;;  %1439 = vmatprep.subr.bf16.mxu1 %v1606_v4  ;;  %v209_v11 = vld [vmem:[%s1769_s6 + $0xc] sm:$0x1]  ;;  %v1312_v12 = vcombine.low %v198_v8, %v1773_v9  ;;  %v498_v14 = vld [vmem:[%s1769_s6] sm:$0x8]  ;;  %v1349_v40 = vcombine.low %v1773_v9, %v1776_v10  ;;  %v801_v50 = vld [vmem:[%s1769_s6 + $0x4] sm:$0xc]  ;;  %v1320_v57 = vcombine.low %v1776_v10, %v1776_v10 }
  0x32   : > { %1487 = vmatprep.subr.bf16.mxu0 %v1607_v5  ;;  %v1781_v13 = vcombine.low %v1776_v10, %v209_v11  ;;  %v1785_v15 = vld [vmem:[%s1769_s6 + $0xc] sm:$0xf]  ;;  %v1788_v18 = vcombine.low %v498_v14, %v1773_v9  ;;  %v401_v47 = vld [vmem:[%s1769_s6] sm:$0xe]  ;;  %v1810_v51 = vld [vmem:[%s1769_s6 + $0x8] sm:$0xf] }
  0x33   : > { %v230_v16 = vshrl.u32 %v1312_v12, 16  ;;  %v232_v17 = vshll.u32 %v1312_v12, 16  ;;  %v1342_v19 = vcombine.low %v1776_v10, %v1785_v15  ;;  %v1327_v49 = vcombine.low %v401_v47, %v1773_v9  ;;  %v803_v52 = vld [vmem:[%s1769_s6 + $0xc] sm:$0xf]  ;;  %v804_v55 = vld [vmem:[%s1769_s6 + $0x10] sm:$0x3] }
  0x34   : > { %1440 = vmatpush3.bf16.msra.mxu1 %v1606_v4  ;;  %v237_v20 = vshll.u32 %v1781_v13, 16  ;;  %v241_v21 = vshrl.u32 %v1781_v13, 16  ;;  %v613_v25 = vshrl.u32 %v1788_v18, 16  ;;  %v616_v26 = vshll.u32 %v1788_v18, 16  ;;  %v908_v59 = vld [vmem:[%s1769_s6 + $0x10] sm:$0x7] }
  0x35   : > { %1488 = vmatpush3.bf16.msra.mxu0 %v1607_v5  ;;  %1441 = vmatprep.subr.bf16.mxu1 %v1608_v6  ;;  %v234_v24 = vrot.slane %v232_v17, 1  ;;  %v621_v27 = vshrl.u32 %v1342_v19, 16  ;;  %v624_v29 = vshll.u32 %v1342_v19, 16  ;;  %v414_v53 = vrot.slane %v1327_v49, 1  ;;  %v1625_v60 = vld [vmem:[#allocation2 + $0xc0] sm:$0xff]   ;;  %v1627_v62 = vld [vmem:[#allocation2 + $0x48] sm:$0xff]  }
  0x36   : > { %1489 = vmatprep.subr.bf16.mxu0 %v1609_v7  ;;  %v239_v28 = vrot.slane %v237_v20, 1  ;;  %v615_v31 = vrot.slane %v613_v25, 3  ;;  %v618_v32 = vrot.slane %v616_v26, 4  ;;  %v415_v54 = vrot.slane %v1781_v13, 1  ;;  %v1628_v2 = vld [vmem:[#allocation2 + $0xc8] sm:$0xff]   ;;  %v1629_v5 = vld [vmem:[#allocation2 + $0x50] sm:$0xff]  }
  0x37   : > { %v235_v30 = vor.u32 %v234_v24, %v230_v16  ;;  %v623_v33 = vrot.slane %v621_v27, 3  ;;  %v626_v35 = vrot.slane %v624_v29, 4  ;;  %v1357_v56 = vcombine.low %v801_v50, %v1810_v51  ;;  %v1631_v14 = vld [vmem:[#allocation2 + $0x58] sm:$0xff]   ;;  %v1638_v25 = vld [vmem:[#allocation2 + $0xe0] sm:$0xff]   ;;  %v1639_v27 = vld [vmem:[#allocation2 + $0x68] sm:$0xff]  }
  0x38   : > { %1442 = vmatpush3.bf16.msra.mxu1 %v1608_v6  ;;  %v243_v34 = vor.u32 %v241_v21, %v239_v28  ;;  %v619_v37 = vor.u32 %v618_v32, %v615_v31  ;;  %v1358_v58 = vcombine.low %v803_v52, %v804_v55  ;;  %v1350_v0 = vcombine.low %v1785_v15, %v1785_v15  ;;  %v1630_v6 = vld [vmem:[#allocation2 + $0xd0] sm:$0xff]   ;;  %v1632_v16 = vld [vmem:[#allocation2 + $0xd8] sm:$0xff]   ;;  %v1019_v32 = vld [vmem:[%s1769_s6 + $0x4] sm:$0x8] }
  0x39   : > { %1490 = vmatpush3.bf16.msra.mxu0 %v1609_v7  ;;  %1447 = vmatprep.subr.bf16.mxu1 %v1612_v22  ;;  %v240_v36 = vsel %vm228_vm0, %v235_v30, %v239_v28  ;;  %v627_v39 = vor.u32 %v626_v35, %v623_v33  ;;  %v824_v61 = vrot.slane %v1357_v56, 2  ;;  %v416_v1 = vsel %vm413_vm3, %v414_v53, %v415_v54  ;;  %v499_v7 = vld [vmem:[%s1769_s6 + $0xc] sm:$0x7]  ;;  %v1641_v30 = vld [vmem:[#allocation2 + $0x70] sm:$0xff]   ;;  %v1643_v13 = vld [vmem:[#allocation2 + $0x78] sm:$0xff]  }
  0x3a   : > { %1495 = vmatprep.subr.bf16.mxu0 %v1616_v23  ;;  %1443 = vmatprep.mubr.msk.bf16.mxu1 %vm268_vm1, %v240_v36  ;;  %v825_v63 = vrot.slane %v1358_v58, 2  ;;  %v1826_v4 = vcombine.low %v803_v52, %v908_v59  ;;  %v922_v8 = vshrl.u32 %v1357_v56, 16  ;;  %v925_v9 = vshll.u32 %v1357_v56, 16  ;;  %v1642_v31 = vld [vmem:[#allocation2 + $0xf0] sm:$0xff]   ;;  %v1644_v33 = vld [vmem:[#allocation2 + $0xf8] sm:$0xff]   ;;  %v1646_v35 = vld [vmem:[#allocation2 + $0x100] sm:$0xff]  }
  0x3b   : > { %1444 = vmatmul.mubr.msk.bf16.vlgmr.msra.gmra.mrb[0].mxu1 %vm268_vm1, %v243_v34  ;;  %v628_v41 = vsel %vm611_vm2, %v619_v37, %v627_v39  ;;  %v1335_v15 = vcombine.low %v1776_v10, %v499_v7  ;;  %v1372_v34 = vcombine.low %v1019_v32, %v1810_v51  ;;  %vm1201_vm3 = vcmask 1040384  }
  0x3c   : > { %1448 = vmatpush3.bf16.msra.mxu1 %v1612_v22  ;;  %1455 = vmatprep.mubr.msk.bf16.mxu1 %vm268_vm1, %v1312_v12  ;;  %v826_v3 = vsel %vm823_vm4, %v824_v61, %v825_v63  ;;  %v930_v11 = vshrl.u32 %v1826_v4, 16  ;;  %v933_v12 = vshll.u32 %v1826_v4, 16  ;;  %v924_v17 = vrot.slane %v922_v8, 2  ;;  %v1634_v22 = vld [vmem:[#allocation2 + $0x60] sm:$0xff]  }
  0x3d   : > { %1491 = vmatprep.mubr.msk.bf16.mxu0 %vm268_vm1, %v628_v41  ;;  %1449 = vmatprep.subr.bf16.mxu1 %v1617_v38  ;;  %v927_v19 = vrot.slane %v925_v9, 3  ;;  %v516_v24 = vrot.slane %v1335_v15, 3  ;;  %v1031_v36 = vrot.slane %v1372_v34, 3  ;;  %v1032_v37 = vrot.slane %v1826_v4, 3  ;;  %v1649_v41 = vld [vmem:[#allocation2 + $0x118] sm:$0xff]  }
  0x3e   : > { %1492 = vmatmul.mubr.msk.bf16.vlgmr.msra.gmra.mrb[0].mxu0 %vm268_vm1, %v627_v39  ;;  %v932_v20 = vrot.slane %v930_v11, 2  ;;  %v935_v21 = vrot.slane %v933_v12, 3 }
  0x3f   : > { %1496 = vmatpush3.bf16.msra.mxu0 %v1616_v23  ;;  %1503 = vmatprep.mubr.msk.bf16.mxu0 %vm268_vm1, %v1349_v40  ;;  %v515_v23 = vrot.slane %v1788_v18, 3  ;;  %v928_v26 = vor.u32 %v927_v19, %v924_v17  ;;  %v1640_v18 = vld [vmem:[#allocation2 + $0xe8] sm:$0xff]   ;;  %v1033_v39 = vsel %vm514_vm5, %v1031_v36, %v1032_v37  ;;  %v1648_v40 = vld [vmem:[#allocation2 + $0x110] sm:$0xff]  }
  0x40   : > { %1497 = vmatprep.subr.bf16.mxu0 %v1618_v42  ;;  %1450 = vmatpush3.bf16.msra.mxu1 %v1617_v38  ;;  %v936_v10 = vor.u32 %v935_v21, %v932_v20  ;;  %v1647_v38 = vld [vmem:[#allocation2 + $0x108] sm:$0xff]  }
  0x41   : > { %1451 = vmatprep.subr.bf16.mxu1 %v1619_v43  ;;  %v517_v28 = vsel %vm514_vm5, %v515_v23, %v516_v24 }
  0x42   : > { %v937_v29 = vsel %vm920_vm6, %v928_v26, %v936_v10 }
  0x43   : > { %1498 = vmatpush3.bf16.msra.mxu0 %v1618_v42  ;;  %v1115_v42 = vlaneseq }
  0x44   : > { %1499 = vmatprep.subr.bf16.mxu0 %v1620_v44  ;;  %1452 = vmatpush3.bf16.msra.mxu1 %v1619_v43 }
  0x45   : > { %1453 = vmatprep.subr.bf16.mxu1 %v1621_v45  ;;  %v1116_v43 = vshrl.u32 %v1115_v42, 7 }
  0x47   : > { %1500 = vmatpush3.bf16.msra.mxu0 %v1620_v44  ;;  %v1118_v44 = vadd.s32 16, %v1116_v43 }
  0x48   : > { %1501 = vmatprep.subr.bf16.mxu0 %v1622_v46  ;;  %1454 = vmatpush3.bf16.msra.mxu1 %v1621_v45  ;;  %v1117_v45 = vadd.s32 8, %v1116_v43 }
  0x49   : > { %1459 = vmatprep.subr.bf16.mxu1 %v1623_v48 }
  0x4a   : > { %v1857_v50 = vmul.u32.u64.low 2863311531, %v1117_v45  ;;  %v1858_v51 = vmul.u32.u64.high 2863311531, %v1117_v45, %v1857_v50 }
  0x4b   : > { %1502 = vmatpush3.bf16.msra.mxu0 %v1622_v46  ;;  %1456 = vmatmul.mubr.msk.bf16.vlgmr.msra.gmra.mrb[0].mxu1 %vm268_vm1, %v1320_v57  ;;  %v1851_v46 = vmul.u32.u64.low 2863311531, %v1118_v44  ;;  %v1852_v47 = vmul.u32.u64.high 2863311531, %v1118_v44, %v1851_v46 }
  0x4c   : > { %1507 = vmatprep.subr.bf16.mxu0 %v1625_v60  ;;  %1460 = vmatpush3.bf16.msra.mxu1 %v1623_v48  ;;  %v1854_v48 = vmul.u32.u64.low 2863311531, %v1116_v43  ;;  %v1855_v49 = vmul.u32.u64.high 2863311531, %v1116_v43, %v1854_v48  ;;  %v1136_v56 = vshrl.u32 %v1858_v51, 2 }
  0x4d   : > { %1461 = vmatprep.subr.bf16.mxu1 %v1627_v62  ;;  %1467 = vmatprep.mubr.msk.bf16.mxu1 %vm268_vm1, %v416_v1  ;;  %v1147_v52 = vshrl.u32 %v1852_v47, 2 }
  0x4e   : > { %1504 = vmatmul.mubr.msk.bf16.vlgmr.msra.gmra.mrb[0].mxu0 %vm268_vm1, %v1350_v0  ;;  %v1125_v53 = vshrl.u32 %v1855_v49, 2  ;;  %v1137_v61 = vmul.u32 6, %v1136_v56 }
  0x4f   : > { %1508 = vmatpush3.bf16.msra.mxu0 %v1625_v60  ;;  %1515 = vmatprep.mubr.msk.bf16.mxu0 %vm268_vm1, %v826_v3  ;;  %v1148_v58 = vmul.u32 6, %v1147_v52 }
  0x50   : > { %1509 = vmatprep.subr.bf16.mxu0 %v1628_v2  ;;  %1462 = vmatpush3.bf16.msra.mxu1 %v1627_v62  ;;  %v1126_v60 = vmul.u32 6, %v1125_v53  ;;  %v1138_v0 = vsub.s32 %v1117_v45, %v1137_v61 }
  0x51   : > { %1463 = vmatprep.subr.bf16.mxu1 %v1629_v5  ;;  %v1149_v62 = vsub.s32 %v1118_v44, %v1148_v58 }
  0x52   : > { %vm1153_vm12 = vcmp.ne.s32.totalorder %v1138_v0, 0  ;;  %vm1156_vm13 = vcmp.lt.s32.totalorder %v1138_v0, 0  ;;  %v1162_v3 = vadd.s32 6, %v1138_v0 }
  0x53   : > { %1510 = vmatpush3.bf16.msra.mxu0 %v1628_v2  ;;  %vm1154_vm7 = vcmp.ne.s32.totalorder %v1149_v62, 0  ;;  %vm1157_vm8 = vcmp.lt.s32.totalorder %v1149_v62, 0  ;;  %v1163_v1 = vadd.s32 6, %v1149_v62  ;;  %vm1159_vm15 = vmand %vm1156_vm13, %vm1153_vm12 }
  0x54   : > { %1511 = vmatprep.subr.bf16.mxu0 %v1630_v6  ;;  %1464 = vmatpush3.bf16.msra.mxu1 %v1629_v5  ;;  %vm1160_vm11 = vmand %vm1157_vm8, %vm1154_vm7  ;;  %v1165_v7 = vsel %vm1159_vm15, %v1162_v3, %v1138_v0 }
  0x55   : > { %1465 = vmatprep.subr.bf16.mxu1 %v1631_v14  ;;  %v1166_v4 = vsel %vm1160_vm11, %v1163_v1, %v1149_v62  ;;  %vm1168_vm2 = vcmp.lt.s32.totalorder %v1165_v7, 4 }
  0x56   : > { %vm1169_vm0 = vcmp.lt.s32.totalorder %v1166_v4, 4 }
  0x57   : > { %1512 = vmatpush3.bf16.msra.mxu0 %v1630_v6 }
  0x58   : > { %1513 = vmatprep.subr.bf16.mxu0 %v1632_v16  ;;  %1466 = vmatpush3.bf16.msra.mxu1 %v1631_v14 }
  0x59   : > { %1471 = vmatprep.subr.bf16.mxu1 %v1634_v22 }
  0x5b   : > { %1514 = vmatpush3.bf16.msra.mxu0 %v1632_v16  ;;  %1468 = vmatmul.mubr.msk.bf16.vlgmr.msra.gmra.mrb[0].mxu1 %vm268_vm1, %v415_v54 }
  0x5c   : > { %1519 = vmatprep.subr.bf16.mxu0 %v1638_v25  ;;  %1472 = vmatpush3.bf16.msra.mxu1 %v1634_v22 }
  0x5d   : > { %1473 = vmatprep.subr.bf16.mxu1 %v1639_v27  ;;  %1479 = vmatprep.mubr.msk.bf16.mxu1 %vm268_vm1, %v517_v28 }
  0x5e   : > { %1516 = vmatmul.mubr.msk.bf16.vlgmr.msra.gmra.mrb[0].mxu0 %vm268_vm1, %v825_v63  ;;  %v1127_v63 = vsub.s32 %v1116_v43, %v1126_v60 }
  0x5f   : > { %1520 = vmatpush3.bf16.msra.mxu0 %v1638_v25  ;;  %1527 = vmatprep.mubr.msk.bf16.mxu0 %vm268_vm1, %v937_v29 }
  0x60   : > { %1521 = vmatprep.subr.bf16.mxu0 %v1640_v18  ;;  %1474 = vmatpush3.bf16.msra.mxu1 %v1639_v27  ;;  %vm1152_vm9 = vcmp.ne.s32.totalorder %v1127_v63, 0  ;;  %vm1155_vm10 = vcmp.lt.s32.totalorder %v1127_v63, 0  ;;  %v1161_v2 = vadd.s32 6, %v1127_v63 }
  0x61   : > { %1475 = vmatprep.subr.bf16.mxu1 %v1641_v30  ;;  %vm1158_vm14 = vmand %vm1155_vm10, %vm1152_vm9 }
  0x62   : > { %v1164_v5 = vsel %vm1158_vm14, %v1161_v2, %v1127_v63 }
  0x63   : > { %1522 = vmatpush3.bf16.msra.mxu0 %v1640_v18 }
  0x64   : > { %1523 = vmatprep.subr.bf16.mxu0 %v1642_v31  ;;  %1476 = vmatpush3.bf16.msra.mxu1 %v1641_v30 }
  0x65   : > { %1477 = vmatprep.subr.bf16.mxu1 %v1643_v13 }
  0x67   : > { %1524 = vmatpush3.bf16.msra.mxu0 %v1642_v31 }
  0x68   : > { %1525 = vmatprep.subr.bf16.mxu0 %v1644_v33  ;;  %1478 = vmatpush3.bf16.msra.mxu1 %v1643_v13 }
  0x6b   : > { %1526 = vmatpush3.bf16.msra.mxu0 %v1644_v33  ;;  %1480 = vmatmul.mubr.msk.bf16.vlgmr.msra.gmra.mrb[0].mxu1 %vm268_vm1, %v516_v24 }
  0x6c   : > { %1531 = vmatprep.subr.bf16.mxu0 %v1646_v35 }
  0x6e   : > { %1528 = vmatmul.mubr.msk.bf16.vlgmr.msra.gmra.mrb[0].mxu0 %vm268_vm1, %v936_v10 }
  0x6f   : > { %1532 = vmatpush3.bf16.msra.mxu0 %v1646_v35  ;;  %1539 = vmatprep.mubr.msk.bf16.mxu0 %vm268_vm1, %v1033_v39 }
  0x70   : > { %1533 = vmatprep.subr.bf16.mxu0 %v1647_v38 }
  0x73   : > { %1534 = vmatpush3.bf16.msra.mxu0 %v1647_v38 }
  0x74   : > { %1535 = vmatprep.subr.bf16.mxu0 %v1648_v40 }
  0x77   : > { %1536 = vmatpush3.bf16.msra.mxu0 %v1648_v40 }
  0x78   : > { %1537 = vmatprep.subr.bf16.mxu0 %v1649_v41 }
  0x7b   : > { %1538 = vmatpush3.bf16.msra.mxu0 %v1649_v41 }
  0x7e   : > { %1540 = vmatmul.mubr.msk.bf16.vlgmr.msra.gmra.mrb[0].mxu0 %vm268_vm1, %v1032_v37  ;;  %vm1167_vm1 = vcmp.lt.s32.totalorder %v1164_v5, 4 }
 0x13e   : > { %v1481_v54 = vpop.f32.mrb[0].mxu1 }
 0x13f   : > { %v582_v55 = vpop.f32.mrb[1].mxu1 }
 0x140   : > { %v1482_v57 = vpop.f32.mrb[2].mxu1 }
 0x141   : > { %v585_v59 = vpop.f32.mrb[3].mxu1 }
 0x151   : > { %v1541_v6 = vpop.f32.mrb[0].mxu0 }
 0x152   : > { %v1543_v8 = vadd.f32 %v1541_v6, %v1481_v54  ;;  %v1098_v9 = vpop.f32.mrb[1].mxu0 }
 0x153   : > { %v1544_v11 = vadd.f32 %v1098_v9, %v582_v55  ;;  %v1542_v12 = vpop.f32.mrb[2].mxu0 }
 0x154   : > { %v1178_v14 = vsel %vm1169_vm0, %v1543_v8, 0.0  ;;  %v1101_v15 = vpop.f32.mrb[3].mxu0 }
 0x155   : > { %1181 = vst [vmem:[%s192_s9 + $0x10] sm:$0xff] %v1178_v14  ;;  %v1176_v16 = vsel %vm1167_vm1, %v1544_v11, 0.0  ;;  %v1545_v17 = vadd.f32 %v1101_v15, %v585_v59  ;;  %v1192_v23 = vmul.f32 %v1178_v14, %v1178_v14 }
 0x156   : > { %1179 = vst [vmem:[%s192_s9] sm:$0xff] %v1176_v16  ;;  %v1190_v20 = vmul.f32 %v1176_v16, %v1176_v16 }
 0x157   : > { %v1177_v19 = vsel %vm1168_vm2, %v1545_v17, 0.0 }
 0x158   : > { %1180 = vst [vmem:[%s192_s9 + $0x8] sm:$0xff] %v1177_v19  ;;  %v1182_v21 = vadd.f32 %v1177_v19, %v1176_v16  ;;  %v1191_v22 = vmul.f32 %v1177_v19, %v1177_v19 }
 0x15a   : > { %v1183_v24 = vadd.f32 %v1182_v21, %v1178_v14  ;;  %v1193_v25 = vadd.f32 %v1191_v22, %v1190_v20 }
 0x15c   : > { %v1184_v26 = vrot.slane %v1183_v24, 4  ;;  %v1194_v10 = vadd.f32 %v1193_v25, %v1192_v23 }
 0x15e   : > { %v1185_v27 = vadd.f32 %v1184_v26, %v1183_v24  ;;  %v1195_v28 = vrot.slane %v1194_v10, 4 }
 0x160   : > { %v1186_v18 = vrot.slane %v1185_v27, 2  ;;  %v1196_v29 = vadd.f32 %v1195_v28, %v1194_v10 }
 0x162   : > { %v1187_v30 = vadd.f32 %v1186_v18, %v1185_v27  ;;  %v1197_v31 = vrot.slane %v1196_v29, 2 }
 0x164   : > { %v1188_v13 = vrot.slane %v1187_v30, 1  ;;  %v1198_v32 = vadd.f32 %v1197_v31, %v1196_v29 }
 0x166   : > { %v1199_v33 = vrot.slane %v1198_v32, 1  ;;  %v1189_v34 = vadd.f32 %v1188_v13, %v1187_v30 }
 0x168   : > { %v1200_v35 = vadd.f32 %v1199_v33, %v1198_v32 }
 0x16a   : > { %v1202_v36 = vsel %vm1201_vm3, %v1189_v34, %v1200_v35 }
 0x16b   : > { %1203 = vst [vmem:[%s196_s15] sm:$0x3] %v1202_v36 }
 0x16c PF: > { %s15_s12 = sadd.s32 1, %s1689_s12  }
 0x16d   : > { %p12_p3 = scmp.ge.s32.totalorder %s15_s12, 4  }
 0x16f   :  { %14 = sbr.rel (!%p12_p3) target bundleno = 1 (0x1), region = 75 }
 0x176   :  { %1239 = vsyncpa [#allocation3], 1 }
 0x177   :  { %1241 = vsyncpa [#allocation3 + $0x1], 1 }

// kernel: tile.57
= control target key start
LH: loop header
LB: loop body
LE: loop exit
PB: predicated region body
PF: predicated region fallthrough
CT: control target
= control target key end

     0   :  { %s22_s0 = inlined_call_operand.vmem [shape: f32[16], index: 0, kind: input, shape index: {}]   ;;  %s23_s1 = inlined_call_operand.vmem [shape: f32[4,16], index: 1, kind: output, shape index: {}]  }
   0x1   :  { %v4_v0 = vld [vmem:[%s22_s0] ss:$0 sm:$0xff] }
   0x2   :  { %5 = vst [vmem:[%s23_s1] sm:$0xf] %v4_v0 }

// kernel: tile.59
= control target key start
LH: loop header
LB: loop body
LE: loop exit
PB: predicated region body
PF: predicated region fallthrough
CT: control target
= control target key end

     0   :  { %vm7_vm0 = vcmask 130048   ;;  %s37_s8 = smov 16   ;;  %s38_s9 = smov 32   ;;  %vm13_vm1 = vcmask 523648   ;;  %vm19_vm2 = vcmask 392448   ;;  %vm25_vm3 = vcmask 261248   ;;  %s55_s0 = inlined_call_operand.vmem [shape: f32[4,16], index: 0, kind: input, shape index: {}]   ;;  %s56_s1 = inlined_call_operand.vmem [shape: f32[1,64], index: 1, kind: output, shape index: {}]  }
   0x1   :  { %v4_v0 = vld [vmem:[%s55_s0] sm:$0xf]  ;;  %s36_s0 = smov 48  }
   0x2   :  { %5 = vst [vmem:[#allocation1] sm:$0xf] %v4_v0 }
   0x9   :  { %v10_v1 = vld [vmem:[#allocation1 + $0x3] sm:$0x1]   ;;  %v22_v2 = vld [vmem:[#allocation1 + $0x1] sm:$0x1]   ;;  %v6_v3 = vld [vmem:[#allocation1] sm:$0x1]  }
   0xa   :  { %11 = vrot.lane.b32.xlu0 %v10_v1, %s36_s0  ;;  %23 = vrot.lane.b32.xlu1 %v22_v2, %s37_s8  ;;  %v16_v4 = vld [vmem:[#allocation1 + $0x2] sm:$0x1]   ;;  %8 = vst.msk [vmem:[#allocation0] sm:$0x1] %vm7_vm0, %v6_v3  }
   0xe   :  { %17 = vrot.lane.b32.xlu0 %v16_v4, %s38_s9 }
  0x7c   :  { %v12_v5 = vpop.permute.xlu0 %11   ;;  %v24_v6 = vpop.permute.xlu1 %23  }
  0x7d   :  { %14 = vst.msk [vmem:[#allocation0] sm:$0x1] %vm13_vm1, %v12_v5  }
  0x80   :  { %v18_v7 = vpop.permute.xlu0 %17  }
  0x81   :  { %20 = vst.msk [vmem:[#allocation0] sm:$0x1] %vm19_vm2, %v18_v7  }
  0x82   :  { %26 = vst.msk [vmem:[#allocation0] sm:$0x1] %vm25_vm3, %v24_v6  }
  0x89   :  { %v30_v8 = vld [vmem:[#allocation0] sm:$0x1] }
  0x8a   :  { %32 = vst [vmem:[%s56_s1] sm:$0x1] %v30_v8 }

// kernel: generator_forward.12
= control target key start
LH: loop header
LB: loop body
LE: loop exit
PB: predicated region body
PF: predicated region fallthrough
CT: control target
= control target key end

     0   :  { %s400_s12 = smov 0   ;;  %s461_s0 = inlined_call_operand.vmem [shape: f32[2,80,64], index: 0, kind: input, shape index: {}]   ;;  %s462_s1 = inlined_call_operand.vmem [shape: f32[1,64], index: 1, kind: input, shape index: {}]   ;;  %s463_s2 = inlined_call_operand.vmem [shape: f32[1,64], index: 2, kind: input, shape index: {}]   ;;  %s464_s3 = inlined_call_operand.vmem [shape: bf16[2,80,64], index: 3, kind: output, shape index: {}]  }
   0x1 LB: > { %s331_s13 = sadd.s32 4294967295, %s378_s12   ;;  %p335_p0 = scmp.ge.s32.totalorder %s378_s12, 1  ;;  %s378_s12 = sphi %s400_s12, %s13_s12  }
   0x2   : > { %p137_p1 = scmp.lt.s32.totalorder %s378_s12, 3 }
   0x4   : > { %p138_p2 = pnand %p335_p0, %p137_p1 }
   0x5   : > { %p161_p3 = scmp.lt.s32.totalorder (!%p138_p2), %s331_s13, 1  ;;  %v338_v0 = vld [vmem:[%s462_s1] ss:$0 sm:$0xff] (!%p138_p2)  ;;  %vm265_vm0 = vcmask (!%p138_p2), 519168  }
   0x6   : > { %141 = sbr.rel (%p138_p2) target bundleno = 35 (0x23), region = 32  ;;  %v339_v1 = vld [vmem:[%s463_s2] ss:$0 sm:$0xff] (!%p138_p2) }
   0xd   : > { %s466_s13 = smov (!%p161_p3, %s331_s13), 1 }
   0xe   : > { %s362_s14 = smul.u32 80, %s466_s13 }
   0xf   : > { %s363_s22 = smul.u32 40, %s466_s13 }
  0x10   : > { %s417_s19 = scalar_lea.vmem %s461_s0, %s362_s14 }
  0x11   : > { %v171_v2 = vld [vmem:[%s417_s19] sm:$0xff]  ;;  %v172_v3 = vld [vmem:[%s417_s19 + $0x8] sm:$0xff]  ;;  %v173_v4 = vld [vmem:[%s417_s19 + $0x10] sm:$0xff]  ;;  %s434_s25 = scalar_lea.vmem %s464_s3, %s363_s22 }
  0x12   : > { %v188_v5 = vmul.f32 %v338_v0, %v171_v2  ;;  %v189_v6 = vmul.f32 %v338_v0, %v172_v3  ;;  %v190_v7 = vmul.f32 %v338_v0, %v173_v4  ;;  %v174_v8 = vld [vmem:[%s417_s19 + $0x18] sm:$0xff]  ;;  %v175_v9 = vld [vmem:[%s417_s19 + $0x20] sm:$0xff]  ;;  %v176_v10 = vld [vmem:[%s417_s19 + $0x28] sm:$0xff] }
  0x13   : > { %v191_v11 = vmul.f32 %v338_v0, %v174_v8  ;;  %v192_v12 = vmul.f32 %v338_v0, %v175_v9  ;;  %v193_v13 = vmul.f32 %v338_v0, %v176_v10  ;;  %v177_v14 = vld [vmem:[%s417_s19 + $0x30] sm:$0xff]  ;;  %v178_v15 = vld [vmem:[%s417_s19 + $0x38] sm:$0xff]  ;;  %v179_v32 = vld [vmem:[%s417_s19 + $0x40] sm:$0xff] }
  0x14   : > { %v205_v16 = vadd.f32 %v339_v1, %v188_v5  ;;  %v206_v17 = vadd.f32 %v339_v1, %v189_v6  ;;  %v207_v18 = vadd.f32 %v339_v1, %v190_v7  ;;  %v194_v19 = vmul.f32 %v338_v0, %v177_v14  ;;  %v180_v33 = vld [vmem:[%s417_s19 + $0x48] sm:$0xff] }
  0x15   : > { %v208_v20 = vadd.f32 %v339_v1, %v191_v11  ;;  %v209_v21 = vadd.f32 %v339_v1, %v192_v12  ;;  %v210_v22 = vadd.f32 %v339_v1, %v193_v13  ;;  %v195_v23 = vmul.f32 %v338_v0, %v178_v15 }
  0x16   : > { %v215_v24 = vmax.f32 %v205_v16, 0.0  ;;  %v216_v25 = vmax.f32 %v206_v17, 0.0  ;;  %v217_v26 = vmax.f32 %v207_v18, 0.0  ;;  %v211_v27 = vadd.f32 %v339_v1, %v194_v19 }
  0x17   : > { %v218_v28 = vmax.f32 %v208_v20, 0.0  ;;  %v219_v29 = vmax.f32 %v209_v21, 0.0  ;;  %v220_v30 = vmax.f32 %v210_v22, 0.0  ;;  %v212_v31 = vadd.f32 %v339_v1, %v195_v23 }
  0x18   : > { %v352_v34 = vpack.c.bf16 %v215_v24, %v215_v24  ;;  %v353_v35 = vpack.c.bf16 %v216_v25, %v216_v25  ;;  %v354_v36 = vpack.c.bf16 %v217_v26, %v217_v26  ;;  %v221_v37 = vmax.f32 %v211_v27, 0.0 }
  0x19   : > { %v355_v38 = vpack.c.bf16 %v218_v28, %v218_v28  ;;  %v356_v39 = vpack.c.bf16 %v219_v29, %v219_v29  ;;  %v357_v40 = vpack.c.bf16 %v220_v30, %v220_v30  ;;  %v222_v41 = vmax.f32 %v212_v31, 0.0 }
  0x1a   : > { %266 = vst.msk [vmem:[%s434_s25] sm:$0xf] %vm265_vm0, %v352_v34  ;;  %267 = vst.msk [vmem:[%s434_s25 + $0x4] sm:$0xf] %vm265_vm0, %v353_v35  ;;  %v358_v42 = vpack.c.bf16 %v221_v37, %v221_v37  ;;  %v196_v43 = vmul.f32 %v338_v0, %v179_v32  ;;  %v197_v44 = vmul.f32 %v338_v0, %v180_v33 }
  0x1b   : > { %268 = vst.msk [vmem:[%s434_s25 + $0x8] sm:$0xf] %vm265_vm0, %v354_v36  ;;  %269 = vst.msk [vmem:[%s434_s25 + $0xc] sm:$0xf] %vm265_vm0, %v355_v38  ;;  %v359_v45 = vpack.c.bf16 %v222_v41, %v222_v41 }
  0x1c   : > { %270 = vst.msk [vmem:[%s434_s25 + $0x10] sm:$0xf] %vm265_vm0, %v356_v39  ;;  %271 = vst.msk [vmem:[%s434_s25 + $0x14] sm:$0xf] %vm265_vm0, %v357_v40  ;;  %v213_v46 = vadd.f32 %v339_v1, %v196_v43  ;;  %v214_v47 = vadd.f32 %v339_v1, %v197_v44 }
  0x1d   : > { %272 = vst.msk [vmem:[%s434_s25 + $0x18] sm:$0xf] %vm265_vm0, %v358_v42  ;;  %273 = vst.msk [vmem:[%s434_s25 + $0x1c] sm:$0xf] %vm265_vm0, %v359_v45 }
  0x1e   : > { %v223_v48 = vmax.f32 %v213_v46, 0.0  ;;  %v224_v49 = vmax.f32 %v214_v47, 0.0 }
  0x20   : > { %v360_v50 = vpack.c.bf16 %v223_v48, %v223_v48  ;;  %v361_v51 = vpack.c.bf16 %v224_v49, %v224_v49 }
  0x22   : > { %274 = vst.msk [vmem:[%s434_s25 + $0x20] sm:$0xf] %vm265_vm0, %v360_v50  ;;  %275 = vst.msk [vmem:[%s434_s25 + $0x24] sm:$0xf] %vm265_vm0, %v361_v51 }
  0x23 PF: > { %s13_s12 = sadd.s32 1, %s378_s12  }
  0x24   : > { %p10_p4 = scmp.ge.s32.totalorder %s13_s12, 4  }
  0x26   :  { %12 = sbr.rel (!%p10_p4) target bundleno = 1 (0x1), region = 62 }

// kernel: generator_forward.11
= control target key start
LH: loop header
LB: loop body
LE: loop exit
PB: predicated region body
PF: predicated region fallthrough
CT: control target
= control target key end

     0   :  { %s2537_s12 = smov 0   ;;  %s3251_s0 = inlined_call_operand.vmem [shape: bf16[2,110,32], index: 0, kind: input, shape index: {}]   ;;  %s3252_s1 = inlined_call_operand.vmem [shape: bf16[288,64], index: 1, kind: input, shape index: {}]   ;;  %s3253_s2 = inlined_call_operand.vmem [shape: f32[2,80,64], index: 2, kind: output, shape index: {0}]   ;;  %s3254_s3 = inlined_call_operand.vmem [shape: f32[2,2,64], index: 3, kind: output, shape index: {1}]  }
   0x1 LB: > { %s1905_s13 = sadd.s32 4294967295, %s2513_s12   ;;  %p1909_p0 = scmp.ge.s32.totalorder %s2513_s12, 1  ;;  %s2513_s12 = sphi %s2537_s12, %s14_s12  }
   0x2   : > { %p140_p1 = scmp.lt.s32.totalorder %s2513_s12, 3 }
   0x4   : > { %p141_p2 = pnand %p1909_p0, %p140_p1 }
   0x5   : > { %v2548_v0 = vld [vmem:[%s3252_s1 + $0x40] sm:$0xff] (!%p141_p2)   ;;  %v2515_v1 = vmov (!%p141_p2), 0.0   ;;  %v2467_v2 = vld [vmem:[%s3252_s1 + $0x10] sm:$0xff] (!%p141_p2)   ;;  %v2559_v3 = vld [vmem:[%s3252_s1 + $0x48] sm:$0xff] (!%p141_p2)   ;;  %vm2516_vm0 = vmmov (!%p141_p2), 0   ;;  %p168_p3 = scmp.lt.s32.totalorder (!%p141_p2), %s1905_s13, 1 }
   0x6   : > { %144 = sbr.rel (%p141_p2) target bundleno = 441 (0x1b9), region = 28  ;;  %2160 = vmatprep.subr.bf16.mxu0 (!%p141_p2), %v2515_v1  ;;  %2064 = vmatprep.subr.bf16.mxu1 (!%p141_p2), %v2515_v1  ;;  %v2469_v4 = vld [vmem:[%s3252_s1 + $0x18] sm:$0xff] (!%p141_p2)   ;;  %vm230_vm1 = vsmask.f32 (!%p141_p2), 7424  ;;  %vm773_vm2 = vsmask.f32 (!%p141_p2), 6400 }
   0x7   : > { %2161 = vmatpush3.bf16.msra.mxu0 (!%p141_p2), %v2548_v0  ;;  %2068 = vmatprep.mubr.msk.bf16.mxu1 (!%p141_p2), %vm2516_vm0, %v2515_v1  ;;  %vm287_vm3 = vcmask (!%p141_p2), 261120   ;;  %v2476_v29 = vld [vmem:[%s3252_s1] sm:$0xff] (!%p141_p2)   ;;  %v2474_v37 = vld [vmem:[%s3252_s1 + $0x50] sm:$0xff] (!%p141_p2)   ;;  %v2484_v44 = vld [vmem:[%s3252_s1 + $0x8] sm:$0xff] (!%p141_p2)   ;;  %vm479_vm4 = vcmask (!%p141_p2), 1046528   ;;  %vm945_vm5 = vcmask (!%p141_p2), 1045504  }
   0x8   : > { %2065 = vmatpush3.bf16.msra.mxu1 (!%p141_p2), %v2467_v2  ;;  %2162 = vmatprep.subr.bf16.mxu0 (!%p141_p2), %v2515_v1  ;;  %v2478_v47 = vld [vmem:[%s3252_s1 + $0x58] sm:$0xff] (!%p141_p2)   ;;  %vm1411_vm6 = vcmask (!%p141_p2), 1044480   ;;  %vm1239_vm7 = vsmask.f32 (!%p141_p2), 5376 }
   0x9   : > { %2066 = vmatprep.subr.bf16.mxu1 (!%p141_p2), %v2515_v1  ;;  %2164 = vmatprep.mubr.msk.bf16.mxu0 (!%p141_p2), %vm2516_vm0, %v2515_v1 }
   0xb   : > { %2163 = vmatpush3.bf16.msra.mxu0 (!%p141_p2), %v2559_v3 }
   0xc   : > { %2067 = vmatpush3.bf16.msra.mxu1 (!%p141_p2), %v2469_v4  ;;  %2184 = vmatprep.subr.bf16.mxu0 (!%p141_p2), %v2515_v1 }
   0xd   : > { %s3280_s13 = smov (!%p168_p3, %s1905_s13), 1  ;;  %2088 = vmatprep.subr.bf16.mxu1 %v2515_v1 }
   0xe   : > { %s2434_s22 = smul.u32 56, %s3280_s13  ;;  %s1912_s6 = sshll.u32 %s3280_s13, 1 }
   0xf   : > { %s2435_s29 = smul.u32 80, %s3280_s13  ;;  %s181_s9 = scalar_lea.vmem %s3254_s3, %s1912_s6 }
  0x10   : > { %s2578_s25 = scalar_lea.vmem %s3251_s0, %s2434_s22 }
  0x11   : > { %v183_v5 = vld [vmem:[%s2578_s25] sm:$0xf]  ;;  %v2583_v6 = vld [vmem:[%s2578_s25 + $0x4] sm:$0xf]  ;;  %v2589_v8 = vld [vmem:[%s2578_s25 + $0x8] sm:$0xff]   ;;  %s3092_s5 = scalar_lea.vmem %s3253_s2, %s2435_s29 }
  0x12   : > { %v2586_v7 = vcombine.low %v183_v5, %v2583_v6  ;;  %v601_v9 = vld [vmem:[%s2578_s25 + $0x4] sm:$0xe]  ;;  %v2593_v10 = vld [vmem:[%s2578_s25 + $0x8] sm:$0xf]  ;;  %v239_v13 = vshll.u32 %v2589_v8, 16  ;;  %v2602_v15 = vld [vmem:[%s2578_s25 + $0xc] sm:$0xff]  }
  0x13   : > { %v2599_v14 = vcombine.low %v601_v9, %v2593_v10  ;;  %v2605_v16 = vld [vmem:[%s2578_s25 + $0x10] sm:$0xff]   ;;  %v783_v21 = vshrl.u32 %v2602_v15, 16  ;;  %v786_v22 = vshll.u32 %v2602_v15, 16  ;;  %v243_v23 = vshrl.u32 %v2589_v8, 16  ;;  %v2627_v39 = vld [vmem:[%s2578_s25 + $0x1c] sm:$0xff]  }
  0x14   : > { %v232_v11 = vshrl.u32 %v2586_v7, 16  ;;  %v234_v12 = vshll.u32 %v2586_v7, 16  ;;  %v241_v18 = vrot.slane %v239_v13, 1  ;;  %v2613_v24 = vld [vmem:[%s2578_s25 + $0x14] sm:$0xff]   ;;  %v247_v28 = vshll.u32 %v2605_v16, 16  ;;  %v2655_v56 = vld [vmem:[%s2578_s25 + $0x20] sm:$0xff]  }
  0x15   : > { %v775_v19 = vshrl.u32 %v2599_v14, 16  ;;  %v778_v20 = vshll.u32 %v2599_v14, 16  ;;  %v785_v30 = vrot.slane %v783_v21, 1  ;;  %v788_v31 = vrot.slane %v786_v22, 2  ;;  %v2632_v43 = vld [vmem:[%s2578_s25 + $0x18] sm:$0xff]   ;;  %v2673_v9 = vld [vmem:[%s2578_s25 + $0x20] sm:$0xff]  }
  0x16   : > { %v236_v17 = vrot.slane %v234_v12, 1  ;;  %v792_v32 = vshrl.u32 %v2613_v24, 16  ;;  %v795_v35 = vshll.u32 %v2613_v24, 16  ;;  %v245_v40 = vor.u32 %v243_v23, %v241_v18  ;;  %v937_v59 = vld [vmem:[%s2578_s25 + $0x4] sm:$0xc] }
  0x17   : > { %v777_v26 = vrot.slane %v775_v19, 1  ;;  %v780_v27 = vrot.slane %v778_v20, 2  ;;  %v789_v36 = vor.u32 %v788_v31, %v785_v30  ;;  %v249_v41 = vrot.slane %v247_v28, 1  ;;  %v471_v2 = vld [vmem:[%s2578_s25] sm:$0xe] }
  0x18   : > { %v237_v25 = vor.u32 %v236_v17, %v232_v11  ;;  %v794_v38 = vrot.slane %v792_v32, 1  ;;  %v797_v42 = vrot.slane %v795_v35, 2  ;;  %v801_v48 = vshrl.u32 %v2627_v39, 16  ;;  %v2678_v13 = vld [vmem:[%s2578_s25 + $0x28] ss:$0 sps:$4 sm:$0x11]  }
  0x19   : > { %v781_v34 = vor.u32 %v780_v27, %v777_v26  ;;  %v804_v49 = vshll.u32 %v2627_v39, 16  ;;  %v250_v50 = vsel %vm230_vm1, %v245_v40, %v249_v41  ;;  %v251_v51 = vshrl.u32 %v2605_v16, 16  ;;  %v2500_v26 = vld [vmem:[%s2578_s25 + $0x30] ss:$0 sps:$4 sm:$0x33]  }
  0x1a   : > { %v242_v33 = vsel %vm230_vm1, %v237_v25, %v241_v18  ;;  %v798_v46 = vor.u32 %v797_v42, %v794_v38  ;;  %v255_v52 = vshll.u32 %v2632_v43, 16  ;;  %v803_v54 = vrot.slane %v801_v48, 1  ;;  %v2483_v38 = vld [vmem:[%s3252_s1 + $0x60] sm:$0xff]  }
  0x1b   : > { %2069 = vmatmul.mubr.msk.bf16.vlgmr.msra.gmra.mrb[0].mxu1 %vm287_vm3, %v242_v33  ;;  %v790_v45 = vsel %vm773_vm2, %v781_v34, %v789_v36  ;;  %v806_v55 = vrot.slane %v804_v49, 2  ;;  %v253_v57 = vor.u32 %v251_v51, %v249_v41  ;;  %v263_v61 = vshll.u32 %v2655_v56, 16  ;;  %v2750_v51 = vld [vmem:[%s2578_s25 + $0xc] sm:$0xf] }
  0x1c   : > { %2072 = vmatprep.mubr.msk.bf16.mxu1 %vm2516_vm0, %v2515_v1  ;;  %2089 = vmatpush3.bf16.msra.mxu1 %v2476_v29  ;;  %v799_v53 = vsel %vm773_vm2, %v789_v36, %v798_v46  ;;  %v257_v58 = vrot.slane %v255_v52, 1  ;;  %v259_v63 = vshrl.u32 %v2632_v43, 16  ;;  %v481_v4 = vrot.slane %v2589_v8, 1  ;;  %v2753_v52 = vld [vmem:[%s2578_s25 + $0x10] sm:$0xff]  }
  0x1d   : > { %2090 = vmatprep.subr.bf16.mxu1 %v2515_v1  ;;  %2165 = vmatmul.mubr.msk.bf16.vlgmr.msra.gmra.mrb[0].mxu0 %vm287_vm3, %v790_v45  ;;  %v2664_v60 = vor.u32 %v806_v55, %v803_v54  ;;  %v1933_v5 = vcombine.low %v471_v2, %v2583_v6  ;;  %v483_v11 = vrot.slane %v2605_v16, 1  ;;  %v1962_v12 = vcombine.low %v937_v59, %v2593_v10  ;;  %v2687_v6 = vld [vmem:[%s2578_s25 + $0x28] sm:$0xff]  }
  0x1e   : > { %2185 = vmatpush3.bf16.msra.mxu0 %v2474_v37  ;;  %2168 = vmatprep.mubr.msk.bf16.mxu0 %vm2516_vm0, %v2515_v1  ;;  %v258_v62 = vsel %vm230_vm1, %v253_v57, %v257_v58  ;;  %v265_v18 = vrot.slane %v263_v61, 1  ;;  %v261_v21 = vor.u32 %v259_v63, %v257_v58  ;;  %v1115_v10 = vrot.slane %v2673_v9, 2  ;;  %v2762_v58 = vld [vmem:[%s2578_s25 + $0x18] sm:$0xff]  }
  0x1f   : > { %2186 = vmatprep.subr.bf16.mxu0 %v2515_v1  ;;  %v808_v17 = vsel %vm773_vm2, %v798_v46, %v2664_v60  ;;  %v480_v19 = vrot.slane %v1933_v5, 1  ;;  %v2684_v20 = vsel %vm479_vm4, %v481_v4, %v483_v11  ;;  %v485_v22 = vrot.slane %v2632_v43, 1  ;;  %v1403_v46 = vld [vmem:[%s2578_s25 + $0x8] sm:$0x8] }
  0x20   : > { %2091 = vmatpush3.bf16.msra.mxu1 %v2484_v44  ;;  %v1117_v25 = vrot.slane %v2687_v6, 2  ;;  %v946_v28 = vrot.slane %v1962_v12, 2  ;;  %v947_v29 = vrot.slane %v2602_v15, 2  ;;  %v1119_v31 = vrot.slane %v2500_v26, 2 }
  0x21   : > { %2112 = vmatprep.subr.bf16.mxu1 %v2515_v1  ;;  %v2694_v23 = vsel %vm479_vm4, %v480_v19, %v481_v4  ;;  %v2702_v27 = vsel %vm479_vm4, %v483_v11, %v485_v22  ;;  %v266_v32 = vsel %vm230_vm1, %v261_v21, %v265_v18  ;;  %v267_v33 = vshrl.u32 %v2655_v56, 16  ;;  %v2489_v5 = vld [vmem:[%s2578_s25 + $0x2c] ss:$0 sps:$4 sm:$0x33]  }
  0x22   : > { %2187 = vmatpush3.bf16.msra.mxu0 %v2478_v47  ;;  %v2710_v30 = vsel %vm945_vm5, %v1115_v10, %v1117_v25  ;;  %v271_v34 = vshll.u32 %v2678_v13, 16  ;;  %v2716_v35 = vsel %vm945_vm5, %v1117_v25, %v1119_v31  ;;  %v644_v36 = vrot.slane %v2599_v14, 1  ;;  %v2740_v47 = vld [vmem:[%s2578_s25 + $0x24] sm:$0xff]  }
  0x23   : > { %2073 = vmatmul.mubr.msk.bf16.gmra.mrb[4].mxu1 %vm287_vm3, %v250_v50  ;;  %2208 = vmatprep.subr.bf16.mxu0 %v2515_v1  ;;  %v948_v37 = vsel %vm945_vm5, %v946_v28, %v947_v29  ;;  %v645_v40 = vrot.slane %v2602_v15, 1  ;;  %v269_v41 = vor.u32 %v267_v33, %v265_v18  ;;  %v647_v44 = vrot.slane %v2613_v24, 1  ;;  %v2486_v15 = vld [vmem:[%s3252_s1 + $0x68] sm:$0xff]  }
  0x24   : > { %2076 = vmatprep.mubr.msk.bf16.mxu1 %vm2516_vm0, %v2515_v1  ;;  %v273_v42 = vrot.slane %v271_v34, 1  ;;  %v949_v45 = vrot.slane %v2613_v24, 2  ;;  %v649_v49 = vrot.slane %v2627_v39, 1  ;;  %v2506_v50 = vld [vmem:[%s2578_s25 + $0x2c] ss:$0 sps:$4 sm:$0x11]   ;;  %v1991_v55 = vcombine.low %v1403_v46, %v2750_v51 }
  0x25   : > { %2169 = vmatmul.mubr.msk.bf16.gmra.mrb[4].mxu0 %vm287_vm3, %v799_v53  ;;  %v2728_v14 = vsel %vm479_vm4, %v644_v36, %v645_v40  ;;  %v2743_v48 = vsel %vm479_vm4, %v645_v40, %v647_v44  ;;  %v651_v54 = vrot.slane %v2740_v47, 1  ;;  %v653_v63 = vrot.slane %v2506_v50, 1 }
  0x26   : > { %2172 = vmatprep.mubr.msk.bf16.mxu0 %vm2516_vm0, %v2515_v1  ;;  %v274_v24 = vsel %vm230_vm1, %v269_v41, %v273_v42  ;;  %v2756_v53 = vsel %vm479_vm4, %v647_v44, %v649_v49  ;;  %v950_v57 = vsel %vm945_vm5, %v947_v29, %v949_v45  ;;  %v1412_v61 = vrot.slane %v1991_v55, 3  ;;  %v2493_v41 = vld [vmem:[%s3252_s1 + $0x28] sm:$0xff]  }
  0x27   : > { %v2766_v59 = vsel %vm479_vm4, %v649_v49, %v651_v54  ;;  %v1415_v2 = vrot.slane %v2762_v58, 3  ;;  %v810_v4 = vshrl.u32 %v2740_v47, 16  ;;  %v2779_v12 = vsel %vm479_vm4, %v651_v54, %v653_v63  ;;  %v1067_v49 = vld [vmem:[%s2578_s25 + $0x8] sm:$0xc] }
  0x28   : > { %v1417_v18 = vrot.slane %v2673_v9, 3  ;;  %v951_v19 = vrot.slane %v2627_v39, 2  ;;  %v819_v29 = vshrl.u32 %v2489_v5, 16  ;;  %v822_v31 = vshll.u32 %v2489_v5, 16 }
  0x29   : > { %v812_v25 = vrot.slane %v810_v4, 1  ;;  %v1419_v40 = vrot.slane %v2687_v6, 3  ;;  %v953_v44 = vrot.slane %v2740_v47, 2  ;;  %v1111_v54 = vrot.slane %v2753_v52, 2 }
  0x2a   : > { %v2791_v28 = vsel %vm1411_vm6, %v1415_v2, %v1417_v18  ;;  %v821_v39 = vrot.slane %v819_v29, 1  ;;  %v824_v34 = vrot.slane %v822_v31, 2  ;;  %v952_v36 = vsel %vm945_vm5, %v949_v45, %v951_v19 }
  0x2b   : > { %2077 = vmatmul.mubr.msk.bf16.gmra.mrb[8].mxu1 %vm287_vm3, %v258_v62  ;;  %v1413_v62 = vrot.slane %v2753_v52, 3  ;;  %v1113_v55 = vrot.slane %v2762_v58, 2  ;;  %v1249_v4 = vshrl.u32 %v2753_v52, 16 }
  0x2c   : > { %2080 = vmatprep.mubr.msk.bf16.mxu1 %vm2516_vm0, %v2515_v1 }
  0x2d   : > { %2173 = vmatmul.mubr.msk.bf16.gmra.mrb[8].mxu0 %vm287_vm3, %v808_v17  ;;  %v2776_v11 = vsel %vm1411_vm6, %v1412_v61, %v1413_v62  ;;  %v813_v17 = vshll.u32 %v2740_v47, 16  ;;  %v2786_v21 = vsel %vm1411_vm6, %v1413_v62, %v1415_v2  ;;  %v955_v47 = vrot.slane %v2489_v5, 2  ;;  %v2498_v62 = vld [vmem:[%s3252_s1 + $0x30] sm:$0xff]   ;;  %v2502_v2 = vld [vmem:[%s3252_s1 + $0x38] sm:$0xff]  }
  0x2e   : > { %2188 = vmatprep.mubr.msk.bf16.mxu0 %vm2516_vm0, %v2515_v1  ;;  %v1114_v61 = vsel %vm945_vm5, %v1111_v54, %v1113_v55  ;;  %v1116_v63 = vsel %vm945_vm5, %v1113_v55, %v1115_v10  ;;  %v1252_v5 = vshll.u32 %v2753_v52, 16 }
  0x2f   : > { %v815_v26 = vrot.slane %v813_v17, 2  ;;  %v956_v50 = vsel %vm945_vm5, %v953_v44, %v955_v47 }
  0x31   : > { %v816_v33 = vor.u32 %v815_v26, %v812_v25  ;;  %v1258_v26 = vshrl.u32 %v2762_v58, 16 }
  0x33   : > { %2081 = vmatmul.mubr.msk.bf16.gmra.mrb[12].mxu1 %vm287_vm3, %v266_v32  ;;  %v2487_v32 = vld [vmem:[%s3252_s1 + $0x20] sm:$0xff]   ;;  %v1260_v31 = vrot.slane %v1258_v26, 2 }
  0x34   : > { %2084 = vmatprep.mubr.msk.bf16.mxu1 %vm2516_vm0, %v2515_v1 }
  0x35   : > { %2189 = vmatmul.mubr.msk.bf16.vlgmr.msra.gmra.mrb[0].mxu0 %vm287_vm3, %v948_v37  ;;  %v2801_v37 = vsel %vm773_vm2, %v2664_v60, %v816_v33  ;;  %v2817_v60 = vsel %vm1411_vm6, %v1417_v18, %v1419_v40  ;;  %v1251_v18 = vrot.slane %v1249_v4, 2 }
  0x36   : > { %2209 = vmatpush3.bf16.msra.mxu0 %v2483_v38  ;;  %2192 = vmatprep.mubr.msk.bf16.mxu0 %vm2516_vm0, %v2515_v1  ;;  %v825_v38 = vor.u32 %v824_v34, %v821_v39  ;;  %v2503_v39 = vld [vmem:[%s3252_s1 + $0x88] sm:$0xff]  }
  0x37   : > { %2210 = vmatprep.subr.bf16.mxu0 %v2515_v1 }
  0x38   : > { %v2814_v42 = vsel %vm773_vm2, %v816_v33, %v825_v38  ;;  %v1270_v33 = vshll.u32 %v2673_v9, 16  ;;  %vm1744_vm2 = vcmask 523264  }
  0x3a   : > { %2211 = vmatpush3.bf16.msra.mxu0 %v2486_v15  ;;  %v954_v15 = vsel %vm945_vm5, %v951_v19, %v953_v44  ;;  %v1254_v19 = vrot.slane %v1252_v5, 3  ;;  %v1272_v38 = vrot.slane %v1270_v33, 3 }
  0x3b   : > { %2085 = vmatmul.mubr.msk.bf16.gmra.mrb[16].mxu1 %vm287_vm3, %v274_v24  ;;  %2232 = vmatprep.subr.bf16.mxu0 %v2515_v1  ;;  %v1970_v24 = vcombine.low %v1067_v49, %v2750_v51  ;;  %v2492_v51 = vld [vmem:[%s3252_s1 + $0x70] sm:$0xff]  }
  0x3c   : > { %2092 = vmatprep.mubr.msk.bf16.mxu1 %vm2516_vm0, %v2515_v1  ;;  %v1255_v52 = vor.u32 %v1254_v19, %v1251_v18 }
  0x3d   : > { %2193 = vmatmul.mubr.msk.bf16.gmra.mrb[4].mxu0 %vm287_vm3, %v950_v57  ;;  %v2497_v57 = vld [vmem:[%s3252_s1 + $0x78] sm:$0xff]   ;;  %v1241_v10 = vshrl.u32 %v1970_v24, 16 }
  0x3e   : > { %2196 = vmatprep.mubr.msk.bf16.mxu0 %vm2516_vm0, %v2515_v1 }
  0x3f   : > { %v1243_v17 = vrot.slane %v1241_v10, 2 }
  0x43   : > { %2093 = vmatmul.mubr.msk.bf16.vlgmr.msra.gmra.mrb[0].mxu1 %vm287_vm3, %v2586_v7  ;;  %v2811_v7 = vld [vmem:[%s2578_s25 + $0x30] ss:$0 sps:$4 sm:$0x77]  }
  0x44   : > { %2096 = vmatprep.mubr.msk.bf16.mxu1 %vm2516_vm0, %v2515_v1  ;;  %2113 = vmatpush3.bf16.msra.mxu1 %v2487_v32  ;;  %v1421_v45 = vrot.slane %v2811_v7, 3  ;;  %v1285_v47 = vshrl.u32 %v2811_v7, 16 }
  0x45   : > { %2114 = vmatprep.subr.bf16.mxu1 %v2515_v1  ;;  %2197 = vmatmul.mubr.msk.bf16.gmra.mrb[8].mxu0 %vm287_vm3, %v952_v36 }
  0x46   : > { %2200 = vmatprep.mubr.msk.bf16.mxu0 %vm2516_vm0, %v2515_v1  ;;  %v2826_v46 = vsel %vm1411_vm6, %v1419_v40, %v1421_v45  ;;  %v1276_v40 = vshrl.u32 %v2687_v6, 16 }
  0x48   : > { %2115 = vmatpush3.bf16.msra.mxu1 %v2493_v41  ;;  %v1279_v41 = vshll.u32 %v2687_v6, 16  ;;  %v1278_v45 = vrot.slane %v1276_v40, 2 }
  0x49   : > { %2136 = vmatprep.subr.bf16.mxu1 %v2515_v1 }
  0x4b   : > { %2097 = vmatmul.mubr.msk.bf16.gmra.mrb[4].mxu1 %vm287_vm3, %v2589_v8  ;;  %v1110_v8 = vrot.slane %v1970_v24, 2 }
  0x4c   : > { %2100 = vmatprep.mubr.msk.bf16.mxu1 %vm2516_vm0, %v2515_v1 }
  0x4d   : > { %2201 = vmatmul.mubr.msk.bf16.gmra.mrb[12].mxu0 %vm287_vm3, %v954_v15  ;;  %v1281_v15 = vrot.slane %v1279_v41, 3 }
  0x4e   : > { %2204 = vmatprep.mubr.msk.bf16.mxu0 %vm2516_vm0, %v2515_v1 }
  0x4f   : > { %v1282_v6 = vor.u32 %v1281_v15, %v1278_v45 }
  0x53   : > { %2101 = vmatmul.mubr.msk.bf16.gmra.mrb[8].mxu1 %vm287_vm3, %v2605_v16  ;;  %v1112_v16 = vsel %vm945_vm5, %v1110_v8, %v1111_v54 }
  0x54   : > { %2104 = vmatprep.mubr.msk.bf16.mxu1 %vm2516_vm0, %v2515_v1 }
  0x55   : > { %2205 = vmatmul.mubr.msk.bf16.gmra.mrb[16].mxu0 %vm287_vm3, %v956_v50 }
  0x56   : > { %2212 = vmatprep.mubr.msk.bf16.mxu0 %vm2516_vm0, %v2515_v1 }
  0x5b   : > { %2105 = vmatmul.mubr.msk.bf16.gmra.mrb[12].mxu1 %vm287_vm3, %v2632_v43 }
  0x5c   : > { %2108 = vmatprep.mubr.msk.bf16.mxu1 %vm2516_vm0, %v2515_v1 }
  0x5d   : > { %2213 = vmatmul.mubr.msk.bf16.vlgmr.msra.gmra.mrb[0].mxu0 %vm287_vm3, %v1112_v16 }
  0x5e   : > { %2233 = vmatpush3.bf16.msra.mxu0 %v2492_v51  ;;  %2216 = vmatprep.mubr.msk.bf16.mxu0 %vm2516_vm0, %v2515_v1 }
  0x5f   : > { %2234 = vmatprep.subr.bf16.mxu0 %v2515_v1 }
  0x62   : > { %2235 = vmatpush3.bf16.msra.mxu0 %v2497_v57 }
  0x63   : > { %2109 = vmatmul.mubr.msk.bf16.gmra.mrb[16].mxu1 %vm287_vm3, %v2655_v56  ;;  %2256 = vmatprep.subr.bf16.mxu0 %v2515_v1 }
  0x64   : > { %2116 = vmatprep.mubr.msk.bf16.mxu1 %vm2516_vm0, %v2515_v1 }
  0x65   : > { %2217 = vmatmul.mubr.msk.bf16.gmra.mrb[4].mxu0 %vm287_vm3, %v1114_v61 }
  0x66   : > { %2220 = vmatprep.mubr.msk.bf16.mxu0 %vm2516_vm0, %v2515_v1 }
  0x6b   : > { %2117 = vmatmul.mubr.msk.bf16.vlgmr.msra.gmra.mrb[0].mxu1 %vm287_vm3, %v2694_v23  ;;  %v1244_v23 = vshll.u32 %v1970_v24, 16 }
  0x6c   : > { %2120 = vmatprep.mubr.msk.bf16.mxu1 %vm2516_vm0, %v2515_v1  ;;  %2137 = vmatpush3.bf16.msra.mxu1 %v2498_v62 }
  0x6d   : > { %2138 = vmatprep.subr.bf16.mxu1 %v2515_v1  ;;  %2221 = vmatmul.mubr.msk.bf16.gmra.mrb[8].mxu0 %vm287_vm3, %v1116_v63 }
  0x6e   : > { %2224 = vmatprep.mubr.msk.bf16.mxu0 %vm2516_vm0, %v2515_v1 }
  0x70   : > { %2139 = vmatpush3.bf16.msra.mxu1 %v2502_v2 }
  0x71   : > { %2280 = vmatprep.subr.bf16.mxu1 %v2515_v1 }
  0x73   : > { %2121 = vmatmul.mubr.msk.bf16.gmra.mrb[4].mxu1 %vm287_vm3, %v2684_v20  ;;  %v1246_v20 = vrot.slane %v1244_v23, 3 }
  0x74   : > { %2124 = vmatprep.mubr.msk.bf16.mxu1 %vm2516_vm0, %v2515_v1 }
  0x75   : > { %2225 = vmatmul.mubr.msk.bf16.gmra.mrb[12].mxu0 %vm287_vm3, %v2710_v30  ;;  %v487_v30 = vrot.slane %v2655_v56, 1  ;;  %v1247_v25 = vor.u32 %v1246_v20, %v1243_v17 }
  0x76   : > { %2228 = vmatprep.mubr.msk.bf16.mxu0 %vm2516_vm0, %v2515_v1 }
  0x77   : > { %v488_v29 = vsel %vm479_vm4, %v485_v22, %v487_v30  ;;  %v1256_v56 = vsel %vm1239_vm7, %v1247_v25, %v1255_v52  ;;  %v1267_v22 = vshrl.u32 %v2673_v9, 16 }
  0x79   : > { %v1269_v36 = vrot.slane %v1267_v22, 2 }
  0x7b   : > { %2125 = vmatmul.mubr.msk.bf16.gmra.mrb[8].mxu1 %vm287_vm3, %v2702_v27  ;;  %v1261_v27 = vshll.u32 %v2762_v58, 16  ;;  %v489_v58 = vrot.slane %v2678_v13, 1  ;;  %v1273_v9 = vor.u32 %v1272_v38, %v1269_v36 }
  0x7c   : > { %2128 = vmatprep.mubr.msk.bf16.mxu1 %vm2516_vm0, %v2515_v1 }
  0x7d   : > { %2229 = vmatmul.mubr.msk.bf16.gmra.mrb[16].mxu0 %vm287_vm3, %v2716_v35  ;;  %v2501_v35 = vld [vmem:[%s3252_s1 + $0x80] sm:$0xff]   ;;  %v1263_v32 = vrot.slane %v1261_v27, 3  ;;  %v490_v34 = vsel %vm479_vm4, %v487_v30, %v489_v58  ;;  %v1283_v49 = vsel %vm1239_vm7, %v1273_v9, %v1282_v6 }
  0x7e   : > { %2236 = vmatprep.mubr.msk.bf16.mxu0 %vm2516_vm0, %v2515_v1 }
  0x7f   : > { %v1264_v43 = vor.u32 %v1263_v32, %v1260_v31 }
  0x81   : > { %v1265_v13 = vsel %vm1239_vm7, %v1255_v52, %v1264_v43  ;;  %v1274_v44 = vsel %vm1239_vm7, %v1264_v43, %v1273_v9 }
  0x83   : > { %2129 = vmatmul.mubr.msk.bf16.gmra.mrb[12].mxu1 %vm287_vm3, %v488_v29 }
  0x84   : > { %2132 = vmatprep.mubr.msk.bf16.mxu1 %vm2516_vm0, %v2515_v1 }
  0x85   : > { %2237 = vmatmul.mubr.msk.bf16.vlgmr.msra.gmra.mrb[0].mxu0 %vm287_vm3, %v1256_v56 }
  0x86   : > { %2257 = vmatpush3.bf16.msra.mxu0 %v2501_v35  ;;  %2240 = vmatprep.mubr.msk.bf16.mxu0 %vm2516_vm0, %v2515_v1 }
  0x87   : > { %2258 = vmatprep.subr.bf16.mxu0 %v2515_v1 }
  0x8a   : > { %2259 = vmatpush3.bf16.msra.mxu0 %v2503_v39 }
  0x8b   : > { %2133 = vmatmul.mubr.msk.bf16.gmra.mrb[16].mxu1 %vm287_vm3, %v490_v34 }
  0x8c   : > { %2140 = vmatprep.mubr.msk.bf16.mxu1 %vm2516_vm0, %v2515_v1 }
  0x8d   : > { %2241 = vmatmul.mubr.msk.bf16.gmra.mrb[4].mxu0 %vm287_vm3, %v1265_v13 }
  0x8e   : > { %2244 = vmatprep.mubr.msk.bf16.mxu0 %vm2516_vm0, %v2515_v1 }
  0x93   : > { %2141 = vmatmul.mubr.msk.bf16.vlgmr.msra.gmra.mrb[0].mxu1 %vm287_vm3, %v2728_v14  ;;  %v1288_v14 = vshll.u32 %v2811_v7, 16 }
  0x94   : > { %2144 = vmatprep.mubr.msk.bf16.mxu1 %vm2516_vm0, %v2515_v1  ;;  %2282 = vmatpush3.bf16.msra.mxu1 %v2548_v0  ;;  %v1287_v0 = vrot.slane %v1285_v47, 2 }
  0x95   : > { %2281 = vmatprep.subr.bf16.mxu1 %v2515_v1  ;;  %2245 = vmatmul.mubr.msk.bf16.gmra.mrb[8].mxu0 %vm287_vm3, %v1274_v44  ;;  %v1290_v50 = vrot.slane %v1288_v14, 3 }
  0x96   : > { %2248 = vmatprep.mubr.msk.bf16.mxu0 %vm2516_vm0, %v2515_v1 }
  0x97   : > { %v1291_v24 = vor.u32 %v1290_v50, %v1287_v0 }
  0x98   : > { %2283 = vmatpush3.bf16.msra.mxu1 %v2559_v3 }
  0x99   : > { %v1292_v3 = vsel %vm1239_vm7, %v1282_v6, %v1291_v24 }
  0x9b   : > { %2145 = vmatmul.mubr.msk.bf16.gmra.mrb[4].mxu1 %vm287_vm3, %v2743_v48  ;;  %v1533_v48 = vlaneseq }
  0x9c   : > { %2148 = vmatprep.mubr.msk.bf16.mxu1 %vm2516_vm0, %v2515_v1 }
  0x9d   : > { %2249 = vmatmul.mubr.msk.bf16.gmra.mrb[12].mxu0 %vm287_vm3, %v1283_v49 }
  0x9e   : > { %2252 = vmatprep.mubr.msk.bf16.mxu0 %vm2516_vm0, %v2515_v1 }
  0xa3   : > { %2149 = vmatmul.mubr.msk.bf16.gmra.mrb[8].mxu1 %vm287_vm3, %v2756_v53  ;;  %v3002_v53 = vshrl.u32 %v1533_v48, 7 }
  0xa4   : > { %2152 = vmatprep.mubr.msk.bf16.mxu1 %vm2516_vm0, %v2515_v1 }
  0xa5   : > { %2253 = vmatmul.mubr.msk.bf16.gmra.mrb[16].mxu0 %vm287_vm3, %v1292_v3  ;;  %v1537_v54 = vadd.s32 24, %v3002_v53  ;;  %v1538_v51 = vadd.s32 32, %v3002_v53  ;;  %v1539_v10 = vadd.s32 40, %v3002_v53  ;;  %v3044_v31 = vadd.s32 48, %v3002_v53 }
  0xa6   : > { %2260 = vmatprep.mubr.msk.bf16.mxu0 %vm2516_vm0, %v2515_v1  ;;  %v3050_v33 = vadd.s32 56, %v3002_v53  ;;  %v3079_v50 = vadd.s32 64, %v3002_v53 }
  0xa7   : > { %v3027_v62 = vmul.u32.u64.low 3435973837, %v1537_v54  ;;  %v3028_v63 = vmul.u32.u64.high 3435973837, %v1537_v54, %v3027_v62  ;;  %v3033_v17 = vmul.u32.u64.low 3435973837, %v1538_v51  ;;  %v3034_v20 = vmul.u32.u64.high 3435973837, %v1538_v51, %v3033_v17 }
  0xa8   : > { %v3036_v30 = vmul.u32.u64.low 3435973837, %v1539_v10  ;;  %v3037_v25 = vmul.u32.u64.high 3435973837, %v1539_v10, %v3036_v30  ;;  %v3058_v36 = vmul.u32.u64.low 3435973837, %v3044_v31  ;;  %v3059_v38 = vmul.u32.u64.high 3435973837, %v3044_v31, %v3058_v36 }
  0xa9   : > { %v1583_v56 = vshrl.u32 %v3028_v63, 3  ;;  %v1594_v22 = vshrl.u32 %v3034_v20, 3  ;;  %v3066_v45 = vmul.u32.u64.low 3435973837, %v3050_v33  ;;  %v3067_v15 = vmul.u32.u64.high 3435973837, %v3050_v33, %v3066_v45 }
  0xaa   : > { %v1605_v13 = vshrl.u32 %v3037_v25, 3 }
  0xab   : > { %2153 = vmatmul.mubr.msk.bf16.gmra.mrb[12].mxu1 %vm287_vm3, %v2766_v59  ;;  %v1535_v59 = vadd.s32 8, %v3002_v53  ;;  %v1584_v39 = vmul.u32 10, %v1583_v56  ;;  %v1595_v44 = vmul.u32 10, %v1594_v22 }
  0xac   : > { %2156 = vmatprep.mubr.msk.bf16.mxu1 %vm2516_vm0, %v2515_v1  ;;  %v1606_v49 = vmul.u32 10, %v1605_v13 }
  0xad   : > { %2261 = vmatmul.mubr.msk.bf16.vlgmr.msra.gmra.mrb[0].mxu0 %vm287_vm3, %v2776_v11  ;;  %v1536_v11 = vadd.s32 16, %v3002_v53  ;;  %v1585_v14 = vsub.s32 %v1537_v54, %v1584_v39 }
  0xae   : > { %2264 = vmatprep.mubr.msk.bf16.mxu0 %vm2516_vm0, %v2515_v1 }
  0xaf   : > { %vm1667_vm4 = vcmp.lt.s32.totalorder %v1585_v14, 0 }
  0xb3   : > { %2157 = vmatmul.mubr.msk.bf16.gmra.mrb[16].mxu1 %vm287_vm3, %v2779_v12 }
  0xb4   : > { %2176 = vmatprep.mubr.msk.bf16.mxu1 %vm2516_vm0, %v2515_v1 }
  0xb5   : > { %2265 = vmatmul.mubr.msk.bf16.gmra.mrb[4].mxu0 %vm287_vm3, %v2786_v21  ;;  %v3007_v12 = vmul.u32.u64.low 3435973837, %v3002_v53  ;;  %v3008_v21 = vmul.u32.u64.high 3435973837, %v3002_v53, %v3007_v12 }
  0xb6   : > { %2268 = vmatprep.mubr.msk.bf16.mxu0 %vm2516_vm0, %v2515_v1 }
  0xb7   : > { %v1550_v16 = vshrl.u32 %v3008_v21, 3  ;;  %v3096_v21 = vadd.s32 72, %v3002_v53 }
  0xb9   : > { %v1551_v4 = vmul.u32 10, %v1550_v16  ;;  %v3105_v54 = vmul.u32.u64.low 3435973837, %v3079_v50  ;;  %v3106_v16 = vmul.u32.u64.high 3435973837, %v3079_v50, %v3105_v54 }
  0xba   : > { %v3123_v62 = vmul.u32.u64.low 3435973837, %v3096_v21  ;;  %v3124_v63 = vmul.u32.u64.high 3435973837, %v3096_v21, %v3123_v62 }
  0xbb   : > { %2177 = vmatmul.mubr.msk.bf16.vlgmr.msra.gmra.mrb[12].mxu1 %vm287_vm3, %v2801_v37  ;;  %v3012_v37 = vmul.u32.u64.low 3435973837, %v1535_v59  ;;  %v3013_v7 = vmul.u32.u64.high 3435973837, %v1535_v59, %v3012_v37  ;;  %v1552_v52 = vsub.s32 %v3002_v53, %v1551_v4  ;;  %v1638_v36 = vshrl.u32 %v3106_v16, 3 }
  0xbc   : > { %2180 = vmatprep.mubr.msk.bf16.mxu1 %vm2516_vm0, %v2515_v1 }
  0xbd   : > { %2269 = vmatmul.mubr.msk.bf16.gmra.mrb[8].mxu0 %vm287_vm3, %v2791_v28  ;;  %v1561_v57 = vshrl.u32 %v3013_v7, 3  ;;  %vm1654_vm8 = vcmp.ne.s32.totalorder %v1552_v52, 0  ;;  %vm1664_vm9 = vcmp.lt.s32.totalorder %v1552_v52, 0  ;;  %v1684_v43 = vadd.s32 10, %v1552_v52 }
  0xbe   : > { %2272 = vmatprep.mubr.msk.bf16.mxu0 %vm2516_vm0, %v2515_v1  ;;  %vm3052_vm13 = vmand %vm1664_vm9, %vm1654_vm8  ;;  %v1687_v7 = vadd.s32 10, %v1585_v14  ;;  %v1639_v3 = vmul.u32 10, %v1638_v36 }
  0xbf   : > { %v1562_v18 = vmul.u32 10, %v1561_v57  ;;  %v1694_v6 = vsel %vm3052_vm13, %v1684_v43, %v1552_v52 }
  0xc0   : > { %vm3081_vm1 = vcmp.lt.s32.totalorder %v1694_v6, 8 }
  0xc1   : > { %v1563_v27 = vsub.s32 %v1535_v59, %v1562_v18  ;;  %v3087_v59 = vsub.s32 %v1538_v51, %v1595_v44  ;;  %v1640_v51 = vsub.s32 %v3079_v50, %v1639_v3 }
  0xc3   : > { %2181 = vmatmul.mubr.msk.bf16.gmra.mrb[16].mxu1 %vm287_vm3, %v2814_v42  ;;  %vm1655_vm10 = vcmp.ne.s32.totalorder %v1563_v27, 0  ;;  %vm1665_vm11 = vcmp.lt.s32.totalorder %v1563_v27, 0  ;;  %v1685_v9 = vadd.s32 10, %v1563_v27  ;;  %vm1658_vm8 = vcmp.ne.s32.totalorder %v3087_v59, 0 }
  0xc4   : > { %vm3061_vm15 = vmand %vm1665_vm11, %vm1655_vm10  ;;  %vm1668_vm9 = vcmp.lt.s32.totalorder %v3087_v59, 0  ;;  %v1688_v25 = vadd.s32 10, %v3087_v59 }
  0xc5   : > { %2273 = vmatmul.mubr.msk.bf16.gmra.mrb[12].mxu0 %vm287_vm3, %v2817_v60  ;;  %v1695_v0 = vsel %vm3061_vm15, %v1685_v9, %v1563_v27 }
  0xc6   : > { %2276 = vmatprep.mubr.msk.bf16.mxu0 %vm2516_vm0, %v2515_v1  ;;  %v3015_v1 = vmul.u32.u64.low 3435973837, %v1536_v11  ;;  %v3016_v42 = vmul.u32.u64.high 3435973837, %v1536_v11, %v3015_v1  ;;  %vm1705_vm5 = vcmp.lt.s32.totalorder %v1695_v0, 8 }
  0xc7   : > { %v3098_v1 = vsub.s32 %v1539_v10, %v1606_v49 }
  0xc8   : > { %v1572_v61 = vshrl.u32 %v3016_v42, 3  ;;  %v1616_v42 = vshrl.u32 %v3059_v38, 3 }
  0xc9   : > { %vm1659_vm10 = vcmp.ne.s32.totalorder %v3098_v1, 0  ;;  %vm1669_vm11 = vcmp.lt.s32.totalorder %v3098_v1, 0 }
  0xca   : > { %v1573_v19 = vmul.u32 10, %v1572_v61 }
  0xcc   : > { %v1574_v29 = vsub.s32 %v1536_v11, %v1573_v19 }
  0xcd   : > { %2277 = vmatmul.mubr.msk.bf16.gmra.mrb[16].mxu0 %vm287_vm3, %v2826_v46  ;;  %vm1657_vm3 = vcmp.ne.s32.totalorder %v1585_v14, 0 }
  0xce   : > { %vm1656_vm12 = vcmp.ne.s32.totalorder %v1574_v29, 0  ;;  %vm1666_vm14 = vcmp.lt.s32.totalorder %v1574_v29, 0  ;;  %v1686_v41 = vadd.s32 10, %v1574_v29  ;;  %vm3115_vm7 = vmand %vm1667_vm4, %vm1657_vm3 }
  0xcf   : > { %vm3072_vm0 = vmand %vm1666_vm14, %vm1656_vm12  ;;  %v1697_v20 = vsel %vm3115_vm7, %v1687_v7, %v1585_v14 }
  0xd0   : > { %v1696_v48 = vsel %vm3072_vm0, %v1686_v41, %v1574_v29  ;;  %vm3142_vm12 = vmand %vm1668_vm9, %vm1658_vm8  ;;  %vm1707_vm13 = vcmp.lt.s32.totalorder %v1697_v20, 8  ;;  %vm1662_vm8 = vcmp.ne.s32.totalorder %v1640_v51, 0  ;;  %vm1672_vm9 = vcmp.lt.s32.totalorder %v1640_v51, 0 }
  0xd1   : > { %vm3110_vm6 = vcmp.lt.s32.totalorder %v1696_v48, 8  ;;  %vm3151_vm14 = vmand %vm1669_vm11, %vm1659_vm10  ;;  %v1698_v40 = vsel %vm3142_vm12, %v1688_v25, %v3087_v59 }
 0x166   : > { %v3010_v28 = vpop.f32.mrb[0].mxu1 }
 0x167   : > { %v2142_v60 = vpop.f32.mrb[1].mxu1 }
 0x168   : > { %v3018_v46 = vpop.f32.mrb[2].mxu1 }
 0x169   : > { %v2143_v8 = vpop.f32.mrb[3].mxu1 }
 0x16e   : > { %v3023_v55 = vpop.f32.mrb[4].mxu1 }
 0x16f   : > { %v2146_v2 = vpop.f32.mrb[5].mxu1 }
 0x170   : > { %v3031_v23 = vpop.f32.mrb[6].mxu1 }
 0x171   : > { %v2147_v5 = vpop.f32.mrb[7].mxu1 }
 0x172   : > { %v1617_v5 = vmul.u32 10, %v1616_v42 }
 0x176   : > { %v3040_v26 = vpop.f32.mrb[8].mxu1 }
 0x177   : > { %v2150_v35 = vpop.f32.mrb[9].mxu1 }
 0x178   : > { %v3046_v32 = vpop.f32.mrb[10].mxu1 }
 0x179   : > { %v2151_v58 = vpop.f32.mrb[11].mxu1 }
 0x17a   : > { %v1689_v58 = vadd.s32 10, %v3098_v1 }
 0x180   : > { %v1484_v24 = vpop.f32.mrb[0].mxu0 }
 0x181   : > { %v2284_v11 = vadd.f32 %v1484_v24, %v3010_v28  ;;  %v2262_v12 = vpop.f32.mrb[1].mxu0 }
 0x182   : > { %v1487_v37 = vpop.f32.mrb[2].mxu0 }
 0x183   : > { %v1734_v60 = vsel %vm3081_vm1, %v2284_v11, 0.0  ;;  %v2285_v8 = vadd.f32 %v1487_v37, %v3018_v46  ;;  %v2263_v28 = vpop.f32.mrb[3].mxu0  ;;  %v1627_v46 = vshrl.u32 %v3067_v15, 3  ;;  %v1649_v15 = vshrl.u32 %v3124_v63, 3 }
 0x184   : > { %1745 = vst.msk [vmem:[%s3092_s5] sm:$0xff] %vm1744_vm2, %v1734_v60  ;;  %v1780_v53 = vmul.f32 %v1734_v60, %v1734_v60  ;;  %v1755_v2 = vsel %vm1744_vm2, %v1734_v60, 0.0  ;;  %vm1708_vm1 = vcmp.lt.s32.totalorder %v1698_v40, 8 }
 0x185   : > { %v1735_v61 = vsel %vm1705_vm5, %v2285_v8, 0.0  ;;  %v1628_v52 = vmul.u32 10, %v1627_v46  ;;  %v1650_v42 = vmul.u32 10, %v1649_v15 }
 0x186   : > { %1746 = vst.msk [vmem:[%s3092_s5 + $0x8] sm:$0xff] %vm1744_vm2, %v1735_v61  ;;  %v1756_v10 = vsel %vm1744_vm2, %v1735_v61, 0.0  ;;  %v1781_v4 = vmul.f32 %v1735_v61, %v1735_v61  ;;  %v1790_v18 = vsel %vm1744_vm2, %v1780_v53, 0.0 }
 0x187   : > { %v1757_v17 = vadd.f32 %v1756_v10, %v1755_v2 }
 0x188   : > { %v1791_v19 = vsel %vm1744_vm2, %v1781_v4, 0.0  ;;  %v1492_v30 = vpop.f32.mrb[4].mxu0 }
 0x189   : > { %v1792_v27 = vadd.f32 %v1791_v19, %v1790_v18  ;;  %v2286_v29 = vadd.f32 %v1492_v30, %v3023_v55  ;;  %v2266_v56 = vpop.f32.mrb[5].mxu0  ;;  %v3156_v55 = vsub.s32 %v3044_v31, %v1617_v5  ;;  %v3169_v31 = vsub.s32 %v3050_v33, %v1628_v52 }
 0x18a   : > { %v1495_v43 = vpop.f32.mrb[6].mxu0  ;;  %v1692_v52 = vadd.s32 10, %v1640_v51 }
 0x18b   : > { %v1736_v39 = vsel %vm3110_vm6, %v2286_v29, 0.0  ;;  %v2287_v34 = vadd.f32 %v1495_v43, %v3031_v23  ;;  %v2267_v13 = vpop.f32.mrb[7].mxu0  ;;  %v1699_v23 = vsel %vm3151_vm14, %v1689_v58, %v3098_v1  ;;  %vm1660_vm15 = vcmp.ne.s32.totalorder %v3156_v55, 0  ;;  %vm3216_vm14 = vmand %vm1672_vm9, %vm1662_vm8 }
 0x18c   : > { %1747 = vst.msk [vmem:[%s3092_s5 + $0x10] sm:$0xff] %vm1744_vm2, %v1736_v39  ;;  %v1758_v38 = vsel %vm1744_vm2, %v1736_v39, 0.0  ;;  %v1782_v9 = vmul.f32 %v1736_v39, %v1736_v39  ;;  %vm1670_vm0 = vcmp.lt.s32.totalorder %v3156_v55, 0  ;;  %vm1661_vm3 = vcmp.ne.s32.totalorder %v3169_v31, 0 }
 0x18d   : > { %v1759_v41 = vadd.f32 %v1758_v38, %v1757_v17  ;;  %v1737_v44 = vsel %vm1707_vm13, %v2287_v34, 0.0  ;;  %vm1671_vm4 = vcmp.lt.s32.totalorder %v3169_v31, 0  ;;  %v1690_v1 = vadd.s32 10, %v3156_v55  ;;  %vm3190_vm6 = vmand %vm1670_vm0, %vm1660_vm15 }
 0x18e   : > { %v912_v45 = vpop.f32.mrb[12].mxu1  ;;  %v1793_v6 = vsel %vm1744_vm2, %v1782_v9, 0.0  ;;  %1748 = vst.msk [vmem:[%s3092_s5 + $0x18] sm:$0xff] %vm1744_vm2, %v1737_v44  ;;  %v1760_v47 = vsel %vm1744_vm2, %v1737_v44, 0.0  ;;  %v1783_v14 = vmul.f32 %v1737_v44, %v1737_v44  ;;  %vm1709_vm5 = vcmp.lt.s32.totalorder %v1699_v23, 8  ;;  %vm3196_vm7 = vmand %vm1671_vm4, %vm1661_vm3 }
 0x18f   : > { %v2178_v49 = vpop.f32.mrb[13].mxu1  ;;  %v1794_v33 = vadd.f32 %v1793_v6, %v1792_v27  ;;  %v1761_v0 = vadd.f32 %v1760_v47, %v1759_v41  ;;  %v1691_v28 = vadd.s32 10, %v3169_v31  ;;  %v1700_v2 = vsel %vm3190_vm6, %v1690_v1, %v3156_v55 }
 0x190   : > { %v915_v24 = vpop.f32.mrb[14].mxu1  ;;  %v1795_v48 = vsel %vm1744_vm2, %v1783_v14, 0.0  ;;  %v1500_v59 = vpop.f32.mrb[8].mxu0  ;;  %vm1710_vm10 = vcmp.lt.s32.totalorder %v1700_v2, 8  ;;  %v1702_v40 = vsel %vm3216_vm14, %v1692_v52, %v1640_v51  ;;  %vm1815_vm3 = vcmask 1040384  }
 0x191   : > { %v2179_v11 = vpop.f32.mrb[15].mxu1  ;;  %v1796_v12 = vadd.f32 %v1795_v48, %v1794_v33  ;;  %v2288_v37 = vadd.f32 %v1500_v59, %v3040_v26  ;;  %v2270_v7 = vpop.f32.mrb[9].mxu0  ;;  %v1701_v17 = vsel %vm3196_vm7, %v1691_v28, %v3169_v31  ;;  %vm1712_vm0 = vcmp.lt.s32.totalorder %v1702_v40, 8 }
 0x192   : > { %v1503_v60 = vpop.f32.mrb[10].mxu0  ;;  %vm1711_vm13 = vcmp.lt.s32.totalorder %v1701_v17, 8 }
 0x193   : > { %v1738_v54 = vsel %vm1708_vm1, %v2288_v37, 0.0  ;;  %v2289_v26 = vadd.f32 %v1503_v60, %v3046_v32  ;;  %v2271_v16 = vpop.f32.mrb[11].mxu0  ;;  %v1651_v32 = vsub.s32 %v3096_v21, %v1650_v42 }
 0x194   : > { %1749 = vst.msk [vmem:[%s3092_s5 + $0x20] sm:$0xff] %vm1744_vm2, %v1738_v54  ;;  %v1762_v57 = vsel %vm1744_vm2, %v1738_v54, 0.0  ;;  %v1784_v46 = vmul.f32 %v1738_v54, %v1738_v54 }
 0x195   : > { %v1763_v61 = vadd.f32 %v1762_v57, %v1761_v0  ;;  %v1739_v62 = vsel %vm1709_vm5, %v2289_v26, 0.0  ;;  %vm1663_vm11 = vcmp.ne.s32.totalorder %v1651_v32, 0  ;;  %vm1673_vm12 = vcmp.lt.s32.totalorder %v1651_v32, 0 }
 0x196   : > { %v920_v63 = vpop.f32.mrb[16].mxu1  ;;  %v1797_v10 = vsel %vm1744_vm2, %v1784_v46, 0.0  ;;  %1750 = vst.msk [vmem:[%s3092_s5 + $0x28] sm:$0xff] %vm1744_vm2, %v1739_v62  ;;  %v1764_v50 = vsel %vm1744_vm2, %v1739_v62, 0.0  ;;  %v1785_v4 = vmul.f32 %v1739_v62, %v1739_v62  ;;  %v1693_v39 = vadd.s32 10, %v1651_v32  ;;  %vm3223_vm15 = vmand %vm1673_vm12, %vm1663_vm11 }
 0x197   : > { %v2182_v5 = vpop.f32.mrb[17].mxu1  ;;  %v1798_v20 = vadd.f32 %v1797_v10, %v1796_v12  ;;  %v1765_v18 = vadd.f32 %v1764_v50, %v1763_v61 }
 0x198   : > { %v923_v19 = vpop.f32.mrb[18].mxu1  ;;  %v1799_v30 = vsel %vm1744_vm2, %v1785_v4, 0.0  ;;  %v1508_v21 = vpop.f32.mrb[12].mxu0  ;;  %v1703_v15 = vsel %vm3223_vm15, %v1693_v39, %v1651_v32 }
 0x199   : > { %v2183_v25 = vpop.f32.mrb[19].mxu1  ;;  %v1800_v27 = vadd.f32 %v1799_v30, %v1798_v20  ;;  %v2290_v29 = vadd.f32 %v1508_v21, %v912_v45  ;;  %v2274_v56 = vpop.f32.mrb[13].mxu0  ;;  %vm1713_vm1 = vcmp.lt.s32.totalorder %v1703_v15, 8 }
 0x19a   : > { %v1511_v35 = vpop.f32.mrb[14].mxu0 }
 0x19b   : > { %v1740_v43 = vsel %vm1710_vm10, %v2290_v29, 0.0  ;;  %v2291_v22 = vadd.f32 %v1511_v35, %v915_v24  ;;  %v2275_v55 = vpop.f32.mrb[15].mxu0 }
 0x19c   : > { %1751 = vst.msk [vmem:[%s3092_s5 + $0x30] sm:$0xff] %vm1744_vm2, %v1740_v43  ;;  %v1766_v34 = vsel %vm1744_vm2, %v1740_v43, 0.0  ;;  %v1786_v13 = vmul.f32 %v1740_v43, %v1740_v43 }
 0x19d   : > { %v1767_v38 = vadd.f32 %v1766_v34, %v1765_v18  ;;  %v1741_v9 = vsel %vm1711_vm13, %v2291_v22, 0.0 }
 0x19e   : > { %v1801_v31 = vsel %vm1744_vm2, %v1786_v13, 0.0  ;;  %1752 = vst.msk [vmem:[%s3092_s5 + $0x38] sm:$0xff] %vm1744_vm2, %v1741_v9  ;;  %v1768_v41 = vsel %vm1744_vm2, %v1741_v9, 0.0  ;;  %v1787_v44 = vmul.f32 %v1741_v9, %v1741_v9 }
 0x19f   : > { %v1802_v45 = vadd.f32 %v1801_v31, %v1800_v27  ;;  %v1769_v23 = vadd.f32 %v1768_v41, %v1767_v38 }
 0x1a0   : > { %v1803_v6 = vsel %vm1744_vm2, %v1787_v44, 0.0  ;;  %v1516_v47 = vpop.f32.mrb[16].mxu0 }
 0x1a1   : > { %v1804_v14 = vadd.f32 %v1803_v6, %v1802_v45  ;;  %v2292_v49 = vadd.f32 %v1516_v47, %v920_v63  ;;  %v2278_v33 = vpop.f32.mrb[17].mxu0 }
 0x1a2   : > { %v1519_v0 = vpop.f32.mrb[18].mxu0 }
 0x1a3   : > { %v1742_v24 = vsel %vm1712_vm0, %v2292_v49, 0.0  ;;  %v2293_v3 = vadd.f32 %v1519_v0, %v923_v19  ;;  %v2279_v48 = vpop.f32.mrb[19].mxu0 }
 0x1a4   : > { %1753 = vst.msk [vmem:[%s3092_s5 + $0x40] sm:$0xff] %vm1744_vm2, %v1742_v24  ;;  %v1770_v59 = vsel %vm1744_vm2, %v1742_v24, 0.0  ;;  %v1788_v11 = vmul.f32 %v1742_v24, %v1742_v24 }
 0x1a5   : > { %v1771_v12 = vadd.f32 %v1770_v59, %v1769_v23  ;;  %v1743_v37 = vsel %vm1713_vm1, %v2293_v3, 0.0 }
 0x1a6   : > { %v1805_v7 = vsel %vm1744_vm2, %v1788_v11, 0.0  ;;  %1754 = vst.msk [vmem:[%s3092_s5 + $0x48] sm:$0xff] %vm1744_vm2, %v1743_v37  ;;  %v1772_v1 = vsel %vm1744_vm2, %v1743_v37, 0.0  ;;  %v1789_v42 = vmul.f32 %v1743_v37, %v1743_v37 }
 0x1a7   : > { %v1806_v60 = vadd.f32 %v1805_v7, %v1804_v14  ;;  %v1773_v8 = vadd.f32 %v1772_v1, %v1771_v12 }
 0x1a8   : > { %v1807_v28 = vsel %vm1744_vm2, %v1789_v42, 0.0  ;;  %vm1817_vm2 = vcmask 517120  }
 0x1a9   : > { %v1774_v54 = vrot.slane %v1773_v8, 4  ;;  %v1808_v26 = vadd.f32 %v1807_v28, %v1806_v60 }
 0x1ab   : > { %v1775_v16 = vadd.f32 %v1774_v54, %v1773_v8  ;;  %v1809_v53 = vrot.slane %v1808_v26, 4 }
 0x1ad   : > { %v1776_v51 = vrot.slane %v1775_v16, 2  ;;  %v1810_v57 = vadd.f32 %v1809_v53, %v1808_v26 }
 0x1af   : > { %v1777_v46 = vadd.f32 %v1776_v51, %v1775_v16  ;;  %v1811_v61 = vrot.slane %v1810_v57, 2 }
 0x1b1   : > { %v1778_v62 = vrot.slane %v1777_v46, 1  ;;  %v1812_v63 = vadd.f32 %v1811_v61, %v1810_v57 }
 0x1b3   : > { %v1813_v2 = vrot.slane %v1812_v63, 1  ;;  %v1779_v32 = vadd.f32 %v1778_v62, %v1777_v46 }
 0x1b5   : > { %v1814_v10 = vadd.f32 %v1813_v2, %v1812_v63 }
 0x1b7   : > { %v1816_v50 = vsel %vm1815_vm3, %v1779_v32, %v1814_v10 }
 0x1b8   : > { %1818 = vst.msk [vmem:[%s181_s9] sm:$0x3] %vm1817_vm2, %v1816_v50 }
 0x1b9 PF: > { %s14_s12 = sadd.s32 1, %s2513_s12  }
 0x1ba   : > { %p11_p4 = scmp.ge.s32.totalorder %s14_s12, 4  }
 0x1bc   :  { %13 = sbr.rel (!%p11_p4) target bundleno = 1 (0x1), region = 70 }

// kernel: generator_forward.13
= control target key start
LH: loop header
LB: loop body
LE: loop exit
PB: predicated region body
PF: predicated region fallthrough
CT: control target
= control target key end

     0   :  { %s5809_s9 = smov 0   ;;  %s8068_s0 = inlined_call_operand.vmem [shape: bf16[2,342,16], index: 0, kind: input, shape index: {}]   ;;  %s8069_s1 = inlined_call_operand.vmem [shape: bf16[144,12], index: 1, kind: input, shape index: {}]   ;;  %s8070_s2 = inlined_call_operand.vmem [shape: f32[2,288,12], index: 2, kind: output, shape index: {}]  }
   0x1 LB: > { %s4505_s10 = sadd.s32 4294967295, %s5792_s9   ;;  %p4509_p0 = scmp.ge.s32.totalorder %s5792_s9, 1  ;;  %s5792_s9 = sphi %s5809_s9, %s12_s9  }
   0x2   : > { %p112_p1 = scmp.lt.s32.totalorder %s5792_s9, 3 }
   0x4   : > { %p113_p2 = pnand %p4509_p0, %p112_p1 }
   0x6   : > { %116 = sbr.rel (%p113_p2) target bundleno = 588 (0x24c), region = 28 }
   0xd   : > { %v5632_v0 = vld [vmem:[%s8069_s1 + $0x20] sm:$0xff]   ;;  %p134_p3 = scmp.lt.s32.totalorder %s4505_s10, 1  ;;  %v5633_v1 = vld [vmem:[%s8069_s1 + $0x8] sm:$0xff]   ;;  %vm279_vm0 = vsmask.f32 7424  ;;  %vm434_vm1 = vcmask 130048  }
   0xe   : > { %5070 = vmatprep.subr.bf16.mxu0 %v5632_v0  ;;  %v5828_v2 = vld [vmem:[%s8069_s1 + $0x28] sm:$0xff]   ;;  %4918 = vmatprep.subr.bf16.mxu1 %v5633_v1  ;;  %v5642_v3 = vld [vmem:[%s8069_s1] sm:$0xff]   ;;  %vm1650_vm2 = vsmask.f32 6400  ;;  %v5884_v31 = vld [vmem:[%s8069_s1 + $0x10] sm:$0xff]   ;;  %vm2100_vm3 = vcmask 1045504  }
   0xf   : > { %s8348_s10 = smov (!%p134_p3, %s4505_s10), 1  ;;  %5071 = vmatpush3.bf16.msra.mxu0 %v5632_v0  ;;  %4919 = vmatpush3.bf16.msra.mxu1 %v5633_v1  ;;  %v5914_v56 = vld [vmem:[%s8069_s1 + $0x30] sm:$0xff]   ;;  %vm891_vm4 = vcmask 1046528   ;;  %vm2859_vm5 = vsmask.f32 5376  ;;  %vm3309_vm6 = vcmask 1044480  }
  0x10   : > { %s5550_s17 = smul.u32 172, %s8348_s10  ;;  %5108 = vmatprep.subr.bf16.mxu0 %v5828_v2  ;;  %4956 = vmatprep.subr.bf16.mxu1 %v5642_v3 }
  0x11   : > { %s5551_s7 = smul.u32 288, %s8348_s10 }
  0x12   : > { %s5838_s22 = scalar_lea.vmem %s8068_s0, %s5550_s17 }
  0x13   : > { %v145_v4 = vld [vmem:[%s5838_s22] sm:$0xf]  ;;  %v5842_v5 = vld [vmem:[%s5838_s22 + $0x4] sm:$0xf]  ;;  %v5848_v7 = vld [vmem:[%s5838_s22 + $0x8] sm:$0xff]   ;;  %s7380_s11 = scalar_lea.vmem %s8070_s2, %s5551_s7 }
  0x14   : > { %v5845_v6 = vcombine.low %v145_v4, %v5842_v5  ;;  %v1202_v8 = vld [vmem:[%s5838_s22 + $0x8] sm:$0xe]  ;;  %v5852_v9 = vld [vmem:[%s5838_s22 + $0xc] sm:$0xf]  ;;  %v288_v12 = vshll.u32 %v5848_v7, 16  ;;  %v292_v13 = vshrl.u32 %v5848_v7, 16 }
  0x15   : > { %v5859_v14 = vld [vmem:[%s5838_s22 + $0x10] sm:$0xff]   ;;  %v5865_v16 = vcombine.low %v1202_v8, %v5852_v9  ;;  %v5873_v24 = vld [vmem:[%s5838_s22 + $0x18] sm:$0xff]   ;;  %v5879_v30 = vld [vmem:[%s5838_s22 + $0x20] sm:$0xff]  }
  0x16   : > { %v281_v10 = vshrl.u32 %v5845_v6, 16  ;;  %v283_v11 = vshll.u32 %v5845_v6, 16  ;;  %v5862_v15 = vld [vmem:[%s5838_s22 + $0x10] sm:$0xff]   ;;  %v290_v18 = vrot.slane %v288_v12, 1  ;;  %v1660_v19 = vshrl.u32 %v5859_v14, 16  ;;  %v5876_v29 = vld [vmem:[%s5838_s22 + $0x18] sm:$0xff]  }
  0x17   : > { %v1663_v20 = vshll.u32 %v5859_v14, 16  ;;  %v1652_v21 = vshrl.u32 %v5865_v16, 16  ;;  %v1655_v22 = vshll.u32 %v5865_v16, 16  ;;  %v296_v23 = vshll.u32 %v5862_v15, 16  ;;  %v5894_v44 = vld [vmem:[%s5838_s22 + $0x20] sm:$0xff]   ;;  %v5897_v45 = vld [vmem:[%s5838_s22 + $0x28] sm:$0xff]  }
  0x18   : > { %v285_v17 = vrot.slane %v283_v11, 1  ;;  %v294_v26 = vor.u32 %v292_v13, %v290_v18  ;;  %v1662_v27 = vrot.slane %v1660_v19, 1  ;;  %v1669_v35 = vshrl.u32 %v5873_v24, 16  ;;  %v5903_v50 = vld [vmem:[%s5838_s22 + $0x28] sm:$0xff]   ;;  %v5909_v55 = vld [vmem:[%s5838_s22 + $0x30] sm:$0xff]  }
  0x19   : > { %v1665_v28 = vrot.slane %v1663_v20, 2  ;;  %v1654_v32 = vrot.slane %v1652_v21, 1  ;;  %v1657_v33 = vrot.slane %v1655_v22, 2  ;;  %v298_v34 = vrot.slane %v296_v23, 1  ;;  %v5919_v61 = vld [vmem:[%s5838_s22 + $0x30] sm:$0xff]  }
  0x1a   : > { %v286_v25 = vor.u32 %v285_v17, %v281_v10  ;;  %v1672_v38 = vshll.u32 %v5873_v24, 16  ;;  %v300_v39 = vshrl.u32 %v5862_v15, 16  ;;  %v1671_v42 = vrot.slane %v1669_v35, 1 }
  0x1b   : > { %v1666_v37 = vor.u32 %v1665_v28, %v1662_v27  ;;  %v1658_v40 = vor.u32 %v1657_v33, %v1654_v32  ;;  %v299_v41 = vsel %vm279_vm0, %v294_v26, %v298_v34  ;;  %v304_v43 = vshll.u32 %v5876_v29, 16  ;;  %v5941_v28 = vld [vmem:[%s5838_s22 + $0x38] sm:$0xff]  }
  0x1c   : > { %v291_v36 = vsel %vm279_vm0, %v286_v25, %v290_v18  ;;  %v1674_v46 = vrot.slane %v1672_v38, 2  ;;  %v302_v47 = vor.u32 %v300_v39, %v298_v34  ;;  %v1678_v48 = vshrl.u32 %v5879_v30, 16  ;;  %v5932_v18 = vld [vmem:[%s5838_s22 + $0x38] sm:$0xff]   ;;  %v5951_v39 = vld [vmem:[%s5838_s22 + $0x40] sm:$0xff]  }
  0x1d   : > { %4920 = vmatprep.mubr.msk.bf16.mxu1 %vm434_vm1, %v291_v36  ;;  %v1681_v49 = vshll.u32 %v5879_v30, 16  ;;  %v1667_v51 = vsel %vm1650_vm2, %v1658_v40, %v1666_v37  ;;  %v306_v52 = vrot.slane %v304_v43, 1  ;;  %v308_v53 = vshrl.u32 %v5876_v29, 16 }
  0x1e   : > { %4921 = vmatmul.mubr.msk.bf16.vlgmr.msra.gmra.mrb[0].mxu1 %vm434_vm1, %v299_v41  ;;  %v312_v54 = vshll.u32 %v5894_v44, 16  ;;  %5072 = vmatprep.mubr.msk.bf16.mxu0 %vm434_vm1, %v1667_v51  ;;  %v1675_v57 = vor.u32 %v1674_v46, %v1671_v42  ;;  %v1680_v58 = vrot.slane %v1678_v48, 1  ;;  %v1687_v60 = vshrl.u32 %v5897_v45, 16  ;;  %v5956_v46 = vld [vmem:[%s5838_s22 + $0x40] sm:$0xff]  }
  0x1f   : > { %4957 = vmatpush3.bf16.msra.mxu1 %v5642_v3  ;;  %v1683_v59 = vrot.slane %v1681_v49, 2  ;;  %v307_v62 = vsel %vm279_vm0, %v302_v47, %v306_v52  ;;  %v310_v63 = vor.u32 %v308_v53, %v306_v52  ;;  %v1690_v1 = vshll.u32 %v5897_v45, 16 }
  0x20   : > { %4994 = vmatprep.subr.bf16.mxu1 %v5884_v31  ;;  %v314_v0 = vrot.slane %v312_v54, 1  ;;  %v1676_v3 = vsel %vm1650_vm2, %v1666_v37, %v1675_v57  ;;  %4924 = vmatprep.mubr.msk.bf16.mxu1 %vm434_vm1, %v307_v62  ;;  %v1689_v8 = vrot.slane %v1687_v60, 1  ;;  %v316_v10 = vshrl.u32 %v5894_v44, 16 }
  0x21   : > { %v1684_v4 = vor.u32 %v1683_v59, %v1680_v58  ;;  %5073 = vmatmul.mubr.msk.bf16.vlgmr.msra.gmra.mrb[0].mxu0 %vm434_vm1, %v1676_v3  ;;  %v1692_v12 = vrot.slane %v1690_v1, 2  ;;  %v320_v13 = vshll.u32 %v5903_v50, 16  ;;  %v1696_v17 = vshrl.u32 %v5909_v55, 16  ;;  %v5964_v58 = vld [vmem:[%s5838_s22 + $0x48] sm:$0xff]  }
  0x22   : > { %v315_v11 = vsel %vm279_vm0, %v310_v63, %v314_v0  ;;  %5109 = vmatpush3.bf16.msra.mxu0 %v5828_v2  ;;  %v318_v20 = vor.u32 %v316_v10, %v314_v0  ;;  %v1699_v21 = vshll.u32 %v5909_v55, 16  ;;  %v324_v22 = vshrl.u32 %v5903_v50, 16  ;;  %v5967_v59 = vld [vmem:[%s5838_s22 + $0x48] sm:$0xff]  }
  0x23   : > { %v1685_v19 = vsel %vm1650_vm2, %v1675_v57, %v1684_v4  ;;  %v1693_v23 = vor.u32 %v1692_v12, %v1689_v8  ;;  %v322_v25 = vrot.slane %v320_v13, 1  ;;  %v1698_v26 = vrot.slane %v1696_v17, 1  ;;  %5146 = vmatprep.subr.bf16.mxu0 %v5914_v56 }
  0x24   : > { %5076 = vmatprep.mubr.msk.bf16.mxu0 %vm434_vm1, %v1685_v19  ;;  %v328_v27 = vshll.u32 %v5919_v61, 16  ;;  %v1701_v2 = vrot.slane %v1699_v21, 2  ;;  %v1705_v32 = vshrl.u32 %v5932_v18, 16  ;;  %v1708_v33 = vshll.u32 %v5932_v18, 16  ;;  %v5984_v19 = vld [vmem:[%s5838_s22 + $0x50] sm:$0xff]  }
  0x25   : > { %v332_v34 = vshrl.u32 %v5919_v61, 16  ;;  %v1694_v35 = vsel %vm1650_vm2, %v1684_v4, %v1693_v23  ;;  %v323_v36 = vsel %vm279_vm0, %v318_v20, %v322_v25  ;;  %v326_v37 = vor.u32 %v324_v22, %v322_v25  ;;  %v5976_v4 = vld [vmem:[%s5838_s22 + $0x50] sm:$0xff]   ;;  %v5989_v22 = vld [vmem:[%s5838_s22 + $0x58] sm:$0xff]  }
  0x26   : > { %4925 = vmatmul.mubr.msk.bf16.gmra.mrb[4].mxu1 %vm434_vm1, %v315_v11  ;;  %v330_v38 = vrot.slane %v328_v27, 1  ;;  %v1702_v40 = vor.u32 %v1701_v2, %v1698_v26  ;;  %v1707_v41 = vrot.slane %v1705_v32, 1  ;;  %v1710_v42 = vrot.slane %v1708_v33, 2 }
  0x27   : > { %4928 = vmatprep.mubr.msk.bf16.mxu1 %vm434_vm1, %v323_v36  ;;  %v336_v43 = vshll.u32 %v5941_v28, 16  ;;  %v1714_v49 = vshrl.u32 %v5951_v39, 16  ;;  %v1717_v51 = vshll.u32 %v5951_v39, 16  ;;  %v340_v57 = vshrl.u32 %v5941_v28, 16 }
  0x28   : > { %v331_v47 = vsel %vm279_vm0, %v326_v37, %v330_v38  ;;  %v334_v48 = vor.u32 %v332_v34, %v330_v38  ;;  %v1703_v52 = vsel %vm1650_vm2, %v1693_v23, %v1702_v40  ;;  %v1711_v53 = vor.u32 %v1710_v42, %v1707_v41 }
  0x29   : > { %v338_v54 = vrot.slane %v336_v43, 1  ;;  %5077 = vmatmul.mubr.msk.bf16.gmra.mrb[4].mxu0 %vm434_vm1, %v1694_v35  ;;  %v1716_v60 = vrot.slane %v1714_v49, 1  ;;  %v1719_v62 = vrot.slane %v1717_v51, 2  ;;  %v344_v63 = vshll.u32 %v5956_v46, 16  ;;  %v5994_v35 = vld [vmem:[%s5838_s22 + $0x58] sm:$0xff]  }
  0x2a   : > { %v348_v0 = vshrl.u32 %v5956_v46, 16  ;;  %5080 = vmatprep.mubr.msk.bf16.mxu0 %vm434_vm1, %v1703_v52  ;;  %v1723_v3 = vshrl.u32 %v5964_v58, 16  ;;  %v1726_v10 = vshll.u32 %v5964_v58, 16  ;;  %v352_v11 = vshll.u32 %v5967_v59, 16  ;;  %v2094_v51 = vld [vmem:[%s5838_s22 + $0x8] sm:$0xc] }
  0x2b   : > { %v339_v1 = vsel %vm279_vm0, %v334_v48, %v338_v54  ;;  %v1720_v8 = vor.u32 %v1719_v62, %v1716_v60  ;;  %v346_v12 = vrot.slane %v344_v63, 1  ;;  %v1732_v13 = vshrl.u32 %v5976_v4, 16  ;;  %v6008_v52 = vld [vmem:[%s5838_s22 + $0x60] sm:$0xff]  }
  0x2c   : > { %v1735_v17 = vshll.u32 %v5976_v4, 16  ;;  %v1712_v20 = vsel %vm1650_vm2, %v1702_v40, %v1711_v53  ;;  %v342_v21 = vor.u32 %v340_v57, %v338_v54  ;;  %v1725_v23 = vrot.slane %v1723_v3, 1 }
  0x2d   : > { %v1728_v25 = vrot.slane %v1726_v10, 2  ;;  %v350_v26 = vor.u32 %v348_v0, %v346_v12  ;;  %v354_v27 = vrot.slane %v352_v11, 1  ;;  %v1721_v2 = vsel %vm1650_vm2, %v1711_v53, %v1720_v8  ;;  %v6013_v0 = vld [vmem:[%s5838_s22 + $0x68] sm:$0xff]  }
  0x2e   : > { %4929 = vmatmul.mubr.msk.bf16.gmra.mrb[8].mxu1 %vm434_vm1, %v331_v47  ;;  %v1734_v32 = vrot.slane %v1732_v13, 1  ;;  %v1737_v33 = vrot.slane %v1735_v17, 2  ;;  %v360_v34 = vshll.u32 %v5984_v19, 16  ;;  %v347_v36 = vsel %vm279_vm0, %v342_v21, %v346_v12 }
  0x2f   : > { %4932 = vmatprep.mubr.msk.bf16.mxu1 %vm434_vm1, %v339_v1  ;;  %v356_v37 = vshrl.u32 %v5967_v59, 16  ;;  %v1741_v38 = vshrl.u32 %v5989_v22, 16  ;;  %v1744_v40 = vshll.u32 %v5989_v22, 16  ;;  %v1729_v41 = vor.u32 %v1728_v25, %v1725_v23  ;;  %v6030_v25 = vld [vmem:[%s5838_s22 + $0x70] sm:$0xff]  }
  0x30   : > { %v355_v42 = vsel %vm279_vm0, %v350_v26, %v354_v27  ;;  %v364_v43 = vshrl.u32 %v5984_v19, 16  ;;  %v368_v47 = vshll.u32 %v5994_v35, 16  ;;  %v1738_v48 = vor.u32 %v1737_v33, %v1734_v32  ;;  %v6036_v33 = vld [vmem:[%s5838_s22 + $0x78] sm:$0xff]  }
  0x31   : > { %5081 = vmatmul.mubr.msk.bf16.gmra.mrb[8].mxu0 %vm434_vm1, %v1712_v20  ;;  %v362_v49 = vrot.slane %v360_v34, 1  ;;  %v358_v53 = vor.u32 %v356_v37, %v354_v27  ;;  %v1743_v54 = vrot.slane %v1741_v38, 1  ;;  %v1746_v57 = vrot.slane %v1744_v40, 2 }
  0x32   : > { %5084 = vmatprep.mubr.msk.bf16.mxu0 %vm434_vm1, %v1721_v2  ;;  %v1730_v60 = vsel %vm1650_vm2, %v1720_v8, %v1729_v41  ;;  %v370_v63 = vrot.slane %v368_v47, 1  ;;  %v1739_v1 = vsel %vm1650_vm2, %v1729_v41, %v1738_v48  ;;  %v4647_v3 = vcombine.low %v2094_v51, %v5852_v9 }
  0x33   : > { %v366_v62 = vor.u32 %v364_v43, %v362_v49  ;;  %v376_v10 = vshll.u32 %v6008_v52, 16  ;;  %v363_v11 = vsel %vm279_vm0, %v358_v53, %v362_v49  ;;  %v372_v12 = vshrl.u32 %v5994_v35, 16 }
  0x34   : > { %v6022_v8 = vor.u32 %v1746_v57, %v1743_v54  ;;  %v380_v17 = vshrl.u32 %v6008_v52, 16  ;;  %v384_v20 = vshll.u32 %v6013_v0, 16  ;;  %v2101_v9 = vrot.slane %v4647_v3, 2  ;;  %v6056_v54 = vld [vmem:[%s5838_s22 + $0x88] sm:$0xff]  }
  0x35   : > { %v371_v13 = vsel %vm279_vm0, %v366_v62, %v370_v63  ;;  %v2102_v21 = vrot.slane %v5859_v14, 2  ;;  %v378_v23 = vrot.slane %v376_v10, 1  ;;  %v374_v26 = vor.u32 %v372_v12, %v370_v63 }
  0x36   : > { %4933 = vmatmul.mubr.msk.bf16.gmra.mrb[12].mxu1 %vm434_vm1, %v347_v36  ;;  %v1748_v27 = vsel %vm1650_vm2, %v1738_v48, %v6022_v8  ;;  %v386_v32 = vrot.slane %v384_v20, 1  ;;  %v392_v14 = vshll.u32 %v6030_v25, 16  ;;  %v2104_v37 = vrot.slane %v5873_v24, 2  ;;  %v6051_v48 = vld [vmem:[%s5838_s22 + $0x80] sm:$0xff]  }
  0x37   : > { %4936 = vmatprep.mubr.msk.bf16.mxu1 %vm434_vm1, %v355_v42  ;;  %v382_v2 = vor.u32 %v380_v17, %v378_v23  ;;  %v2103_v34 = vsel %vm2100_vm3, %v2101_v9, %v2102_v21  ;;  %v379_v36 = vsel %vm279_vm0, %v374_v26, %v378_v23  ;;  %v388_v38 = vshrl.u32 %v6013_v0, 16  ;;  %v6079_v17 = vld [vmem:[%s5838_s22 + $0x90] ss:$0 sps:$4 sm:$0x11]  }
  0x38   : > { %v396_v41 = vshrl.u32 %v6030_v25, 16  ;;  %v400_v42 = vshll.u32 %v6036_v33, 16  ;;  %v2106_v43 = vrot.slane %v5879_v30, 2  ;;  %v394_v47 = vrot.slane %v392_v14, 1  ;;  %v6062_v30 = vld [vmem:[%s8069_s1 + $0x38] sm:$0xff]  }
  0x39   : > { %5085 = vmatmul.mubr.msk.bf16.gmra.mrb[12].mxu0 %vm434_vm1, %v1730_v60  ;;  %v387_v40 = vsel %vm279_vm0, %v382_v2, %v386_v32  ;;  %v390_v24 = vor.u32 %v388_v38, %v386_v32  ;;  %v2105_v49 = vsel %vm2100_vm3, %v2102_v21, %v2104_v37  ;;  %v408_v60 = vshll.u32 %v6051_v48, 16 }
  0x3a   : > { %5088 = vmatprep.mubr.msk.bf16.mxu0 %vm434_vm1, %v1739_v1  ;;  %v398_v51 = vor.u32 %v396_v41, %v394_v47  ;;  %v402_v53 = vrot.slane %v400_v42, 1  ;;  %v2107_v57 = vsel %vm2100_vm3, %v2104_v37, %v2106_v43  ;;  %v2108_v63 = vrot.slane %v5897_v45, 2  ;;  %v6106_v42 = vld [vmem:[%s5838_s22 + $0x60] sm:$0xff]  }
  0x3b   : > { %v395_v62 = vsel %vm279_vm0, %v390_v24, %v394_v47  ;;  %v404_v1 = vshrl.u32 %v6036_v33, 16  ;;  %v412_v10 = vshrl.u32 %v6051_v48, 16  ;;  %v2110_v12 = vrot.slane %v5909_v55, 2  ;;  %v6129_v24 = vld [vmem:[%s5838_s22 + $0x70] sm:$0xff]  }
  0x3c   : > { %v403_v3 = vsel %vm279_vm0, %v398_v51, %v402_v53  ;;  %v420_v23 = vshrl.u32 %v6056_v54, 16  ;;  %v424_v26 = vshll.u32 %v6079_v17, 16  ;;  %v2114_v32 = vrot.slane %v5951_v39, 2 }
  0x3d   : > { %v406_v45 = vor.u32 %v404_v1, %v402_v53  ;;  %v2111_v21 = vsel %vm2100_vm3, %v2108_v63, %v2110_v12  ;;  %v2118_v39 = vrot.slane %v5976_v4, 2  ;;  %v6114_v4 = vld [vmem:[%s8069_s1 + $0x18] sm:$0xff]   ;;  %v2126_v51 = vrot.slane %v6129_v24, 2 }
  0x3e   : > { %4937 = vmatmul.mubr.msk.bf16.gmra.mrb[16].mxu1 %vm434_vm1, %v363_v11  ;;  %v416_v11 = vshll.u32 %v6056_v54, 16  ;;  %v426_v14 = vrot.slane %v424_v26, 1  ;;  %v6141_v53 = vld [vmem:[%s5838_s22 + $0x78] sm:$0xff]  }
  0x3f   : > { %4940 = vmatprep.mubr.msk.bf16.mxu1 %vm434_vm1, %v371_v13  ;;  %v410_v13 = vrot.slane %v408_v60, 1  ;;  %v6145_v60 = vld [vmem:[%s5838_s22 + $0x80] sm:$0xff]  }
  0x40   : > { %v418_v9 = vrot.slane %v416_v11, 1  ;;  %v6161_v11 = vld [vmem:[%s5838_s22 + $0x90] sm:$0xff]  }
  0x41   : > { %5089 = vmatmul.mubr.msk.bf16.gmra.mrb[16].mxu0 %vm434_vm1, %v1748_v27  ;;  %v414_v20 = vor.u32 %v412_v10, %v410_v13  ;;  %v411_v55 = vsel %vm279_vm0, %v406_v45, %v410_v13  ;;  %v2112_v27 = vrot.slane %v5932_v18, 2  ;;  %v2116_v18 = vrot.slane %v5964_v58, 2  ;;  %v2411_v45 = vld [vmem:[%s5838_s22 + $0x10] sm:$0xc] }
  0x42   : > { %5110 = vmatprep.mubr.msk.bf16.mxu0 %vm434_vm1, %v2103_v34  ;;  %v422_v34 = vor.u32 %v420_v23, %v418_v9  ;;  %v2120_v58 = vrot.slane %v5989_v22, 2  ;;  %v6124_v22 = vld [vmem:[%s5838_s22 + $0x68] sm:$0xff]   ;;  %v2134_v13 = vrot.slane %v6161_v11, 2  ;;  %v6184_v23 = vld [vmem:[%s5838_s22 + $0x18] sm:$0xff]  }
  0x43   : > { %v419_v2 = vsel %vm279_vm0, %v414_v20, %v418_v9  ;;  %v2115_v37 = vsel %vm2100_vm3, %v2112_v27, %v2114_v32  ;;  %v2119_v41 = vsel %vm2100_vm3, %v2116_v18, %v2118_v39  ;;  %v6177_v9 = vld [vmem:[%s5838_s22 + $0x98] ss:$0 sps:$4 sm:$0x33]  }
  0x44   : > { %v427_v38 = vsel %vm279_vm0, %v422_v34, %v426_v14  ;;  %v2136_v26 = vrot.slane %v6177_v9, 2  ;;  %v6197_v34 = vld [vmem:[%s5838_s22 + $0x20] sm:$0xff]  }
  0x46   : > { %4941 = vmatmul.mubr.msk.bf16.gmra.mrb[20].mxu1 %vm434_vm1, %v379_v36  ;;  %v2113_v36 = vsel %vm2100_vm3, %v2110_v12, %v2112_v27 }
  0x47   : > { %4944 = vmatprep.mubr.msk.bf16.mxu1 %vm434_vm1, %v387_v40  ;;  %v2117_v40 = vsel %vm2100_vm3, %v2114_v32, %v2116_v18  ;;  %v2137_v32 = vsel %vm2100_vm3, %v2134_v13, %v2136_v26 }
  0x49   : > { %5111 = vmatmul.mubr.msk.bf16.vlgmr.msra.gmra.mrb[0].mxu0 %vm434_vm1, %v2105_v49  ;;  %v2124_v49 = vrot.slane %v6124_v22, 2 }
  0x4a   : > { %5147 = vmatpush3.bf16.msra.mxu0 %v5914_v56  ;;  %5114 = vmatprep.mubr.msk.bf16.mxu0 %vm434_vm1, %v2107_v57  ;;  %v2109_v56 = vsel %vm2100_vm3, %v2106_v43, %v2108_v63  ;;  %v2121_v43 = vsel %vm2100_vm3, %v2118_v39, %v2120_v58  ;;  %v2130_v63 = vrot.slane %v6145_v60, 2  ;;  %v6213_v39 = vld [vmem:[%s5838_s22 + $0x30] sm:$0xff]  }
  0x4b   : > { %5184 = vmatprep.subr.bf16.mxu0 %v6062_v30  ;;  %v2127_v57 = vsel %vm2100_vm3, %v2124_v49, %v2126_v51 }
  0x4e   : > { %4945 = vmatmul.mubr.msk.bf16.gmra.mrb[24].mxu1 %vm434_vm1, %v395_v62  ;;  %v2128_v62 = vrot.slane %v6141_v53, 2 }
  0x4f   : > { %4948 = vmatprep.mubr.msk.bf16.mxu1 %vm434_vm1, %v403_v3  ;;  %v6157_v3 = vld [vmem:[%s5838_s22 + $0x88] sm:$0xff]  }
  0x50   : > { %v2129_v1 = vsel %vm2100_vm3, %v2126_v51, %v2128_v62  ;;  %v2131_v10 = vsel %vm2100_vm3, %v2128_v62, %v2130_v63  ;;  %v2132_v12 = vrot.slane %v6157_v3, 2  ;;  %v6240_v51 = vld [vmem:[%s5838_s22 + $0x48] sm:$0xff]  }
  0x51   : > { %5115 = vmatmul.mubr.msk.bf16.gmra.mrb[4].mxu0 %vm434_vm1, %v2109_v56  ;;  %v6171_v56 = vld [vmem:[%s5838_s22 + $0x14] sm:$0xf] }
  0x52   : > { %5118 = vmatprep.mubr.msk.bf16.mxu0 %vm434_vm1, %v2111_v21  ;;  %v2133_v20 = vsel %vm2100_vm3, %v2130_v63, %v2132_v12  ;;  %v2135_v21 = vsel %vm2100_vm3, %v2132_v12, %v2134_v13  ;;  %v2556_v63 = vrot.slane %v6240_v51, 2  ;;  %v893_v13 = vrot.slane %v5848_v7, 1 }
  0x56   : > { %4949 = vmatmul.mubr.msk.bf16.gmra.mrb[28].mxu1 %vm434_vm1, %v411_v55  ;;  %v6181_v55 = vcombine.low %v2411_v45, %v6171_v56 }
  0x57   : > { %4952 = vmatprep.mubr.msk.bf16.mxu1 %vm434_vm1, %v419_v2  ;;  %v2544_v2 = vrot.slane %v6184_v23, 2 }
  0x58   : > { %v2543_v27 = vrot.slane %v6181_v55, 2 }
  0x59   : > { %5119 = vmatmul.mubr.msk.bf16.gmra.mrb[8].mxu0 %vm434_vm1, %v2113_v36  ;;  %v6201_v36 = vld [vmem:[%s5838_s22 + $0x28] sm:$0xff]  }
  0x5a   : > { %5122 = vmatprep.mubr.msk.bf16.mxu0 %vm434_vm1, %v2115_v37  ;;  %v2545_v14 = vsel %vm2100_vm3, %v2543_v27, %v2544_v2  ;;  %v2546_v37 = vrot.slane %v6197_v34, 2 }
  0x5c   : > { %v2547_v18 = vsel %vm2100_vm3, %v2544_v2, %v2546_v37  ;;  %v6272_v2 = vld [vmem:[%s5838_s22 + $0x60] sm:$0xff]  }
  0x5e   : > { %4953 = vmatmul.mubr.msk.bf16.gmra.mrb[32].mxu1 %vm434_vm1, %v427_v38  ;;  %v2548_v38 = vrot.slane %v6201_v36, 2 }
  0x5f   : > { %4958 = vmatprep.mubr.msk.bf16.mxu1 %vm434_vm1, %v5845_v6  ;;  %v2122_v6 = vrot.slane %v6106_v42, 2 }
  0x61   : > { %5123 = vmatmul.mubr.msk.bf16.gmra.mrb[12].mxu0 %vm434_vm1, %v2117_v40  ;;  %v2123_v47 = vsel %vm2100_vm3, %v2120_v58, %v2122_v6  ;;  %v2549_v40 = vsel %vm2100_vm3, %v2546_v37, %v2548_v38  ;;  %v6222_v58 = vld [vmem:[%s8069_s1 + $0x40] sm:$0xff]   ;;  %v6277_v37 = vld [vmem:[%s5838_s22 + $0x68] sm:$0xff]  }
  0x62   : > { %5126 = vmatprep.mubr.msk.bf16.mxu0 %vm434_vm1, %v2119_v41  ;;  %v6217_v41 = vld [vmem:[%s5838_s22 + $0x38] sm:$0xff]  }
  0x66   : > { %4959 = vmatmul.mubr.msk.bf16.vlgmr.msra.gmra.mrb[0].mxu1 %vm434_vm1, %v5848_v7  ;;  %v895_v7 = vrot.slane %v5862_v15, 1 }
  0x67   : > { %4962 = vmatprep.mubr.msk.bf16.mxu1 %vm434_vm1, %v5862_v15  ;;  %4995 = vmatpush3.bf16.msra.mxu1 %v5884_v31  ;;  %v2125_v31 = vsel %vm2100_vm3, %v2122_v6, %v2124_v49  ;;  %v2550_v6 = vrot.slane %v6213_v39, 2  ;;  %v6236_v49 = vld [vmem:[%s5838_s22 + $0x40] sm:$0xff]   ;;  %v2562_v15 = vrot.slane %v6272_v2, 2 }
  0x68   : > { %5032 = vmatprep.subr.bf16.mxu1 %v6114_v4 }
  0x69   : > { %5127 = vmatmul.mubr.msk.bf16.gmra.mrb[16].mxu0 %vm434_vm1, %v2121_v43  ;;  %v2552_v43 = vrot.slane %v6217_v41, 2 }
  0x6a   : > { %5130 = vmatprep.mubr.msk.bf16.mxu0 %vm434_vm1, %v2123_v47  ;;  %v2551_v47 = vsel %vm2100_vm3, %v2548_v38, %v2550_v6  ;;  %v896_v38 = vsel %vm891_vm4, %v893_v13, %v895_v7 }
  0x6e   : > { %4963 = vmatmul.mubr.msk.bf16.gmra.mrb[4].mxu1 %vm434_vm1, %v5876_v29 }
  0x6f   : > { %4966 = vmatprep.mubr.msk.bf16.mxu1 %vm434_vm1, %v5894_v44 }
  0x71   : > { %5131 = vmatmul.mubr.msk.bf16.gmra.mrb[20].mxu0 %vm434_vm1, %v2125_v31  ;;  %v885_v31 = vld [vmem:[%s5838_s22] sm:$0xe] }
  0x72   : > { %5134 = vmatprep.mubr.msk.bf16.mxu0 %vm434_vm1, %v2127_v57  ;;  %v2554_v57 = vrot.slane %v6236_v49, 2  ;;  %v4569_v62 = vcombine.low %v885_v31, %v5842_v5  ;;  %v6259_v5 = vld [vmem:[%s5838_s22 + $0x58] sm:$0xff]  }
  0x73   : > { %v2560_v26 = vrot.slane %v6259_v5, 2 }
  0x74   : > { %v892_v12 = vrot.slane %v4569_v62, 1  ;;  %v2557_v45 = vsel %vm2100_vm3, %v2554_v57, %v2556_v63 }
  0x76   : > { %4967 = vmatmul.mubr.msk.bf16.gmra.mrb[8].mxu1 %vm434_vm1, %v5903_v50 }
  0x77   : > { %4970 = vmatprep.mubr.msk.bf16.mxu1 %vm434_vm1, %v5919_v61 }
  0x79   : > { %5135 = vmatmul.mubr.msk.bf16.gmra.mrb[24].mxu0 %vm434_vm1, %v2129_v1  ;;  %v2555_v1 = vsel %vm2100_vm3, %v2552_v43, %v2554_v57 }
  0x7a   : > { %5138 = vmatprep.mubr.msk.bf16.mxu0 %vm434_vm1, %v2131_v10  ;;  %v6254_v10 = vld [vmem:[%s5838_s22 + $0x50] sm:$0xff]  }
  0x7e   : > { %4971 = vmatmul.mubr.msk.bf16.gmra.mrb[12].mxu1 %vm434_vm1, %v5941_v28 }
  0x7f   : > { %4974 = vmatprep.mubr.msk.bf16.mxu1 %vm434_vm1, %v5956_v46 }
  0x81   : > { %5139 = vmatmul.mubr.msk.bf16.gmra.mrb[28].mxu0 %vm434_vm1, %v2133_v20  ;;  %v2558_v20 = vrot.slane %v6254_v10, 2 }
  0x82   : > { %5142 = vmatprep.mubr.msk.bf16.mxu0 %vm434_vm1, %v2135_v21  ;;  %v894_v21 = vsel %vm891_vm4, %v892_v12, %v893_v13  ;;  %v6315_v12 = vld [vmem:[%s5838_s22 + $0x80] sm:$0xff]   ;;  %v905_v13 = vrot.slane %v5941_v28, 1  ;;  %v907_v28 = vrot.slane %v5956_v46, 1 }
  0x83   : > { %v2559_v27 = vsel %vm2100_vm3, %v2556_v63, %v2558_v20  ;;  %v903_v63 = vrot.slane %v5919_v61, 1  ;;  %v2570_v61 = vrot.slane %v6315_v12, 2 }
  0x86   : > { %4975 = vmatmul.mubr.msk.bf16.gmra.mrb[16].mxu1 %vm434_vm1, %v5967_v59 }
  0x87   : > { %4978 = vmatprep.mubr.msk.bf16.mxu1 %vm434_vm1, %v5984_v19 }
  0x89   : > { %5143 = vmatmul.mubr.msk.bf16.gmra.mrb[32].mxu0 %vm434_vm1, %v2137_v32  ;;  %v897_v32 = vrot.slane %v5876_v29, 1  ;;  %v899_v29 = vrot.slane %v5894_v44, 1  ;;  %v6302_v44 = vld [vmem:[%s5838_s22 + $0x78] sm:$0xff]  }
  0x8a   : > { %5148 = vmatprep.mubr.msk.bf16.mxu0 %vm434_vm1, %v2545_v14  ;;  %v2561_v14 = vsel %vm2100_vm3, %v2558_v20, %v2560_v26  ;;  %v2568_v62 = vrot.slane %v6302_v44, 2  ;;  %v6320_v20 = vld [vmem:[%s5838_s22 + $0x88] sm:$0xff]  }
  0x8e   : > { %4979 = vmatmul.mubr.msk.bf16.gmra.mrb[20].mxu1 %vm434_vm1, %v5994_v35 }
  0x8f   : > { %4982 = vmatprep.mubr.msk.bf16.mxu1 %vm434_vm1, %v6008_v52 }
  0x91   : > { %5149 = vmatmul.mubr.msk.bf16.vlgmr.msra.gmra.mrb[0].mxu0 %vm434_vm1, %v2547_v18  ;;  %v898_v18 = vsel %vm891_vm4, %v895_v7, %v897_v32  ;;  %v2572_v7 = vrot.slane %v6320_v20, 2 }
  0x92   : > { %5185 = vmatpush3.bf16.msra.mxu0 %v6062_v30  ;;  %5152 = vmatprep.mubr.msk.bf16.mxu0 %vm434_vm1, %v2549_v40  ;;  %v2553_v30 = vsel %vm2100_vm3, %v2550_v6, %v2552_v43  ;;  %v2564_v40 = vrot.slane %v6277_v37, 2  ;;  %v2563_v6 = vsel %vm2100_vm3, %v2560_v26, %v2562_v15  ;;  %v6291_v43 = vld [vmem:[%s5838_s22 + $0x70] sm:$0xff]   ;;  %v906_v26 = vsel %vm891_vm4, %v903_v63, %v905_v13 }
  0x93   : > { %5222 = vmatprep.subr.bf16.mxu0 %v6222_v58 }
  0x94   : > { %v2565_v31 = vsel %vm2100_vm3, %v2562_v15, %v2564_v40  ;;  %v2573_v15 = vsel %vm2100_vm3, %v2570_v61, %v2572_v7 }
  0x96   : > { %4983 = vmatmul.mubr.msk.bf16.gmra.mrb[24].mxu1 %vm434_vm1, %v6013_v0 }
  0x97   : > { %4986 = vmatprep.mubr.msk.bf16.mxu1 %vm434_vm1, %v6030_v25 }
  0x99   : > { %5153 = vmatmul.mubr.msk.bf16.gmra.mrb[4].mxu0 %vm434_vm1, %v2551_v47  ;;  %v901_v47 = vrot.slane %v5903_v50, 1  ;;  %v2566_v50 = vrot.slane %v6291_v43, 2 }
  0x9a   : > { %5156 = vmatprep.mubr.msk.bf16.mxu0 %vm434_vm1, %v2553_v30  ;;  %v6297_v30 = vld [vmem:[%s8069_s1 + $0x20] sm:$0xff]  }
  0x9b   : > { %v902_v57 = vsel %vm891_vm4, %v899_v29, %v901_v47 }
  0x9e   : > { %4987 = vmatmul.mubr.msk.bf16.gmra.mrb[28].mxu1 %vm434_vm1, %v6036_v33 }
  0x9f   : > { %4990 = vmatprep.mubr.msk.bf16.mxu1 %vm434_vm1, %v6051_v48 }
  0xa1   : > { %5157 = vmatmul.mubr.msk.bf16.gmra.mrb[8].mxu0 %vm434_vm1, %v2555_v1  ;;  %v2567_v1 = vsel %vm2100_vm3, %v2564_v40, %v2566_v50 }
  0xa2   : > { %5160 = vmatprep.mubr.msk.bf16.mxu0 %vm434_vm1, %v2557_v45  ;;  %v2569_v45 = vsel %vm2100_vm3, %v2566_v50, %v2568_v62 }
  0xa6   : > { %4991 = vmatmul.mubr.msk.bf16.gmra.mrb[32].mxu1 %vm434_vm1, %v6056_v54 }
  0xa7   : > { %4996 = vmatprep.mubr.msk.bf16.mxu1 %vm434_vm1, %v894_v21  ;;  %v904_v21 = vsel %vm891_vm4, %v901_v47, %v903_v63  ;;  %v2869_v47 = vshrl.u32 %v6184_v23, 16  ;;  %v913_v63 = vrot.slane %v5994_v35, 1  ;;  %v2887_v35 = vshrl.u32 %v6201_v36, 16 }
  0xa9   : > { %5161 = vmatmul.mubr.msk.bf16.gmra.mrb[12].mxu0 %vm434_vm1, %v2559_v27  ;;  %v2571_v27 = vsel %vm2100_vm3, %v2568_v62, %v2570_v61  ;;  %v5698_v62 = vld [vmem:[%s5838_s22 + $0xa0] ss:$0 sps:$4 sm:$0x33]  }
  0xaa   : > { %5164 = vmatprep.mubr.msk.bf16.mxu0 %vm434_vm1, %v2561_v14  ;;  %v909_v14 = vrot.slane %v5967_v59, 1  ;;  %v2864_v59 = vshll.u32 %v6181_v55, 16  ;;  %v2578_v61 = vrot.slane %v5698_v62, 2 }
  0xac   : > { %v910_v46 = vsel %vm891_vm4, %v907_v28, %v909_v14 }
  0xae   : > { %4997 = vmatmul.mubr.msk.bf16.vlgmr.msra.gmra.mrb[0].mxu1 %vm434_vm1, %v896_v38  ;;  %v6337_v38 = vld [vmem:[%s5838_s22 + $0x98] sm:$0xff]  }
  0xaf   : > { %5000 = vmatprep.mubr.msk.bf16.mxu1 %vm434_vm1, %v898_v18  ;;  %5033 = vmatpush3.bf16.msra.mxu1 %v6114_v4  ;;  %v900_v4 = vsel %vm891_vm4, %v897_v32, %v899_v29  ;;  %v6333_v32 = vld [vmem:[%s5838_s22 + $0x90] sm:$0xff]   ;;  %v908_v18 = vsel %vm891_vm4, %v905_v13, %v907_v28  ;;  %v2576_v29 = vrot.slane %v6337_v38, 2  ;;  %v2866_v13 = vrot.slane %v2864_v59, 3 }
  0xb0   : > { %5260 = vmatprep.subr.bf16.mxu1 %v6297_v30  ;;  %v2574_v40 = vrot.slane %v6333_v32, 2 }
  0xb1   : > { %5165 = vmatmul.mubr.msk.bf16.gmra.mrb[16].mxu0 %vm434_vm1, %v2563_v6  ;;  %v2861_v6 = vshrl.u32 %v6181_v55, 16  ;;  %v2871_v55 = vrot.slane %v2869_v47, 2  ;;  %v2889_v47 = vrot.slane %v2887_v35, 2  ;;  %v2917_v35 = vshll.u32 %v6236_v49, 16 }
  0xb2   : > { %5168 = vmatprep.mubr.msk.bf16.mxu0 %vm434_vm1, %v2565_v31  ;;  %v2872_v31 = vshll.u32 %v6184_v23, 16  ;;  %v2575_v50 = vsel %vm2100_vm3, %v2572_v7, %v2574_v40  ;;  %v2881_v7 = vshll.u32 %v6197_v34, 16 }
  0xb6   : > { %5001 = vmatmul.mubr.msk.bf16.gmra.mrb[4].mxu1 %vm434_vm1, %v900_v4  ;;  %v911_v4 = vrot.slane %v5984_v19, 1 }
  0xb7   : > { %5004 = vmatprep.mubr.msk.bf16.mxu1 %vm434_vm1, %v902_v57  ;;  %v2577_v57 = vsel %vm2100_vm3, %v2574_v40, %v2576_v29 }
  0xb8   : > { %v914_v19 = vsel %vm891_vm4, %v911_v4, %v913_v63 }
  0xb9   : > { %5169 = vmatmul.mubr.msk.bf16.gmra.mrb[20].mxu0 %vm434_vm1, %v2567_v1  ;;  %v2863_v1 = vrot.slane %v2861_v6, 2  ;;  %v917_v6 = vrot.slane %v6013_v0, 1  ;;  %v2905_v0 = vshrl.u32 %v6217_v41, 16 }
  0xba   : > { %5172 = vmatprep.mubr.msk.bf16.mxu0 %vm434_vm1, %v2569_v45  ;;  %v2874_v45 = vrot.slane %v2872_v31, 3 }
  0xbb   : > { %v2867_v28 = vor.u32 %v2866_v13, %v2863_v1  ;;  %v2908_v1 = vshll.u32 %v6217_v41, 16 }
  0xbe   : > { %5005 = vmatmul.mubr.msk.bf16.gmra.mrb[8].mxu1 %vm434_vm1, %v904_v21  ;;  %v912_v21 = vsel %vm891_vm4, %v909_v14, %v911_v4  ;;  %v915_v14 = vrot.slane %v6008_v52, 1  ;;  %v2896_v52 = vshrl.u32 %v6213_v39, 16 }
  0xbf   : > { %5008 = vmatprep.mubr.msk.bf16.mxu1 %vm434_vm1, %v906_v26  ;;  %v2878_v26 = vshrl.u32 %v6197_v34, 16 }
  0xc0   : > { %v916_v4 = vsel %vm891_vm4, %v913_v63, %v915_v14  ;;  %v919_v63 = vrot.slane %v6030_v25, 1 }
  0xc1   : > { %5173 = vmatmul.mubr.msk.bf16.gmra.mrb[24].mxu0 %vm434_vm1, %v2571_v27  ;;  %v2875_v27 = vor.u32 %v2874_v45, %v2871_v55  ;;  %v2880_v40 = vrot.slane %v2878_v26, 2  ;;  %v2898_v55 = vrot.slane %v2896_v52, 2  ;;  %v2910_v26 = vrot.slane %v2908_v1, 3 }
  0xc2   : > { %5176 = vmatprep.mubr.msk.bf16.mxu0 %vm434_vm1, %v2573_v15  ;;  %v2890_v15 = vshll.u32 %v6201_v36, 16  ;;  %v2935_v52 = vshll.u32 %v6254_v10, 16 }
  0xc3   : > { %v2876_v59 = vsel %vm2859_vm5, %v2867_v28, %v2875_v27 }
  0xc4   : > { %v2892_v31 = vrot.slane %v2890_v15, 3  ;;  %v2923_v15 = vshrl.u32 %v6240_v51, 16 }
  0xc6   : > { %5009 = vmatmul.mubr.msk.bf16.gmra.mrb[12].mxu1 %vm434_vm1, %v908_v18  ;;  %v2579_v18 = vsel %vm2100_vm3, %v2576_v29, %v2578_v61  ;;  %v2899_v29 = vshll.u32 %v6213_v39, 16  ;;  %v2893_v62 = vor.u32 %v2892_v31, %v2889_v47  ;;  %v2925_v47 = vrot.slane %v2923_v15, 2  ;;  %v5777_v15 = vld [vmem:[%s5838_s22 + $0x18] sm:$0xff]  }
  0xc7   : > { %5012 = vmatprep.mubr.msk.bf16.mxu1 %vm434_vm1, %v910_v46  ;;  %v2883_v46 = vrot.slane %v2881_v7, 3  ;;  %v920_v7 = vsel %vm891_vm4, %v917_v6, %v919_v63 }
  0xc8   : > { %v2901_v45 = vrot.slane %v2899_v29, 3 }
  0xc9   : > { %5177 = vmatmul.mubr.msk.bf16.gmra.mrb[28].mxu0 %vm434_vm1, %v2575_v50  ;;  %v2884_v50 = vor.u32 %v2883_v46, %v2880_v40  ;;  %v2919_v46 = vrot.slane %v2917_v35, 3  ;;  %v2959_v35 = vshrl.u32 %v6277_v37, 16 }
  0xca   : > { %5180 = vmatprep.mubr.msk.bf16.mxu0 %vm434_vm1, %v2577_v57  ;;  %v918_v57 = vsel %vm891_vm4, %v915_v14, %v917_v6  ;;  %v2902_v28 = vor.u32 %v2901_v45, %v2898_v55  ;;  %v2926_v14 = vshll.u32 %v6240_v51, 16  ;;  %v925_v6 = vrot.slane %v6056_v54, 1  ;;  %v5776_v45 = vld [vmem:[%s5838_s22 + $0x10] sm:$0xff]  }
  0xcb   : > { %v2885_v13 = vsel %vm2859_vm5, %v2875_v27, %v2884_v50  ;;  %v2894_v61 = vsel %vm2859_vm5, %v2884_v50, %v2893_v62  ;;  %v2914_v27 = vshrl.u32 %v6236_v49, 16  ;;  %v2932_v50 = vshrl.u32 %v6254_v10, 16 }
  0xcc   : > { %v2928_v31 = vrot.slane %v2926_v14, 3  ;;  %v2941_v54 = vshrl.u32 %v6259_v5, 16  ;;  %v1334_v55 = vrot.slane %v5865_v16, 1  ;;  %v2953_v16 = vshll.u32 %v6272_v2, 16 }
  0xcd   : > { %v2916_v40 = vrot.slane %v2914_v27, 2  ;;  %v2934_v1 = vrot.slane %v2932_v50, 2  ;;  %v1337_v14 = vrot.slane %v5777_v15, 1 }
  0xce   : > { %5013 = vmatmul.mubr.msk.bf16.gmra.mrb[16].mxu1 %vm434_vm1, %v912_v21  ;;  %v921_v21 = vrot.slane %v6036_v33, 1  ;;  %v2929_v29 = vor.u32 %v2928_v31, %v2925_v47  ;;  %v2961_v47 = vrot.slane %v2959_v35, 2  ;;  %v2998_v35 = vshll.u32 %v6320_v20, 16 }
  0xcf   : > { %5016 = vmatprep.mubr.msk.bf16.mxu1 %vm434_vm1, %v914_v19  ;;  %v2907_v19 = vrot.slane %v2905_v0, 2  ;;  %v927_v0 = vrot.slane %v6079_v17, 1 }
  0xd0   : > { %v922_v25 = vsel %vm891_vm4, %v919_v63, %v921_v21 }
  0xd1   : > { %5181 = vmatmul.mubr.msk.bf16.gmra.mrb[32].mxu0 %vm434_vm1, %v2579_v18  ;;  %v2911_v33 = vor.u32 %v2910_v26, %v2907_v19  ;;  %v2903_v18 = vsel %vm2859_vm5, %v2893_v62, %v2902_v28  ;;  %v2944_v62 = vshll.u32 %v6259_v5, 16  ;;  %v2943_v19 = vrot.slane %v2941_v54, 2 }
  0xd2   : > { %5186 = vmatprep.mubr.msk.bf16.mxu0 %vm434_vm1, %v2876_v59  ;;  %v2977_v54 = vshrl.u32 %v6302_v44, 16 }
  0xd3   : > { %v2912_v59 = vsel %vm2859_vm5, %v2902_v28, %v2911_v33  ;;  %v2946_v26 = vrot.slane %v2944_v62, 3  ;;  %v2980_v62 = vshll.u32 %v6302_v44, 16 }
  0xd5   : > { %v2947_v27 = vor.u32 %v2946_v26, %v2943_v19  ;;  %v2979_v19 = vrot.slane %v2977_v54, 2  ;;  %v2982_v26 = vrot.slane %v2980_v62, 3  ;;  %v3016_v54 = vshll.u32 %v6337_v38, 16  ;;  %v5783_v62 = vld [vmem:[%s5838_s22 + $0x48] sm:$0xff]  }
  0xd6   : > { %5017 = vmatmul.mubr.msk.bf16.gmra.mrb[20].mxu1 %vm434_vm1, %v916_v4 }
  0xd7   : > { %5020 = vmatprep.mubr.msk.bf16.mxu1 %vm434_vm1, %v918_v57 }
  0xd9   : > { %5187 = vmatmul.mubr.msk.bf16.vlgmr.msra.gmra.mrb[0].mxu0 %vm434_vm1, %v2885_v13  ;;  %v2937_v13 = vrot.slane %v2935_v52, 3  ;;  %v2971_v52 = vshll.u32 %v6291_v43, 16 }
  0xda   : > { %5223 = vmatpush3.bf16.msra.mxu0 %v6222_v58  ;;  %5190 = vmatprep.mubr.msk.bf16.mxu0 %vm434_vm1, %v2894_v61  ;;  %v923_v58 = vrot.slane %v6051_v48, 1  ;;  %v2920_v48 = vor.u32 %v2919_v46, %v2916_v40  ;;  %v2955_v40 = vrot.slane %v2953_v16, 3  ;;  %v5778_v46 = vld [vmem:[%s5838_s22 + $0x20] sm:$0xff]   ;;  %v2983_v16 = vor.u32 %v2982_v26, %v2979_v19 }
  0xdb   : > { %v2938_v17 = vor.u32 %v2937_v13, %v2934_v1  ;;  %v3018_v26 = vrot.slane %v3016_v54, 3  ;;  %v3315_v54 = vrot.slane %v6201_v36, 3  ;;  %v3317_v36 = vrot.slane %v6213_v39, 3 }
  0xdc   : > { %v924_v4 = vsel %vm891_vm4, %v921_v21, %v923_v58  ;;  %v926_v57 = vsel %vm891_vm4, %v923_v58, %v925_v6  ;;  %v2921_v63 = vsel %vm2859_vm5, %v2911_v33, %v2920_v48  ;;  %v1335_v21 = vrot.slane %v5776_v45, 1  ;;  %v5780_v45 = vld [vmem:[%s5838_s22 + $0x30] sm:$0xff]  }
  0xdd   : > { %v2930_v61 = vsel %vm2859_vm5, %v2920_v48, %v2929_v29  ;;  %v2962_v33 = vshll.u32 %v6277_v37, 16  ;;  %v2939_v58 = vsel %vm2859_vm5, %v2929_v29, %v2938_v17 }
  0xde   : > { %5021 = vmatmul.mubr.msk.bf16.gmra.mrb[24].mxu1 %vm434_vm1, %v920_v7  ;;  %v928_v7 = vsel %vm891_vm4, %v925_v6, %v927_v0  ;;  %v1336_v28 = vsel %vm891_vm4, %v1334_v55, %v1335_v21  ;;  %v1339_v6 = vrot.slane %v5778_v46, 1  ;;  %v5779_v0 = vld [vmem:[%s5838_s22 + $0x28] sm:$0xff]   ;;  %v2973_v55 = vrot.slane %v2971_v52, 3 }
  0xdf   : > { %5024 = vmatprep.mubr.msk.bf16.mxu1 %vm434_vm1, %v922_v25  ;;  %v2950_v25 = vshrl.u32 %v6272_v2, 16  ;;  %v2964_v31 = vrot.slane %v2962_v33, 3  ;;  %v1341_v1 = vrot.slane %v5779_v0, 1  ;;  %v5781_v33 = vld [vmem:[%s5838_s22 + $0x38] sm:$0xff]   ;;  %v1349_v0 = vrot.slane %v5783_v62, 1 }
  0xe0   : > { %v1340_v48 = vsel %vm891_vm4, %v1337_v14, %v1339_v6  ;;  %v1345_v15 = vrot.slane %v5781_v33, 1  ;;  %v1361_v62 = vrot.slane %v6141_v53, 1 }
  0xe1   : > { %5191 = vmatmul.mubr.msk.bf16.gmra.mrb[4].mxu0 %vm434_vm1, %v2903_v18  ;;  %v2952_v18 = vrot.slane %v2950_v25, 2  ;;  %v2965_v29 = vor.u32 %v2964_v31, %v2961_v47  ;;  %v2989_v25 = vshll.u32 %v6315_v12, 16  ;;  %v3000_v47 = vrot.slane %v2998_v35, 3  ;;  %v5785_v35 = vld [vmem:[%s5838_s22 + $0x58] sm:$0xff]  }
  0xe2   : > { %5194 = vmatprep.mubr.msk.bf16.mxu0 %vm434_vm1, %v2912_v59  ;;  %v2948_v59 = vsel %vm2859_vm5, %v2938_v17, %v2947_v27  ;;  %v1353_v33 = vrot.slane %v5785_v35, 1  ;;  %v1759_v35 = vshrl.u32 %v6124_v22, 16 }
  0xe3   : > { %v2956_v50 = vor.u32 %v2955_v40, %v2952_v18  ;;  %v2991_v18 = vrot.slane %v2989_v25, 3  ;;  %v5782_v40 = vld [vmem:[%s5838_s22 + $0x40] sm:$0xff]  }
  0xe4   : > { %v1347_v46 = vrot.slane %v5782_v40, 1 }
  0xe6   : > { %5025 = vmatmul.mubr.msk.bf16.gmra.mrb[28].mxu1 %vm434_vm1, %v924_v4  ;;  %v1338_v4 = vsel %vm891_vm4, %v1335_v21, %v1337_v14  ;;  %v1343_v21 = vrot.slane %v5780_v45, 1 }
  0xe7   : > { %5028 = vmatprep.mubr.msk.bf16.mxu1 %vm434_vm1, %v926_v57  ;;  %v2968_v57 = vshrl.u32 %v6291_v43, 16 }
  0xe8   : > { %v1346_v31 = vsel %vm891_vm4, %v1343_v21, %v1345_v15 }
  0xe9   : > { %5195 = vmatmul.mubr.msk.bf16.gmra.mrb[8].mxu0 %vm434_vm1, %v2921_v63  ;;  %v2957_v63 = vsel %vm2859_vm5, %v2947_v27, %v2956_v50  ;;  %v2970_v13 = vrot.slane %v2968_v57, 2  ;;  %v2995_v27 = vshrl.u32 %v6320_v20, 16  ;;  %v3007_v57 = vshll.u32 %v6333_v32, 16 }
  0xea   : > { %5198 = vmatprep.mubr.msk.bf16.mxu0 %vm434_vm1, %v2930_v61  ;;  %v2966_v61 = vsel %vm2859_vm5, %v2956_v50, %v2965_v29  ;;  %v1348_v50 = vsel %vm891_vm4, %v1345_v15, %v1347_v46 }
  0xeb   : > { %v2974_v17 = vor.u32 %v2973_v55, %v2970_v13  ;;  %v3009_v13 = vrot.slane %v3007_v57, 3  ;;  %v5784_v55 = vld [vmem:[%s5838_s22 + $0x50] sm:$0xff]  }
  0xec   : > { %v1351_v45 = vrot.slane %v5784_v55, 1  ;;  %v3319_v55 = vrot.slane %v6217_v41, 3 }
  0xed   : > { %v2975_v14 = vsel %vm2859_vm5, %v2965_v29, %v2974_v17  ;;  %v3013_v29 = vshrl.u32 %v6337_v38, 16 }
  0xee   : > { %5029 = vmatmul.mubr.msk.bf16.gmra.mrb[32].mxu1 %vm434_vm1, %v928_v7  ;;  %v1342_v7 = vsel %vm891_vm4, %v1339_v6, %v1341_v1  ;;  %v2984_v6 = vsel %vm2859_vm5, %v2974_v17, %v2983_v16  ;;  %v3320_v39 = vsel %vm3309_vm6, %v3317_v36, %v3319_v55 }
  0xef   : > { %5034 = vmatprep.mubr.msk.bf16.mxu1 %vm434_vm1, %v1336_v28  ;;  %v2986_v28 = vshrl.u32 %v6315_v12, 16  ;;  %v3015_v19 = vrot.slane %v3013_v29, 2 }
  0xf1   : > { %5199 = vmatmul.mubr.msk.bf16.gmra.mrb[12].mxu0 %vm434_vm1, %v2939_v58  ;;  %v2988_v58 = vrot.slane %v2986_v28, 2 }
  0xf2   : > { %5202 = vmatprep.mubr.msk.bf16.mxu0 %vm434_vm1, %v2948_v59  ;;  %v2997_v59 = vrot.slane %v2995_v27, 2  ;;  %v3303_v27 = vld [vmem:[%s5838_s22 + $0x10] sm:$0x8] }
  0xf4   : > { %v3001_v52 = vor.u32 %v3000_v47, %v2997_v59 }
  0xf6   : > { %5035 = vmatmul.mubr.msk.bf16.vlgmr.msra.gmra.mrb[0].mxu1 %vm434_vm1, %v1338_v4  ;;  %v2992_v4 = vor.u32 %v2991_v18, %v2988_v58  ;;  %v1355_v18 = vrot.slane %v6106_v42, 1 }
  0xf7   : > { %5038 = vmatprep.mubr.msk.bf16.mxu1 %vm434_vm1, %v1340_v48  ;;  %5261 = vmatpush3.bf16.msra.mxu1 %v6297_v30  ;;  %v1344_v30 = vsel %vm891_vm4, %v1341_v1, %v1343_v21  ;;  %v3004_v48 = vshrl.u32 %v6333_v32, 16  ;;  %v6472_v21 = vld [vmem:[%s5838_s22 + $0xa0] ss:$0 sps:$4 sm:$0x77]  }
  0xf8   : > { %v2993_v1 = vsel %vm2859_vm5, %v2983_v16, %v2992_v4  ;;  %v3022_v28 = vshrl.u32 %v6472_v21, 16  ;;  %v3025_v25 = vshll.u32 %v6472_v21, 16  ;;  %v3019_v16 = vor.u32 %v3018_v26, %v3015_v19 }
  0xf9   : > { %5203 = vmatmul.mubr.msk.bf16.gmra.mrb[16].mxu0 %vm434_vm1, %v2957_v63  ;;  %v3006_v63 = vrot.slane %v3004_v48, 2  ;;  %v1356_v47 = vsel %vm891_vm4, %v1353_v33, %v1355_v18  ;;  %v1359_v48 = vrot.slane %v6129_v24, 1  ;;  %v1367_v19 = vrot.slane %v6161_v11, 1 }
  0xfa   : > { %5206 = vmatprep.mubr.msk.bf16.mxu0 %vm434_vm1, %v2966_v61  ;;  %v3002_v61 = vsel %vm2859_vm5, %v2992_v4, %v3001_v52  ;;  %v3027_v58 = vrot.slane %v3025_v25, 3  ;;  %v3311_v4 = vrot.slane %v6184_v23, 3  ;;  %v3313_v23 = vrot.slane %v6197_v34, 3 }
  0xfb   : > { %v3010_v17 = vor.u32 %v3009_v13, %v3006_v63  ;;  %v1362_v34 = vsel %vm891_vm4, %v1359_v48, %v1361_v62  ;;  %v1750_v26 = vshrl.u32 %v6106_v42, 16 }
  0xfc   : > { %v3316_v63 = vsel %vm3309_vm6, %v3313_v23, %v3315_v54 }
  0xfd   : > { %v3011_v15 = vsel %vm2859_vm5, %v3001_v52, %v3010_v17  ;;  %v3020_v40 = vsel %vm2859_vm5, %v3010_v17, %v3019_v16  ;;  %v5702_v17 = vld [vmem:[%s5838_s22 + $0x98] ss:$0 sps:$4 sm:$0x11]   ;;  %v1752_v25 = vrot.slane %v1750_v26, 1 }
  0xfe   : > { %5039 = vmatmul.mubr.msk.bf16.gmra.mrb[4].mxu1 %vm434_vm1, %v1342_v7  ;;  %v1350_v7 = vsel %vm891_vm4, %v1347_v46, %v1349_v0  ;;  %v4725_v46 = vcombine.low %v3303_v27, %v6171_v56  ;;  %v3323_v27 = vrot.slane %v6240_v51, 3 }
  0xff   : > { %5042 = vmatprep.mubr.msk.bf16.mxu1 %vm434_vm1, %v1344_v30  ;;  %v1352_v30 = vsel %vm891_vm4, %v1349_v0, %v1351_v45  ;;  %v3314_v0 = vsel %vm3309_vm6, %v3311_v4, %v3313_v23 }
 0x101   : > { %5207 = vmatmul.mubr.msk.bf16.gmra.mrb[20].mxu0 %vm434_vm1, %v2975_v14  ;;  %v3024_v14 = vrot.slane %v3022_v28, 2 }
 0x102   : > { %5210 = vmatprep.mubr.msk.bf16.mxu0 %vm434_vm1, %v2984_v6  ;;  %v1354_v6 = vsel %vm891_vm4, %v1351_v45, %v1353_v33  ;;  %v1365_v45 = vrot.slane %v6157_v3, 1  ;;  %v1762_v33 = vshll.u32 %v6124_v22, 16 }
 0x103   : > { %v3028_v59 = vor.u32 %v3027_v58, %v3024_v14  ;;  %v1771_v58 = vshll.u32 %v6129_v24, 16 }
 0x104   : > { %v1368_v28 = vsel %vm891_vm4, %v1365_v45, %v1367_v19 }
 0x105   : > { %v3029_v56 = vsel %vm2859_vm5, %v3019_v16, %v3028_v59 }
 0x106   : > { %5043 = vmatmul.mubr.msk.bf16.gmra.mrb[8].mxu1 %vm434_vm1, %v1346_v31  ;;  %v3310_v31 = vrot.slane %v4725_v46, 3  ;;  %v1764_v46 = vrot.slane %v1762_v33, 2 }
 0x107   : > { %5046 = vmatprep.mubr.msk.bf16.mxu1 %vm434_vm1, %v1348_v50  ;;  %v1357_v50 = vrot.slane %v6124_v22, 1 }
 0x108   : > { %v3312_v57 = vsel %vm3309_vm6, %v3310_v31, %v3311_v4  ;;  %v3327_v31 = vrot.slane %v6259_v5, 3  ;;  %v1777_v4 = vshrl.u32 %v6141_v53, 16 }
 0x109   : > { %5211 = vmatmul.mubr.msk.bf16.gmra.mrb[24].mxu0 %vm434_vm1, %v2993_v1  ;;  %v1358_v52 = vsel %vm891_vm4, %v1355_v18, %v1357_v50  ;;  %v1360_v29 = vsel %vm891_vm4, %v1357_v50, %v1359_v48  ;;  %v1363_v1 = vrot.slane %v6145_v60, 1  ;;  %v1780_v50 = vshll.u32 %v6141_v53, 16 }
 0x10a   : > { %5214 = vmatprep.mubr.msk.bf16.mxu0 %vm434_vm1, %v3002_v61  ;;  %v3318_v61 = vsel %vm3309_vm6, %v3315_v54, %v3317_v36 }
 0x10b   : > { %v1364_v13 = vsel %vm891_vm4, %v1361_v62, %v1363_v1  ;;  %v1366_v41 = vsel %vm891_vm4, %v1363_v1, %v1365_v45  ;;  %v1782_v23 = vrot.slane %v1780_v50, 2  ;;  %v1795_v1 = vshrl.u32 %v6157_v3, 16 }
 0x10d   : > { %v1797_v45 = vrot.slane %v1795_v1, 1 }
 0x10e   : > { %5047 = vmatmul.mubr.msk.bf16.gmra.mrb[12].mxu1 %vm434_vm1, %v1350_v7  ;;  %v1753_v7 = vshll.u32 %v6106_v42, 16  ;;  %v1369_v42 = vrot.slane %v5702_v17, 1  ;;  %v1816_v17 = vshll.u32 %v6177_v9, 16 }
 0x10f   : > { %5050 = vmatprep.mubr.msk.bf16.mxu1 %vm434_vm1, %v1352_v30  ;;  %v3321_v30 = vrot.slane %v6236_v49, 3  ;;  %v1768_v49 = vshrl.u32 %v6129_v24, 16 }
 0x110   : > { %v1755_v16 = vrot.slane %v1753_v7, 2  ;;  %v1370_v51 = vsel %vm891_vm4, %v1367_v19, %v1369_v42  ;;  %v3333_v19 = vrot.slane %v6291_v43, 3 }
 0x111   : > { %5215 = vmatmul.mubr.msk.bf16.gmra.mrb[28].mxu0 %vm434_vm1, %v3011_v15  ;;  %v3322_v15 = vsel %vm3309_vm6, %v3319_v55, %v3321_v30  ;;  %v3324_v18 = vsel %vm3309_vm6, %v3321_v30, %v3323_v27  ;;  %v1770_v59 = vrot.slane %v1768_v49, 1  ;;  %v3343_v49 = vrot.slane %v6337_v38, 3 }
 0x112   : > { %5218 = vmatprep.mubr.msk.bf16.mxu0 %vm434_vm1, %v3020_v40  ;;  %v1756_v14 = vor.u32 %v1755_v16, %v1752_v25  ;;  %v1761_v40 = vrot.slane %v1759_v35, 1  ;;  %v3339_v35 = vrot.slane %v6320_v20, 3 }
 0x114   : > { %v1757_v22 = vsel %vm1650_vm2, %v6022_v8, %v1756_v14  ;;  %v1765_v24 = vor.u32 %v1764_v46, %v1761_v40  ;;  %v1789_v8 = vshll.u32 %v6145_v60, 16  ;;  %v3620_v40 = vlaneseq }
 0x116   : > { %5051 = vmatmul.mubr.msk.bf16.gmra.mrb[16].mxu1 %vm434_vm1, %v1354_v6  ;;  %v3325_v6 = vrot.slane %v6254_v10, 3  ;;  %v1786_v10 = vshrl.u32 %v6145_v60, 16  ;;  %v1766_v5 = vsel %vm1650_vm2, %v1756_v14, %v1765_v24  ;;  %v1791_v62 = vrot.slane %v1789_v8, 2 }
 0x117   : > { %5054 = vmatprep.mubr.msk.bf16.mxu1 %vm434_vm1, %v1356_v47  ;;  %v1773_v47 = vrot.slane %v1771_v58, 2 }
 0x118   : > { %v1788_v54 = vrot.slane %v1786_v10, 1 }
 0x119   : > { %5219 = vmatmul.mubr.msk.bf16.gmra.mrb[32].mxu0 %vm434_vm1, %v3029_v56  ;;  %v3326_v56 = vsel %vm3309_vm6, %v3323_v27, %v3325_v6  ;;  %v1774_v48 = vor.u32 %v1773_v47, %v1770_v59  ;;  %v3337_v27 = vrot.slane %v6315_v12, 3  ;;  %v3341_v12 = vrot.slane %v6333_v32, 3 }
 0x11a   : > { %5224 = vmatprep.mubr.msk.bf16.mxu0 %vm434_vm1, %v3312_v57  ;;  %v3328_v57 = vsel %vm3309_vm6, %v3325_v6, %v3327_v31  ;;  %v1792_v36 = vor.u32 %v1791_v62, %v1788_v54  ;;  %v6605_v32 = vshrl.u32 %v3620_v40, 7 }
 0x11b   : > { %v1775_v53 = vsel %vm1650_vm2, %v1765_v24, %v1774_v48  ;;  %v3342_v20 = vsel %vm3309_vm6, %v3339_v35, %v3341_v12  ;;  %v3344_v58 = vsel %vm3309_vm6, %v3341_v12, %v3343_v49 }
 0x11c   : > { %v3623_v38 = vadd.s32 16, %v6605_v32  ;;  %v3624_v46 = vadd.s32 24, %v6605_v32  ;;  %v3622_v59 = vadd.s32 8, %v6605_v32 }
 0x11e   : > { %5055 = vmatmul.mubr.msk.bf16.gmra.mrb[20].mxu1 %vm434_vm1, %v1358_v52  ;;  %v1779_v52 = vrot.slane %v1777_v4, 1  ;;  %v3627_v4 = vadd.s32 48, %v6605_v32 }
 0x11f   : > { %5058 = vmatprep.mubr.msk.bf16.mxu1 %vm434_vm1, %v1360_v29  ;;  %v3329_v29 = vrot.slane %v6272_v2, 3  ;;  %v1804_v2 = vshrl.u32 %v6161_v11, 16 }
 0x120   : > { %v1783_v60 = vor.u32 %v1782_v23, %v1779_v52  ;;  %v6625_v10 = vmul.u32.u64.low 3817748708, %v3627_v4  ;;  %v6626_v8 = vmul.u32.u64.high 3817748708, %v3627_v4, %v6625_v10 }
 0x121   : > { %5225 = vmatmul.mubr.msk.bf16.vlgmr.msra.gmra.mrb[0].mxu0 %vm434_vm1, %v3314_v0  ;;  %v3331_v0 = vrot.slane %v6277_v37, 3  ;;  %v1806_v26 = vrot.slane %v1804_v2, 1 }
 0x122   : > { %5228 = vmatprep.mubr.msk.bf16.mxu0 %vm434_vm1, %v3316_v63  ;;  %v1798_v63 = vshll.u32 %v6157_v3, 16  ;;  %v1784_v37 = vsel %vm1650_vm2, %v1774_v48, %v1783_v60  ;;  %v1793_v3 = vsel %vm1650_vm2, %v1783_v60, %v1792_v36  ;;  %v3625_v48 = vadd.s32 32, %v6605_v32 }
 0x123   : > { %v3332_v55 = vsel %vm3309_vm6, %v3329_v29, %v3331_v0  ;;  %v3334_v30 = vsel %vm3309_vm6, %v3331_v0, %v3333_v19 }
 0x126   : > { %5059 = vmatmul.mubr.msk.bf16.gmra.mrb[24].mxu1 %vm434_vm1, %v1362_v34  ;;  %v3330_v34 = vsel %vm3309_vm6, %v3327_v31, %v3329_v29  ;;  %v6614_v47 = vmul.u32.u64.low 3817748708, %v6605_v32  ;;  %v6615_v31 = vmul.u32.u64.high 3817748708, %v6605_v32, %v6614_v47 }
 0x127   : > { %5062 = vmatprep.mubr.msk.bf16.mxu1 %vm434_vm1, %v1364_v13  ;;  %v1807_v13 = vshll.u32 %v6161_v11, 16  ;;  %v6631_v23 = vmul.u32.u64.low 3817748708, %v3625_v48  ;;  %v6632_v29 = vmul.u32.u64.high 3817748708, %v3625_v48, %v6631_v23 }
 0x129   : > { %5229 = vmatmul.mubr.msk.bf16.gmra.mrb[4].mxu0 %vm434_vm1, %v3318_v61  ;;  %v1800_v61 = vrot.slane %v1798_v63, 2  ;;  %v1809_v7 = vrot.slane %v1807_v13, 2 }
 0x12a   : > { %5232 = vmatprep.mubr.msk.bf16.mxu0 %vm434_vm1, %v3320_v39  ;;  %v3335_v39 = vrot.slane %v6302_v44, 3  ;;  %v1818_v44 = vrot.slane %v1816_v17, 2  ;;  %v6673_v17 = vadd.s32 88, %v6605_v32 }
 0x12b   : > { %v1801_v11 = vor.u32 %v1800_v61, %v1797_v45  ;;  %v3707_v61 = vshrl.u32 %v6632_v29, 4 }
 0x12c   : > { %v3336_v43 = vsel %vm3309_vm6, %v3333_v19, %v3335_v39  ;;  %v3338_v33 = vsel %vm3309_vm6, %v3335_v39, %v3337_v27  ;;  %v6664_v39 = vadd.s32 64, %v6605_v32 }
 0x12d   : > { %v1802_v25 = vsel %vm1650_vm2, %v1792_v36, %v1801_v11  ;;  %v6644_v36 = vadd.s32 40, %v6605_v32 }
 0x12e   : > { %5063 = vmatmul.mubr.msk.bf16.gmra.mrb[28].mxu1 %vm434_vm1, %v1366_v41  ;;  %v1813_v41 = vshrl.u32 %v6177_v9, 16 }
 0x12f   : > { %5066 = vmatprep.mubr.msk.bf16.mxu1 %vm434_vm1, %v1368_v28  ;;  %v1810_v28 = vor.u32 %v1809_v7, %v1806_v26  ;;  %v6660_v26 = vmul.u32.u64.low 3817748708, %v6644_v36  ;;  %v6661_v7 = vmul.u32.u64.high 3817748708, %v6644_v36, %v6660_v26 }
 0x130   : > { %v1815_v16 = vrot.slane %v1813_v41, 1 }
 0x131   : > { %5233 = vmatmul.mubr.msk.bf16.gmra.mrb[8].mxu0 %vm434_vm1, %v3322_v15  ;;  %v1811_v42 = vsel %vm1650_vm2, %v1801_v11, %v1810_v28  ;;  %v3340_v15 = vsel %vm3309_vm6, %v3337_v27, %v3339_v35  ;;  %v6688_v27 = vadd.s32 72, %v6605_v32  ;;  %v3718_v47 = vshrl.u32 %v6661_v7, 4 }
 0x132   : > { %5236 = vmatprep.mubr.msk.bf16.mxu0 %vm434_vm1, %v3324_v18  ;;  %v1819_v9 = vor.u32 %v1818_v44, %v1815_v16  ;;  %v3345_v18 = vrot.slane %v6472_v21, 3  ;;  %v6617_v21 = vmul.u32.u64.low 3817748708, %v3624_v46  ;;  %v6618_v24 = vmul.u32.u64.high 3817748708, %v3624_v46, %v6617_v21 }
 0x133   : > { %v3708_v16 = vmul.u32 18, %v3707_v61  ;;  %v6755_v21 = vadd.s32 112, %v6605_v32  ;;  %v3719_v23 = vmul.u32 18, %v3718_v47 }
 0x134   : > { %v1820_v14 = vsel %vm1650_vm2, %v1810_v28, %v1819_v9  ;;  %v3696_v52 = vshrl.u32 %v6618_v24, 4  ;;  %v6694_v35 = vmul.u32.u64.low 3817748708, %v6664_v39  ;;  %v6695_v9 = vmul.u32.u64.high 3817748708, %v6664_v39, %v6694_v35 }
 0x135   : > { %v6737_v40 = vsub.s32 %v3625_v48, %v3708_v16  ;;  %v6823_v7 = vsub.s32 %v6644_v36, %v3719_v23  ;;  %v6862_v23 = vadd.s32 128, %v6605_v32 }
 0x136   : > { %5067 = vmatmul.mubr.msk.bf16.gmra.mrb[32].mxu1 %vm434_vm1, %v1370_v51  ;;  %v3346_v51 = vsel %vm3309_vm6, %v3343_v49, %v3345_v18  ;;  %v3697_v60 = vmul.u32 18, %v3696_v52  ;;  %v3751_v29 = vshrl.u32 %v6695_v9, 4 }
 0x137   : > { %5092 = vmatprep.mubr.msk.bf16.mxu1 %vm434_vm1, %v1757_v22  ;;  %v6609_v6 = vmul.u32.u64.low 3817748708, %v3623_v38  ;;  %v6610_v22 = vmul.u32.u64.high 3817748708, %v3623_v38, %v6609_v6  ;;  %vm4057_vm6 = vcmp.ne.s32.totalorder %v6737_v40, 0 }
 0x138   : > { %v6654_v45 = vsub.s32 %v3624_v46, %v3697_v60  ;;  %v6740_v46 = vmul.u32.u64.low 3817748708, %v6688_v27  ;;  %v6741_v6 = vmul.u32.u64.high 3817748708, %v6688_v27, %v6740_v46 }
 0x139   : > { %5237 = vmatmul.mubr.msk.bf16.gmra.mrb[12].mxu0 %vm434_vm1, %v3326_v56  ;;  %v6621_v50 = vmul.u32.u64.low 3817748708, %v3622_v59  ;;  %v6622_v56 = vmul.u32.u64.high 3817748708, %v3622_v59, %v6621_v50 }
 0x13a   : > { %5240 = vmatprep.mubr.msk.bf16.mxu0 %vm434_vm1, %v3328_v57  ;;  %v3685_v57 = vshrl.u32 %v6610_v22, 4  ;;  %vm4056_vm11 = vcmp.ne.s32.totalorder %v6654_v45, 0  ;;  %vm4092_vm12 = vcmp.lt.s32.totalorder %v6654_v45, 0  ;;  %v3762_v61 = vshrl.u32 %v6741_v6, 4 }
 0x13b   : > { %v3674_v62 = vshrl.u32 %v6622_v56, 4 }
 0x13c   : > { %v3686_v54 = vmul.u32 18, %v3685_v57 }
 0x13d   : > { %v3675_v13 = vmul.u32 18, %v3674_v62 }
 0x13e   : > { %5093 = vmatmul.mubr.msk.bf16.vlgmr.msra.gmra.mrb[20].mxu1 %vm434_vm1, %v1766_v5  ;;  %v3663_v5 = vshrl.u32 %v6615_v31, 4  ;;  %v6646_v2 = vsub.s32 %v3623_v38, %v3686_v54  ;;  %v6794_v54 = vadd.s32 96, %v6605_v32 }
 0x13f   : > { %5096 = vmatprep.mubr.msk.bf16.mxu1 %vm434_vm1, %v1775_v53  ;;  %v6635_v53 = vadd.s32 56, %v6605_v32  ;;  %v6670_v41 = vsub.s32 %v3622_v59, %v3675_v13  ;;  %v6812_v13 = vadd.s32 104, %v6605_v32 }
 0x140   : > { %v3664_v0 = vmul.u32 18, %v3663_v5  ;;  %vm4055_vm7 = vcmp.ne.s32.totalorder %v6646_v2, 0  ;;  %vm4091_vm8 = vcmp.lt.s32.totalorder %v6646_v2, 0  ;;  %v6712_v12 = vadd.s32 18, %v6646_v2 }
 0x141   : > { %5241 = vmatmul.mubr.msk.bf16.gmra.mrb[16].mxu0 %vm434_vm1, %v3330_v34  ;;  %v6639_v1 = vmul.u32.u64.low 3817748708, %v6635_v53  ;;  %v6640_v63 = vmul.u32.u64.high 3817748708, %v6635_v53, %v6639_v1  ;;  %v3729_v34 = vshrl.u32 %v6626_v8, 4  ;;  %vm6701_vm13 = vmand %vm4091_vm8, %vm4055_vm7  ;;  %vm4054_vm14 = vcmp.ne.s32.totalorder %v6670_v41, 0 }
 0x142   : > { %5244 = vmatprep.mubr.msk.bf16.mxu0 %vm434_vm1, %v3332_v55  ;;  %v6649_v55 = vsub.s32 %v6605_v32, %v3664_v0  ;;  %vm4090_vm15 = vcmp.lt.s32.totalorder %v6670_v41, 0  ;;  %v6729_v18 = vadd.s32 18, %v6670_v41  ;;  %vm4093_vm7 = vcmp.lt.s32.totalorder %v6737_v40, 0 }
 0x143   : > { %v3740_v44 = vshrl.u32 %v6640_v63, 4  ;;  %vm6745_vm2 = vmand %vm4090_vm15, %vm4054_vm14  ;;  %v6798_v0 = vmul.u32.u64.low 3817748708, %v6755_v21  ;;  %v6799_v60 = vmul.u32.u64.high 3817748708, %v6755_v21, %v6798_v0  ;;  %v6802_v1 = vadd.s32 120, %v6605_v32 }
 0x144   : > { %vm4053_vm9 = vcmp.ne.s32.totalorder %v6649_v55, 0  ;;  %vm4089_vm10 = vcmp.lt.s32.totalorder %v6649_v55, 0  ;;  %v6809_v63 = vadd.s32 18, %v6737_v40  ;;  %vm4094_vm14 = vcmp.lt.s32.totalorder %v6823_v7, 0 }
 0x145   : > { %vm6718_vm0 = vmand %vm4089_vm10, %vm4053_vm9  ;;  %v3741_v38 = vmul.u32 18, %v3740_v44 }
 0x146   : > { %5097 = vmatmul.mubr.msk.bf16.gmra.mrb[24].mxu1 %vm434_vm1, %v1784_v37  ;;  %v6652_v37 = vadd.s32 80, %v6605_v32  ;;  %vm6835_vm10 = vmand %vm4093_vm7, %vm4057_vm6 }
 0x147   : > { %5100 = vmatprep.mubr.msk.bf16.mxu1 %vm434_vm1, %v1793_v3  ;;  %v3730_v3 = vmul.u32 18, %v3729_v34  ;;  %v6789_v52 = vsub.s32 %v6635_v53, %v3741_v38  ;;  %v6895_v53 = vmul.u32.u64.low 3817748708, %v6862_v23  ;;  %v6896_v57 = vmul.u32.u64.high 3817748708, %v6862_v23, %v6895_v53 }
 0x149   : > { %5245 = vmatmul.mubr.msk.bf16.gmra.mrb[20].mxu0 %vm434_vm1, %v3334_v30  ;;  %vm4060_vm8 = vcmp.ne.s32.totalorder %v6789_v52, 0  ;;  %vm4096_vm9 = vcmp.lt.s32.totalorder %v6789_v52, 0  ;;  %v6840_v9 = vadd.s32 18, %v6789_v52 }
 0x14a   : > { %5248 = vmatprep.mubr.msk.bf16.mxu0 %vm434_vm1, %v3336_v43  ;;  %v6680_v28 = vmul.u32.u64.low 3817748708, %v6652_v37  ;;  %v6681_v43 = vmul.u32.u64.high 3817748708, %v6652_v37, %v6680_v28 }
 0x14b   : > { %v3752_v28 = vmul.u32 18, %v3751_v29 }
 0x14c   : > { %v3773_v48 = vshrl.u32 %v6681_v43, 4  ;;  %v6826_v43 = vmul.u32.u64.low 3817748708, %v6794_v54  ;;  %v6827_v16 = vmul.u32.u64.high 3817748708, %v6794_v54, %v6826_v43 }
 0x14e   : > { %5101 = vmatmul.mubr.msk.bf16.gmra.mrb[28].mxu1 %vm434_vm1, %v1802_v25  ;;  %v3774_v34 = vmul.u32 18, %v3773_v48  ;;  %v6858_v47 = vmul.u32.u64.low 3817748708, %v6812_v13  ;;  %v6859_v48 = vmul.u32.u64.high 3817748708, %v6812_v13, %v6858_v47  ;;  %v3795_v53 = vshrl.u32 %v6827_v16, 4 }
 0x14f   : > { %5104 = vmatprep.mubr.msk.bf16.mxu1 %vm434_vm1, %v1811_v42  ;;  %v6691_v42 = vsub.s32 %v3627_v4, %v3730_v3  ;;  %v6818_v3 = vadd.s32 144, %v6605_v32  ;;  %v6887_v47 = vadd.s32 18, %v6823_v7  ;;  %v8114_v16 = vmov 0 }
 0x150   : > { %v6855_v6 = vsub.s32 %v6652_v37, %v3774_v34  ;;  %v6880_v34 = vsub.s32 %v6664_v39, %v3752_v28  ;;  %v3817_v37 = vshrl.u32 %v6799_v60, 4  ;;  %v6899_v39 = vadd.s32 136, %v6605_v32 }
 0x151   : > { %5249 = vmatmul.mubr.msk.bf16.gmra.mrb[24].mxu0 %vm434_vm1, %v3338_v33  ;;  %vm4059_vm3 = vcmp.ne.s32.totalorder %v6691_v42, 0  ;;  %vm4095_vm4 = vcmp.lt.s32.totalorder %v6691_v42, 0  ;;  %v6768_v56 = vadd.s32 18, %v6691_v42  ;;  %v3806_v4 = vshrl.u32 %v6859_v48, 4 }
 0x152   : > { %5252 = vmatprep.mubr.msk.bf16.mxu0 %vm434_vm1, %v3340_v15  ;;  %vm6783_vm5 = vmand %vm4095_vm4, %vm4059_vm3  ;;  %8105 = vst [vmem:[#allocation9_spill] sm:$0xff] %v6855_v6  ;;  %v6867_v0 = vmul.u32.u64.low 3817748708, %v6818_v3  ;;  %v6868_v43 = vmul.u32.u64.high 3817748708, %v6818_v3, %v6867_v0  ;;  %vm4063_vm15 = vcmp.ne.s32.totalorder %v6855_v6, 0  ;;  %vm4099_vm3 = vcmp.lt.s32.totalorder %v6855_v6, 0 }
 0x153   : > { %v6912_v60 = vadd.s32 18, %v6855_v6  ;;  %vm4061_vm4 = vcmp.ne.s32.totalorder %v6880_v34, 0  ;;  %vm6936_vm6 = vmand %vm4099_vm3, %vm4063_vm15  ;;  %vm8118_vm15 = vcmp.lt.s32.totalorder %v6880_v34, 0  ;;  %v8122_v48 = vmov 0 }
 0x154   : > { %v8115_v16 = vsel %vm6936_vm6, 4294967295, %v8114_v16  ;;  %vm6964_vm3 = vmand %vm8118_vm15, %vm4061_vm4 }
 0x155   : > { %8109 = vst [vmem:[#allocation13_spill] sm:$0xff] %v6912_v60  ;;  %8116 = vst [vmem:[#allocation16_spill] sm:$0xff] %v8115_v16 }
 0x156   : > { %5105 = vmatmul.mubr.msk.bf16.gmra.mrb[32].mxu1 %vm434_vm1, %v1820_v14  ;;  %v6708_v15 = vmul.u32.u64.low 3817748708, %v6673_v17  ;;  %v6709_v14 = vmul.u32.u64.high 3817748708, %v6673_v17, %v6708_v15 }
 0x158   : > { %v3784_v62 = vshrl.u32 %v6709_v14, 4  ;;  %v6843_v15 = vmul.u32.u64.low 3817748708, %v6802_v1  ;;  %v6844_v14 = vmul.u32.u64.high 3817748708, %v6802_v1, %v6843_v15 }
 0x159   : > { %5253 = vmatmul.mubr.msk.bf16.gmra.mrb[28].mxu0 %vm434_vm1, %v3342_v20  ;;  %v6723_v20 = vadd.s32 18, %v6649_v55  ;;  %v6871_v15 = vadd.s32 152, %v6605_v32 }
 0x15a   : > { %5256 = vmatprep.mubr.msk.bf16.mxu0 %vm434_vm1, %v3344_v58  ;;  %v6726_v58 = vadd.s32 18, %v6654_v45  ;;  %v3785_v36 = vmul.u32 18, %v3784_v62  ;;  %v3763_v62 = vmul.u32 18, %v3762_v61 }
 0x15b   : > { %v8134_v33 = vsel %vm6718_vm0, %v6723_v20, %v6649_v55 }
 0x15c   : > { %v6890_v0 = vsub.s32 %v6673_v17, %v3785_v36  ;;  %v6903_v28 = vsub.s32 %v6688_v27, %v3763_v62  ;;  %v6906_v61 = vmul.u32.u64.low 3817748708, %v6871_v15  ;;  %v6907_v17 = vmul.u32.u64.high 3817748708, %v6871_v15, %v6906_v61 }
 0x15d   : > { %v3818_v62 = vmul.u32 18, %v3817_v37  ;;  %v3828_v61 = vshrl.u32 %v6844_v14, 4  ;;  %v6946_v37 = vadd.s32 176, %v6605_v32 }
 0x15e   : > { %8107 = vst [vmem:[#allocation11_spill] sm:$0xff] %v6903_v28 }
 0x161   : > { %5257 = vmatmul.mubr.msk.bf16.gmra.mrb[32].mxu0 %vm434_vm1, %v3346_v51  ;;  %vm6733_vm1 = vmand %vm4092_vm12, %vm4056_vm11  ;;  %vm4058_vm12 = vcmp.ne.s32.totalorder %v6823_v7, 0 }
 0x162   : > { %vm6850_vm11 = vmand %vm4096_vm9, %vm4060_vm8  ;;  %vm4064_vm8 = vcmp.ne.s32.totalorder %v6890_v0, 0  ;;  %vm4100_vm9 = vcmp.lt.s32.totalorder %v6890_v0, 0  ;;  %v8141_v55 = vsel %vm6733_vm1, %v6726_v58, %v6654_v45  ;;  %v8148_v58 = vsel %vm6745_vm2, %v6729_v18, %v6670_v41 }
 0x163   : > { %vm6923_vm7 = vmand %vm4094_vm14, %vm4058_vm12  ;;  %vm4062_vm12 = vcmp.ne.s32.totalorder %v6903_v28, 0  ;;  %vm4098_vm14 = vcmp.lt.s32.totalorder %v6903_v28, 0  ;;  %vm7101_vm0 = vcmp.lt.s32.totalorder %v8141_v55, 16  ;;  %vm7126_vm1 = vcmp.lt.s32.totalorder %v8148_v58, 16 }
 0x164   : > { %vm6982_vm4 = vmand %vm4100_vm9, %vm4064_vm8  ;;  %v7144_v41 = vadd.s32 192, %v6605_v32 }
 0x165   : > { %v8123_v48 = vsel %vm6982_vm4, 4294967295, %v8122_v48  ;;  %vm6992_vm15 = vmand %vm4098_vm14, %vm4062_vm12 }
 0x1c9   : > { %v6657_v19 = vpop.f32.mrb[0].mxu1 }
 0x1ca   : > { %v6666_v11 = vpop.f32.mrb[1].mxu1 }
 0x1cb   : > { %v6675_v30 = vpop.f32.mrb[2].mxu1 }
 0x1cc   : > { %v6683_v25 = vpop.f32.mrb[3].mxu1 }
 0x1d1   : > { %v6743_v22 = vpop.f32.mrb[4].mxu1 }
 0x1d2   : > { %8090 = vst [vmem:[#allocation2_spill] sm:$0xff] %v6743_v22  ;;  %v6752_v31 = vpop.f32.mrb[5].mxu1  ;;  %v6998_v22 = vmul.u32.u64.low 3817748708, %v6946_v37  ;;  %v6999_v6 = vmul.u32.u64.high 3817748708, %v6946_v37, %v6998_v22 }
 0x1d3   : > { %8093 = vst [vmem:[#allocation3_spill] sm:$0xff] %v6752_v31  ;;  %v6757_v24 = vpop.f32.mrb[6].mxu1  ;;  %v3839_v31 = vshrl.u32 %v6896_v57, 4 }
 0x1d4   : > { %8094 = vst [vmem:[#allocation4_spill] sm:$0xff] %v6757_v24  ;;  %v6771_v10 = vpop.f32.mrb[7].mxu1  ;;  %v8124_v24 = vmov 0 }
 0x1d5   : > { %8095 = vst [vmem:[#allocation5_spill] sm:$0xff] %v6771_v10  ;;  %v3829_v10 = vmul.u32 18, %v3828_v61  ;;  %v8125_v24 = vsel %vm6992_vm15, 4294967295, %v8124_v24  ;;  %v3840_v60 = vmul.u32 18, %v3839_v31  ;;  %v7057_v31 = vadd.s32 168, %v6605_v32 }
 0x1d7   : > { %v7116_v51 = vsub.s32 %v6862_v23, %v3840_v60 }
 0x1d9   : > { %v6820_v26 = vpop.f32.mrb[8].mxu1 }
 0x1da   : > { %8098 = vst [vmem:[#allocation6_spill] sm:$0xff] %v6820_v26  ;;  %v6829_v44 = vpop.f32.mrb[9].mxu1  ;;  %v6987_v26 = vadd.s32 18, %v6903_v28 }
 0x1db   : > { %8099 = vst [vmem:[#allocation7_spill] sm:$0xff] %v6829_v44  ;;  %v6846_v38 = vpop.f32.mrb[10].mxu1  ;;  %v6972_v44 = vadd.s32 160, %v6605_v32 }
 0x1dc   : > { %8102 = vst [vmem:[#allocation8_spill] sm:$0xff] %v6846_v38  ;;  %v6864_v29 = vpop.f32.mrb[11].mxu1  ;;  %v3796_v38 = vmul.u32 18, %v3795_v53  ;;  %v6990_v53 = vsub.s32 %v6755_v21, %v3818_v62  ;;  %v3872_v21 = vshrl.u32 %v6907_v17, 4  ;;  %v7007_v62 = vadd.s32 184, %v6605_v32 }
 0x1dd   : > { %8106 = vst [vmem:[#allocation10_spill] sm:$0xff] %v6864_v29  ;;  %v3861_v29 = vshrl.u32 %v6868_v43, 4  ;;  %v3807_v43 = vmul.u32 18, %v3806_v4  ;;  %v7031_v4 = vsub.s32 %v6802_v1, %v3829_v10 }
 0x1de   : > { %v7016_v22 = vsub.s32 %v6794_v54, %v3796_v38  ;;  %v7036_v38 = vadd.s32 18, %v6990_v53  ;;  %v3873_v28 = vmul.u32 18, %v3872_v21  ;;  %vm8137_vm14 = vcmp.ne.s32.totalorder %v6990_v53, 0 }
 0x1df   : > { %v3862_v16 = vmul.u32 18, %v3861_v29  ;;  %v7048_v10 = vmul.u32.u64.low 3817748708, %v7007_v62  ;;  %v7049_v1 = vmul.u32.u64.high 3817748708, %v7007_v62, %v7048_v10  ;;  %vm8138_vm8 = vcmp.lt.s32.totalorder %v6990_v53, 0 }
 0x1e0   : > { %8127 = vst [vmem:[#allocation20_spill] sm:$0xff] %v7016_v22  ;;  %vm7089_vm12 = vmand %vm8138_vm8, %vm8137_vm14  ;;  %v3905_v21 = vshrl.u32 %v6999_v6, 4  ;;  %vm8144_vm8 = vcmp.ne.s32.totalorder %v7016_v22, 0  ;;  %vm8145_vm14 = vcmp.lt.s32.totalorder %v7016_v22, 0  ;;  %v8146_v10 = vmov 0 }
 0x1e1   : > { %v6909_v36 = vpop.f32.mrb[12].mxu1  ;;  %v7045_v17 = vsub.s32 %v6818_v3, %v3862_v16  ;;  %v8131_v3 = vsel %vm6701_vm13, %v6712_v12, %v6646_v2  ;;  %v7071_v16 = vadd.s32 18, %v7031_v4  ;;  %vm7081_vm13 = vcmp.lt.s32.totalorder %v8134_v33, 16 }
 0x1e2   : > { %8108 = vst [vmem:[#allocation12_spill] sm:$0xff] %v6909_v36  ;;  %v6917_v8 = vpop.f32.mrb[13].mxu1  ;;  %vm7064_vm9 = vcmp.lt.s32.totalorder %v8131_v3, 16  ;;  %v8139_v12 = vmov 0  ;;  %v7119_v45 = vsub.s32 %v6871_v15, %v3873_v28  ;;  %v8149_v6 = vmov 0 }
 0x1e3   : > { %8110 = vst [vmem:[#allocation14_spill] sm:$0xff] %v6917_v8  ;;  %v6930_v50 = vpop.f32.mrb[14].mxu1  ;;  %v6942_v8 = vmul.u32.u64.low 3817748708, %v6899_v39  ;;  %v6943_v36 = vmul.u32.u64.high 3817748708, %v6899_v39, %v6942_v8  ;;  %v8140_v12 = vsel %vm7089_vm12, 4294967295, %v8139_v12  ;;  %v8150_v6 = vsel %vm7126_vm1, 4294967295, %v8149_v6 }
 0x1e4   : > { %8113 = vst [vmem:[#allocation15_spill] sm:$0xff] %v6930_v50  ;;  %v6948_v14 = vpop.f32.mrb[15].mxu1  ;;  %v6951_v50 = vadd.s32 18, %v6880_v34  ;;  %v8119_v8 = vmov 0  ;;  %v7140_v15 = vmul.u32.u64.low 3817748708, %v7057_v31  ;;  %v7141_v59 = vmul.u32.u64.high 3817748708, %v7057_v31, %v7140_v15 }
 0x1e5   : > { %8117 = vst [vmem:[#allocation17_spill] sm:$0xff] %v6948_v14  ;;  %v8120_v8 = vsel %vm6964_vm3, 4294967295, %v8119_v8  ;;  %v6969_v14 = vadd.s32 18, %v6890_v0  ;;  %vm7109_vm3 = vmand %vm8145_vm14, %vm8144_vm8  ;;  %vm8151_vm8 = vcmp.ne.s32.totalorder %v7031_v4, 0  ;;  %vm8152_vm14 = vcmp.lt.s32.totalorder %v7031_v4, 0  ;;  %v8237_v18 = vld [vmem:[#allocation10_spill] sm:$0xff] }
 0x1e6   : > { %8121 = vst [vmem:[#allocation18_spill] sm:$0xff] %v8120_v8  ;;  %v7019_v57 = vmul.u32.u64.low 3817748708, %v6972_v44  ;;  %v7020_v8 = vmul.u32.u64.high 3817748708, %v6972_v44, %v7019_v57  ;;  %v8147_v10 = vsel %vm7109_vm3, 4294967295, %v8146_v10  ;;  %vm7134_vm15 = vmand %vm8152_vm14, %vm8151_vm8  ;;  %v7158_v60 = vadd.s32 18, %v7045_v17 }
 0x1e7   : > { %v7039_v57 = vsub.s32 %v6812_v13, %v3807_v43  ;;  %v7054_v13 = vadd.s32 18, %v7016_v22  ;;  %v7074_v43 = vadd.s32 208, %v6605_v32  ;;  %vm8160_vm8 = vcmp.lt.s32.totalorder %v7045_v17, 0 }
 0x1e8   : > { %v3883_v23 = vshrl.u32 %v7020_v8, 4  ;;  %vm4105_vm12 = vcmp.lt.s32.totalorder %v7116_v51, 0  ;;  %vm4072_vm1 = vcmp.ne.s32.totalorder %v7119_v45, 0  ;;  %v3916_v55 = vshrl.u32 %v7049_v1, 4 }
 0x1e9   : > { %v7009_v61 = vpop.f32.mrb[16].mxu1  ;;  %vm8155_vm2 = vcmp.ne.s32.totalorder %v7039_v57, 0  ;;  %vm8156_vm4 = vcmp.lt.s32.totalorder %v7039_v57, 0  ;;  %v7155_v28 = vadd.s32 18, %v7039_v57  ;;  %v4212_v1 = vsel %vm7134_vm15, %v7071_v16, %v7031_v4  ;;  %v8229_v16 = vld [vmem:[#allocation8_spill] sm:$0xff] }
 0x1ea   : > { %8126 = vst [vmem:[#allocation19_spill] sm:$0xff] %v7009_v61  ;;  %v7022_v29 = vpop.f32.mrb[17].mxu1  ;;  %vm7150_vm6 = vmand %vm8156_vm4, %vm8155_vm2  ;;  %v7161_v8 = vmul.u32.u64.low 3817748708, %v7074_v43  ;;  %v7162_v3 = vmul.u32.u64.high 3817748708, %v7074_v43, %v7161_v8  ;;  %vm8159_vm4 = vcmp.ne.s32.totalorder %v7045_v17, 0  ;;  %vm4069_vm2 = vcmp.ne.s32.totalorder %v7116_v51, 0 }
 0x1eb   : > { %8128 = vst [vmem:[#allocation21_spill] sm:$0xff] %v7022_v29  ;;  %v7033_v54 = vpop.f32.mrb[18].mxu1  ;;  %v3850_v29 = vshrl.u32 %v6943_v36, 4  ;;  %vm7176_vm14 = vmand %vm8160_vm8, %vm8159_vm4  ;;  %v3906_v8 = vmul.u32 18, %v3905_v21  ;;  %v3884_v33 = vmul.u32 18, %v3883_v23  ;;  %v8166_v23 = vsel %vm6835_vm10, %v6809_v63, %v6737_v40 }
 0x1ec   : > { %8129 = vst [vmem:[#allocation22_spill] sm:$0xff] %v7033_v54  ;;  %v7042_v61 = vpop.f32.mrb[19].mxu1  ;;  %vm7230_vm8 = vmand %vm4105_vm12, %vm4069_vm2  ;;  %vm8174_vm12 = vcmp.lt.s32.totalorder %v7119_v45, 0  ;;  %v3917_v46 = vmul.u32 18, %v3916_v55  ;;  %v3894_v55 = vshrl.u32 %v7141_v59, 4  ;;  %v3949_v27 = vshrl.u32 %v7162_v3, 4 }
 0x1ed   : > { %8130 = vst [vmem:[#allocation23_spill] sm:$0xff] %v7042_v61  ;;  %v3851_v49 = vmul.u32 18, %v3850_v29  ;;  %v7189_v61 = vmul.u32.u64.low 3817748708, %v7144_v41  ;;  %v7190_v54 = vmul.u32.u64.high 3817748708, %v7144_v41, %v7189_v61  ;;  %v7239_v35 = vsub.s32 %v6946_v37, %v3906_v8  ;;  %vm7255_vm2 = vmand %vm8174_vm12, %vm4072_vm1 }
 0x1ee   : > { %v8177_v8 = vsel %vm6923_vm7, %v6887_v47, %v6823_v7  ;;  %v7304_v20 = vsub.s32 %v7007_v62, %v3917_v46  ;;  %v7307_v59 = vadd.s32 216, %v6605_v32  ;;  %v3895_v3 = vmul.u32 18, %v3894_v55 }
 0x1ef   : > { %v7181_v15 = vsub.s32 %v6899_v39, %v3851_v49  ;;  %v8163_v39 = vsel %vm6783_vm5, %v6768_v56, %v6691_v42  ;;  %v7214_v42 = vadd.s32 18, %v7116_v51  ;;  %vm7222_vm5 = vcmp.lt.s32.totalorder %v8166_v23, 16  ;;  %v8208_v49 = vld [vmem:[#allocation5_spill] sm:$0xff] }
 0x1f0   : > { %vm7197_vm4 = vcmp.lt.s32.totalorder %v8163_v39, 16  ;;  %vm8203_vm1 = vnez %v8125_v24  ;;  %v7403_v23 = vadd.s32 18, %v7304_v20 }
 0x1f1   : > { %vm4106_vm3 = vcmp.lt.s32.totalorder %v7181_v15, 0  ;;  %vm8180_vm7 = vcmp.ne.s32.totalorder %v7181_v15, 0 }
 0x1f4   : > { %v5226_v22 = vpop.f32.mrb[0].mxu0 }
 0x1f5   : > { %v5262_v56 = vadd.f32 %v5226_v22, %v6657_v19  ;;  %v3441_v21 = vpop.f32.mrb[1].mxu0  ;;  %v7235_v19 = vadd.s32 18, %v7119_v45  ;;  %v8171_v22 = vsel %vm6850_vm11, %v6840_v9, %v6789_v52  ;;  %vm7271_vm11 = vcmp.lt.s32.totalorder %v8177_v8, 16 }
 0x1f6   : > { %v5263_v40 = vadd.f32 %v3441_v21, %v6666_v11  ;;  %v5227_v63 = vpop.f32.mrb[2].mxu0  ;;  %vm7247_vm10 = vcmp.lt.s32.totalorder %v8171_v22, 16  ;;  %v7261_v11 = vadd.s32 18, %v7181_v15  ;;  %v7276_v22 = vsub.s32 %v6972_v44, %v3884_v33 }
 0x1f7   : > { %v4343_v52 = vsel %vm7064_vm9, %v5262_v56, 0.0  ;;  %v5264_v9 = vadd.f32 %v5227_v63, %v6675_v30  ;;  %v3444_v37 = vpop.f32.mrb[3].mxu0  ;;  %v4213_v44 = vsel %vm7230_vm8, %v7214_v42, %v7116_v51  ;;  %v4216_v47 = vsel %vm7255_vm2, %v7235_v19, %v7119_v45  ;;  %vm7297_vm9 = vmand %vm4106_vm3, %vm8180_vm7  ;;  %v8187_v63 = vld [vmem:[#allocation9_spill] sm:$0xff] }
 0x1f8   : > { %5703 = vtanh.f32 %v4343_v52  ;;  %v4341_v30 = vsel %vm7081_vm13, %v5263_v40, 0.0  ;;  %v5265_v36 = vadd.f32 %v3444_v37, %v6683_v25  ;;  %vm8183_vm13 = vnez %v8150_v6  ;;  %v8184_v40 = vld [vmem:[#allocation16_spill] sm:$0xff]  ;;  %v8186_v6 = vld [vmem:[#allocation13_spill] sm:$0xff]  ;;  %v8191_v37 = vld [vmem:[#allocation2_spill] sm:$0xff] }
 0x1f9   : > { %5705 = vtanh.f32 %v4341_v30  ;;  %v4344_v7 = vsel %vm7101_vm0, %v5264_v9, 0.0  ;;  %v3927_v33 = vshrl.u32 %v7190_v54, 4  ;;  %vm8185_vm3 = vnez %v8184_v40  ;;  %v8192_v30 = vld [vmem:[#allocation18_spill] sm:$0xff]  ;;  %v8270_v25 = vld [vmem:[#allocation17_spill] sm:$0xff] }
 0x1fa   : > { %5707 = vtanh.f32 %v4344_v7  ;;  %v4342_v2 = vsel %vm8183_vm13, %v5265_v36, 0.0  ;;  %v8188_v52 = vsel %vm8185_vm3, %v8186_v6, %v8187_v63  ;;  %v4214_v46 = vsel %vm7297_vm9, %v7261_v11, %v7181_v15 }
 0x1fb   : > { %5709 = vtanh.f32 %v4342_v2  ;;  %vm7318_vm7 = vcmp.lt.s32.totalorder %v8188_v52, 16  ;;  %v7327_v9 = vadd.s32 18, %v7239_v35  ;;  %v3950_v54 = vmul.u32 18, %v3949_v27  ;;  %v8197_v27 = vld [vmem:[#allocation3_spill] sm:$0xff] }
 0x1fc   : > { %v5230_v56 = vpop.f32.mrb[4].mxu0  ;;  %vm8193_vm3 = vnez %v8192_v30  ;;  %v7342_v2 = vadd.s32 18, %v7276_v22  ;;  %v7345_v40 = vadd.s32 200, %v6605_v32  ;;  %vm8198_vm13 = vnez %v8123_v48 }
 0x1fd   : > { %v5266_v8 = vadd.f32 %v5230_v56, %v8191_v37  ;;  %v3457_v55 = vpop.f32.mrb[5].mxu0  ;;  %v8194_v36 = vsel %vm8193_vm3, %v6951_v50, %v6880_v34  ;;  %v8199_v50 = vsel %vm8198_vm13, %v6969_v14, %v6890_v0  ;;  %v8204_v0 = vld [vmem:[#allocation11_spill] sm:$0xff]  ;;  %vm7601_vm8 = vcmp.lt.s32.totalorder %v4216_v47, 16 }
 0x1fe   : > { %vm7336_vm12 = vcmp.lt.s32.totalorder %v8194_v36, 16  ;;  %v5267_v56 = vadd.f32 %v3457_v55, %v8197_v27  ;;  %v5231_v6 = vpop.f32.mrb[6].mxu0  ;;  %vm7353_vm3 = vcmp.lt.s32.totalorder %v8199_v50, 16  ;;  %v8202_v55 = vld [vmem:[#allocation4_spill] sm:$0xff]  ;;  %v8205_v14 = vsel %vm8203_vm1, %v6987_v26, %v8204_v0 }
 0x1ff   : > { %v7359_v63 = vmul.u32.u64.low 3817748708, %v7307_v59  ;;  %v7360_v52 = vmul.u32.u64.high 3817748708, %v7307_v59, %v7359_v63  ;;  %v4347_v37 = vsel %vm7197_vm4, %v5266_v8, 0.0  ;;  %v5268_v30 = vadd.f32 %v5231_v6, %v8202_v55  ;;  %v3460_v36 = vpop.f32.mrb[7].mxu0 }
 0x200   : > { %vm7370_vm13 = vcmp.lt.s32.totalorder %v8205_v14, 16  ;;  %v7375_v27 = vsub.s32 %v7057_v31, %v3895_v3  ;;  %v3928_v50 = vmul.u32 18, %v3927_v33  ;;  %5711 = vtanh.f32 %v4347_v37 }
 0x201   : > { %v4345_v24 = vsel %vm7222_vm5, %v5267_v56, 0.0  ;;  %v5269_v26 = vadd.f32 %v3460_v36, %v8208_v49  ;;  %v7386_v8 = vsub.s32 %v7074_v43, %v3950_v54  ;;  %v4348_v31 = vsel %vm7247_vm10, %v5268_v30, 0.0 }
 0x202   : > { %5713 = vtanh.f32 %v4345_v24  ;;  %v7391_v3 = vmul.u32.u64.low 3817748708, %v7345_v40  ;;  %v7392_v33 = vmul.u32.u64.high 3817748708, %v7345_v40, %v7391_v3  ;;  %v5704_v6 = vpop.eup %5703  ;;  %v7398_v56 = vadd.s32 240, %v6605_v32 }
 0x203   : > { %5715 = vtanh.f32 %v4348_v31  ;;  %v4346_v39 = vsel %vm7271_vm11, %v5269_v26, 0.0  ;;  %v5706_v43 = vpop.eup %5705  ;;  %vm8209_vm5 = vcmask 97280   ;;  %v7406_v54 = vadd.s32 224, %v6605_v32 }
 0x204   : > { %4416 = vst.msk [vmem:[%s7380_s11 + $0x10] sm:$0xff] %vm8209_vm5, %v5704_v6  ;;  %5717 = vtanh.f32 %v4346_v39  ;;  %v7409_v63 = vadd.s32 248, %v6605_v32  ;;  %v5708_v21 = vpop.eup %5707  ;;  %vm8210_vm10 = vmmov %vm8209_vm5  ;;  %v5234_v37 = vpop.f32.mrb[8].mxu0  ;;  %vm8211_vm11 = vnez %v8140_v12  ;;  %v7425_v36 = vsub.s32 %v7144_v41, %v3928_v50  ;;  %v8216_v12 = vld [vmem:[#allocation6_spill] sm:$0xff]  ;;  %v8222_v50 = vld [vmem:[#allocation7_spill] sm:$0xff] }
 0x205   : > { %4414 = vst.msk [vmem:[%s7380_s11] sm:$0xff] %vm8210_vm10, %v5706_v43  ;;  %v8212_v55 = vsel %vm8211_vm11, %v7036_v38, %v6990_v53  ;;  %v7428_v0 = vadd.s32 232, %v6605_v32  ;;  %v5710_v14 = vpop.eup %5709  ;;  %vm8215_vm10 = vmmov %vm8209_vm5  ;;  %v5270_v24 = vadd.f32 %v5234_v37, %v8216_v12  ;;  %v3473_v53 = vpop.f32.mrb[9].mxu0  ;;  %vm8217_vm11 = vnez %v8147_v10  ;;  %v8218_v38 = vld [vmem:[#allocation20_spill] sm:$0xff] }
 0x206   : > { %vm7418_vm1 = vcmp.lt.s32.totalorder %v8212_v55, 16  ;;  %4417 = vst.msk [vmem:[%s7380_s11 + $0x18] sm:$0xff] %vm8215_vm10, %v5708_v21  ;;  %v8219_v49 = vsel %vm8217_vm11, %v7054_v13, %v8218_v38  ;;  %v8220_v26 = vmov 0  ;;  %v7443_v41 = vadd.s32 18, %v7375_v27  ;;  %4415 = vst.msk [vmem:[%s7380_s11 + $0x8] sm:$0xff] %vm8215_vm10, %v5710_v14  ;;  %v5235_v3 = vpop.f32.mrb[10].mxu0 }
 0x207   : > { %vm7438_vm5 = vcmp.lt.s32.totalorder %v8219_v49, 16  ;;  %v5271_v31 = vadd.f32 %v3473_v53, %v8222_v50  ;;  %vm7455_vm11 = vcmp.lt.s32.totalorder %v4212_v1, 16  ;;  %vm8226_vm4 = vcmp.lt.s32.totalorder %v7239_v35, 0  ;;  %v3476_v43 = vpop.f32.mrb[11].mxu0 }
 0x208   : > { %v8221_v26 = vsel %vm7438_vm5, 4294967295, %v8220_v26  ;;  %vm8225_vm5 = vcmp.ne.s32.totalorder %v7239_v35, 0  ;;  %v3960_v6 = vshrl.u32 %v7360_v52, 4  ;;  %v4351_v4 = vsel %vm7318_vm7, %v5270_v24, 0.0 }
 0x209   : > { %vm7463_vm9 = vmand %vm8226_vm4, %vm8225_vm5  ;;  %v7469_v39 = vmul.u32.u64.low 3817748708, %v7398_v56  ;;  %v7470_v29 = vmul.u32.u64.high 3817748708, %v7398_v56, %v7469_v39  ;;  %v5272_v1 = vadd.f32 %v5235_v3, %v8229_v16  ;;  %v8230_v21 = vsel %vm7150_vm6, %v7155_v28, %v7039_v57 }
 0x20a   : > { %vm7480_vm15 = vcmp.lt.s32.totalorder %v8230_v21, 16  ;;  %v8231_v37 = vmov 0  ;;  %vm8233_vm4 = vcmp.ne.s32.totalorder %v7276_v22, 0  ;;  %vm8234_vm5 = vcmp.lt.s32.totalorder %v7276_v22, 0  ;;  %v5712_v53 = vpop.eup %5711 }
 0x20b   : > { %v8232_v37 = vsel %vm7480_vm15, 4294967295, %v8231_v37  ;;  %vm7488_vm10 = vmand %vm8234_vm5, %vm8233_vm4  ;;  %v7493_v62 = vmul.u32.u64.low 3817748708, %v7406_v54  ;;  %v7494_v55 = vmul.u32.u64.high 3817748708, %v7406_v54, %v7493_v62  ;;  %5719 = vtanh.f32 %v4351_v4 }
 0x20c   : > { %v4349_v57 = vsel %vm7336_vm12, %v5271_v31, 0.0  ;;  %v5273_v28 = vadd.f32 %v3476_v43, %v8237_v18  ;;  %vm8238_vm6 = vcmp.ne.s32.totalorder %v7304_v20, 0  ;;  %vm8239_vm7 = vcmp.lt.s32.totalorder %v7304_v20, 0  ;;  %v5714_v50 = vpop.eup %5713  ;;  %v5238_v4 = vpop.f32.mrb[12].mxu0  ;;  %v8258_v62 = vld [vmem:[#allocation12_spill] sm:$0xff] }
 0x20d   : > { %vm7503_vm0 = vmand %vm8239_vm7, %vm8238_vm6  ;;  %vm4077_vm4 = vcmp.ne.s32.totalorder %v7425_v36, 0  ;;  %5721 = vtanh.f32 %v4349_v57  ;;  %v4352_v12 = vsel %vm7353_vm3, %v5272_v1, 0.0  ;;  %vm8242_vm5 = vcmp.ne.s32.totalorder %v7375_v27, 0  ;;  %v5716_v39 = vpop.eup %5715  ;;  %v3489_v18 = vpop.f32.mrb[13].mxu0 }
 0x20e   : > { %vm8243_vm12 = vcmp.lt.s32.totalorder %v7375_v27, 0  ;;  %vm4113_vm6 = vcmp.lt.s32.totalorder %v7425_v36, 0  ;;  %v3938_v24 = vshrl.u32 %v7392_v33, 4  ;;  %5723 = vtanh.f32 %v4352_v12  ;;  %v5718_v21 = vpop.eup %5717 }
 0x20f   : > { %vm7514_vm15 = vmand %vm8243_vm12, %vm8242_vm5  ;;  %v4350_v38 = vsel %vm7370_vm13, %v5273_v28, 0.0  ;;  %v4219_v34 = vsel %vm7463_vm9, %v7327_v9, %v7239_v35  ;;  %v7527_v49 = vadd.s32 18, %v7386_v8  ;;  %vm8246_vm3 = vcmask 97280  }
 0x210   : > { %4420 = vst.msk [vmem:[%s7380_s11 + $0x30] sm:$0xff] %vm8246_vm3, %v5712_v53  ;;  %5725 = vtanh.f32 %v4350_v38  ;;  %v4217_v33 = vsel %vm7488_vm10, %v7342_v2, %v7276_v22  ;;  %vm8247_vm13 = vcmp.ne.s32.totalorder %v7386_v8, 0  ;;  %vm8248_vm7 = vcmp.lt.s32.totalorder %v7386_v8, 0  ;;  %vm8251_vm12 = vmmov %vm8246_vm3 }
 0x211   : > { %vm7539_vm5 = vmand %vm8248_vm7, %vm8247_vm13  ;;  %v7544_v31 = vadd.s32 18, %v7425_v36  ;;  %v3961_v3 = vmul.u32 18, %v3960_v6  ;;  %4418 = vst.msk [vmem:[%s7380_s11 + $0x20] sm:$0xff] %vm8251_vm12, %v5714_v50  ;;  %v8252_v16 = vsel %vm7176_vm14, %v7158_v60, %v7045_v17  ;;  %v4220_v43 = vsel %vm7503_vm0, %v7403_v23, %v7304_v20  ;;  %v8262_v50 = vld [vmem:[#allocation14_spill] sm:$0xff]  ;;  %v7616_v19 = vpop.f32.mrb[20].mxu1 }
 0x212   : > { %vm7553_vm3 = vcmp.lt.s32.totalorder %v8252_v16, 16  ;;  %v4218_v6 = vsel %vm7514_vm15, %v7443_v41, %v7375_v27  ;;  %vm7569_vm13 = vmand %vm4113_vm6, %vm4077_vm4  ;;  %v7574_v60 = vmul.u32.u64.low 3817748708, %v7409_v63  ;;  %v7575_v58 = vmul.u32.u64.high 3817748708, %v7409_v63, %v7574_v60  ;;  %v7637_v15 = vpop.f32.mrb[21].mxu1 }
 0x213   : > { %vm8257_vm14 = vmmov %vm8251_vm12  ;;  %v5274_v57 = vadd.f32 %v5238_v4, %v8258_v62  ;;  %vm7585_vm7 = vcmp.lt.s32.totalorder %v4213_v44, 16  ;;  %v3939_v12 = vmul.u32 18, %v3938_v24  ;;  %v5239_v4 = vpop.f32.mrb[14].mxu0  ;;  %v4223_v5 = vsel %vm7539_vm5, %v7527_v49, %v7386_v8  ;;  %v8265_v24 = vld [vmem:[#allocation15_spill] sm:$0xff]  ;;  %v7642_v62 = vpop.f32.mrb[22].mxu1 }
 0x214   : > { %4421 = vst.msk [vmem:[%s7380_s11 + $0x38] sm:$0xff] %vm8257_vm14, %v5716_v39  ;;  %v7590_v53 = vmul.u32.u64.low 3817748708, %v7428_v0  ;;  %v7591_v38 = vmul.u32.u64.high 3817748708, %v7428_v0, %v7590_v53  ;;  %vm8261_vm4 = vmmov %vm8251_vm12  ;;  %v5275_v39 = vadd.f32 %v3489_v18, %v8262_v50  ;;  %v3993_v42 = vshrl.u32 %v7470_v29, 4  ;;  %v3492_v45 = vpop.f32.mrb[15].mxu0  ;;  %v7652_v18 = vpop.f32.mrb[23].mxu1 }
 0x215   : > { %4419 = vst.msk [vmem:[%s7380_s11 + $0x28] sm:$0xff] %vm8261_vm4, %v5718_v21  ;;  %v7611_v44 = vadd.s32 272, %v6605_v32  ;;  %v4355_v61 = vsel %vm7418_vm1, %v5274_v57, 0.0  ;;  %v5276_v16 = vadd.f32 %v5239_v4, %v8265_v24  ;;  %vm7623_vm6 = vcmp.lt.s32.totalorder %v4214_v46, 16  ;;  %v5242_v50 = vpop.f32.mrb[16].mxu0 }
 0x216   : > { %v4221_v30 = vsel %vm7569_vm13, %v7544_v31, %v7425_v36  ;;  %v7632_v29 = vsub.s32 %v7307_v59, %v3961_v3  ;;  %5727 = vtanh.f32 %v4355_v61  ;;  %vm8269_vm1 = vnez %v8221_v26  ;;  %v5720_v3 = vpop.eup %5719 }
 0x217   : > { %v4353_v60 = vsel %vm8269_vm1, %v5275_v39, 0.0  ;;  %v5277_v21 = vadd.f32 %v3492_v45, %v8270_v25  ;;  %v3971_v11 = vshrl.u32 %v7494_v55, 4  ;;  %v4356_v46 = vsel %vm7455_vm11, %v5276_v16, 0.0  ;;  %v5722_v53 = vpop.eup %5721  ;;  %vm8272_vm11 = vmmov %vm8261_vm4  ;;  %v8276_v16 = vld [vmem:[#allocation19_spill] sm:$0xff]  ;;  %v3505_v45 = vpop.f32.mrb[17].mxu0 }
 0x218   : > { %5729 = vtanh.f32 %v4353_v60  ;;  %v7645_v59 = vsub.s32 %v7345_v40, %v3939_v12  ;;  %v7648_v26 = vadd.s32 256, %v6605_v32  ;;  %vm8271_vm12 = vnez %v8232_v37  ;;  %4424 = vst.msk [vmem:[%s7380_s11 + $0x50] sm:$0xff] %vm8272_vm11, %v5720_v3  ;;  %v5724_v37 = vpop.eup %5723  ;;  %vm8277_vm11 = vmmov %vm8261_vm4  ;;  %v5243_v25 = vpop.f32.mrb[18].mxu0 }
 0x219   : > { %5731 = vtanh.f32 %v4356_v46  ;;  %v4354_v57 = vsel %vm8271_vm12, %v5277_v21, 0.0  ;;  %v3994_v55 = vmul.u32 18, %v3993_v42  ;;  %v7655_v13 = vadd.s32 280, %v6605_v32  ;;  %4422 = vst.msk [vmem:[%s7380_s11 + $0x40] sm:$0xff] %vm8261_vm4, %v5722_v53  ;;  %vm8275_vm12 = vmmov %vm8261_vm4  ;;  %v7701_v3 = vpop.f32.mrb[24].mxu1 }
 0x21a   : > { %5733 = vtanh.f32 %v4354_v57  ;;  %vm4080_vm14 = vcmp.ne.s32.totalorder %v7632_v29, 0  ;;  %v7661_v40 = vmul.u32.u64.low 3817748708, %v7611_v44  ;;  %v7662_v12 = vmul.u32.u64.high 3817748708, %v7611_v44, %v7661_v40  ;;  %v5726_v24 = vpop.eup %5725  ;;  %4425 = vst.msk [vmem:[%s7380_s11 + $0x58] sm:$0xff] %vm8275_vm12, %v5724_v37  ;;  %v8280_v37 = vld [vmem:[#allocation23_spill] sm:$0xff] }
 0x21b   : > { %vm7671_vm2 = vcmp.lt.s32.totalorder %v4219_v34, 16  ;;  %vm4116_vm1 = vcmp.lt.s32.totalorder %v7632_v29, 0  ;;  %v7677_v4 = vadd.s32 18, %v7632_v29  ;;  %v3972_v42 = vmul.u32 18, %v3971_v11  ;;  %4423 = vst.msk [vmem:[%s7380_s11 + $0x48] sm:$0xff] %vm8277_vm11, %v5726_v24  ;;  %v8278_v34 = vld [vmem:[#allocation21_spill] sm:$0xff] }
 0x21c   : > { %v4004_v61 = vshrl.u32 %v7575_v58, 4  ;;  %v5278_v10 = vadd.f32 %v5242_v50, %v8276_v16  ;;  %vm4078_vm9 = vcmp.ne.s32.totalorder %v7645_v59, 0  ;;  %v3982_v35 = vshrl.u32 %v7591_v38, 4  ;;  %v8279_v38 = vld [vmem:[#allocation22_spill] sm:$0xff] }
 0x21d   : > { %v7686_v9 = vadd.s32 264, %v6605_v32  ;;  %v5279_v60 = vadd.f32 %v3505_v45, %v8278_v34  ;;  %vm4114_vm4 = vcmp.lt.s32.totalorder %v7645_v59, 0  ;;  %v7693_v58 = vadd.s32 18, %v7645_v59  ;;  %v3508_v32 = vpop.f32.mrb[19].mxu0 }
 0x21e   : > { %v7696_v21 = vsub.s32 %v7398_v56, %v3994_v55  ;;  %v4359_v11 = vsel %vm7553_vm3, %v5278_v10, 0.0  ;;  %v5280_v46 = vadd.f32 %v5243_v25, %v8279_v38  ;;  %v5281_v56 = vadd.f32 %v3508_v32, %v8280_v37  ;;  %v7710_v55 = vpop.f32.mrb[25].mxu1  ;;  %vm7723_vm3 = vmand %vm4116_vm1, %vm4080_vm14  ;;  %v5246_v52 = vpop.f32.mrb[20].mxu0 }
 0x21f   : > { %v7704_v57 = vmul.u32.u64.low 3817748708, %v7648_v26  ;;  %v7705_v53 = vmul.u32.u64.high 3817748708, %v7648_v26, %v7704_v57  ;;  %5735 = vtanh.f32 %v4359_v11  ;;  %v4357_v40 = vsel %vm7585_vm7, %v5279_v60, 0.0  ;;  %v7717_v24 = vpop.f32.mrb[26].mxu1  ;;  %vm7739_vm7 = vmand %vm4114_vm4, %vm4078_vm9  ;;  %v3521_v14 = vpop.f32.mrb[21].mxu0 }
 0x220   : > { %v7713_v1 = vsub.s32 %v7406_v54, %v3972_v42  ;;  %5737 = vtanh.f32 %v4357_v40  ;;  %v4360_v50 = vsel %vm7601_vm8, %v5280_v46, 0.0  ;;  %v5728_v54 = vpop.eup %5727  ;;  %v4358_v51 = vsel %vm7623_vm6, %v5281_v56, 0.0  ;;  %v7733_v42 = vpop.f32.mrb[27].mxu1  ;;  %vm8285_vm8 = vmmov %vm8277_vm11 }
 0x221   : > { %v7728_v16 = vmul.u32.u64.low 3817748708, %v7655_v13  ;;  %v7729_v10 = vmul.u32.u64.high 3817748708, %v7655_v13, %v7728_v16  ;;  %5739 = vtanh.f32 %v4360_v50  ;;  %4428 = vst.msk [vmem:[%s7380_s11 + $0x70] sm:$0xff] %vm8285_vm8, %v5728_v54  ;;  %vm7754_vm6 = vcmp.lt.s32.totalorder %v4217_v33, 16  ;;  %vm8290_vm1 = vmmov %vm8285_vm8  ;;  %v5247_v48 = vpop.f32.mrb[22].mxu0  ;;  %v7820_v17 = vpop.f32.mrb[28].mxu1 }
 0x222   : > { %v7744_v34 = vmul.u32.u64.low 3817748708, %v7686_v9  ;;  %v7745_v60 = vmul.u32.u64.high 3817748708, %v7686_v9, %v7744_v34  ;;  %v5730_v25 = vpop.eup %5729  ;;  %5741 = vtanh.f32 %v4358_v51  ;;  %vm7763_vm14 = vcmp.lt.s32.totalorder %v4220_v43, 16  ;;  %vm8295_vm15 = vmmov %vm8290_vm1 }
 0x223   : > { %v4005_v38 = vmul.u32 18, %v4004_v61  ;;  %v5732_v46 = vpop.eup %5731  ;;  %4426 = vst.msk [vmem:[%s7380_s11 + $0x60] sm:$0xff] %vm8290_vm1, %v5730_v25  ;;  %vm7774_vm10 = vcmp.lt.s32.totalorder %v4218_v6, 16  ;;  %vm7783_vm0 = vcmp.lt.s32.totalorder %v4223_v5, 16  ;;  %v4224_v2 = vsel %vm7723_vm3, %v7677_v4, %v7632_v29  ;;  %vm8298_vm9 = vmmov %vm8290_vm1  ;;  %v3524_v6 = vpop.f32.mrb[23].mxu0 }
 0x224   : > { %v3983_v23 = vmul.u32 18, %v3982_v35  ;;  %v5734_v27 = vpop.eup %5733  ;;  %4429 = vst.msk [vmem:[%s7380_s11 + $0x78] sm:$0xff] %vm8295_vm15, %v5732_v46  ;;  %v5282_v41 = vadd.f32 %v5246_v52, %v7616_v19  ;;  %vm7799_vm5 = vcmp.lt.s32.totalorder %v4221_v30, 16  ;;  %v4222_v7 = vsel %vm7739_vm7, %v7693_v58, %v7645_v59  ;;  %v7829_v29 = vpop.f32.mrb[29].mxu1  ;;  %vm8303_vm7 = vmmov %vm8290_vm1 }
 0x225   : > { %vm4083_vm12 = vcmp.ne.s32.totalorder %v7696_v21, 0  ;;  %v4037_v49 = vshrl.u32 %v7662_v12, 4  ;;  %4427 = vst.msk [vmem:[%s7380_s11 + $0x68] sm:$0xff] %vm8298_vm9, %v5734_v27  ;;  %v5283_v33 = vadd.f32 %v3521_v14, %v7637_v15  ;;  %vm4119_vm13 = vcmp.lt.s32.totalorder %v7696_v21, 0  ;;  %v7834_v59 = vpop.f32.mrb[30].mxu1  ;;  %v5250_v37 = vpop.f32.mrb[24].mxu0  ;;  %vm8309_vm15 = vmmov %vm8303_vm7 }
 0x226   : > { %v7814_v36 = vadd.s32 18, %v7696_v21  ;;  %vm4081_vm11 = vcmp.ne.s32.totalorder %v7713_v1, 0  ;;  %v4363_v31 = vsel %vm7671_vm2, %v5282_v41, 0.0  ;;  %v5284_v43 = vadd.f32 %v5247_v48, %v7642_v62  ;;  %vm7840_vm2 = vmand %vm4119_vm13, %vm4083_vm12  ;;  %v7848_v61 = vpop.f32.mrb[31].mxu1  ;;  %v3537_v54 = vpop.f32.mrb[25].mxu0 }
 0x227   : > { %vm4117_vm4 = vcmp.lt.s32.totalorder %v7713_v1, 0  ;;  %v7824_v5 = vsub.s32 %v7409_v63, %v4005_v38  ;;  %5743 = vtanh.f32 %v4363_v31  ;;  %v4361_v19 = vsel %vm7754_vm6, %v5283_v33, 0.0  ;;  %vm8310_vm12 = vmmov %vm8303_vm7  ;;  %v5251_v25 = vpop.f32.mrb[26].mxu0 }
 0x228   : > { %v5285_v30 = vadd.f32 %v3524_v6, %v7652_v18  ;;  %v4015_v15 = vshrl.u32 %v7705_v53, 4  ;;  %5745 = vtanh.f32 %v4361_v19  ;;  %v4364_v62 = vsel %vm7763_vm14, %v5284_v43, 0.0  ;;  %vm7854_vm3 = vmand %vm4117_vm4, %vm4081_vm11 }
 0x229   : > { %v4189_v18 = vadd.s32 18, %v7713_v1  ;;  %v4048_v12 = vshrl.u32 %v7729_v10, 4  ;;  %v5736_v39 = vpop.eup %5735  ;;  %5747 = vtanh.f32 %v4364_v62  ;;  %v7859_v58 = vsub.s32 %v7428_v0, %v3983_v23  ;;  %vm8304_vm14 = vmmov %vm8290_vm1  ;;  %v7903_v11 = vpop.f32.mrb[32].mxu1 }
 0x22a   : > { %v4362_v4 = vsel %vm7774_vm10, %v5285_v30, 0.0  ;;  %v4026_v32 = vshrl.u32 %v7745_v60, 4  ;;  %v5738_v57 = vpop.eup %5737  ;;  %4432 = vst.msk [vmem:[%s7380_s11 + $0x90] sm:$0xff] %vm8303_vm7, %v5736_v39  ;;  %vm4084_vm8 = vcmp.ne.s32.totalorder %v7824_v5, 0  ;;  %vm4120_vm6 = vcmp.lt.s32.totalorder %v7824_v5, 0  ;;  %vm8317_vm4 = vmmov %vm8303_vm7 }
 0x22b   : > { %5749 = vtanh.f32 %v4362_v4  ;;  %v4038_v53 = vmul.u32 18, %v4037_v49  ;;  %v5740_v40 = vpop.eup %5739  ;;  %4430 = vst.msk [vmem:[%s7380_s11 + $0x80] sm:$0xff] %vm8304_vm14, %v5738_v57  ;;  %vm7868_vm1 = vcmp.lt.s32.totalorder %v4224_v2, 16  ;;  %vm7872_vm10 = vcmp.lt.s32.totalorder %v4222_v7, 16  ;;  %vm7894_vm9 = vmand %vm4120_vm6, %vm4084_vm8  ;;  %v7912_v2 = vpop.f32.mrb[33].mxu1 }
 0x22c   : > { %v4227_v50 = vsel %vm7840_vm2, %v7814_v36, %v7696_v21  ;;  %v4016_v28 = vmul.u32 18, %v4015_v15  ;;  %v5742_v16 = vpop.eup %5741  ;;  %4433 = vst.msk [vmem:[%s7380_s11 + $0x98] sm:$0xff] %vm8309_vm15, %v5740_v40  ;;  %v5286_v10 = vadd.f32 %v5250_v37, %v7701_v3  ;;  %v4225_v51 = vsel %vm7854_vm3, %v4189_v18, %v7713_v1  ;;  %v7919_v23 = vpop.f32.mrb[34].mxu1  ;;  %vm8320_vm8 = vmmov %vm8317_vm4 }
 0x22d   : > { %v4192_v45 = vadd.s32 18, %v7824_v5  ;;  %v4049_v34 = vmul.u32 18, %v4048_v12  ;;  %4431 = vst.msk [vmem:[%s7380_s11 + $0x88] sm:$0xff] %vm8310_vm12, %v5742_v16  ;;  %v5287_v60 = vadd.f32 %v3537_v54, %v7710_v55  ;;  %vm4082_vm13 = vcmp.ne.s32.totalorder %v7859_v58, 0  ;;  %v3540_v55 = vpop.f32.mrb[27].mxu0  ;;  %v7941_v8 = vpop.f32.mrb[35].mxu1 }
 0x22e   : > { %vm4118_vm11 = vcmp.lt.s32.totalorder %v7859_v58, 0  ;;  %v4027_v3 = vmul.u32 18, %v4026_v32  ;;  %v4367_v1 = vsel %vm7783_vm0, %v5286_v10, 0.0  ;;  %v5288_v47 = vadd.f32 %v5251_v25, %v7717_v24  ;;  %v5254_v48 = vpop.f32.mrb[28].mxu0 }
 0x22f   : > { %v4190_v38 = vadd.s32 18, %v7859_v58  ;;  %v7907_v46 = vsub.s32 %v7611_v44, %v4038_v53  ;;  %5751 = vtanh.f32 %v4367_v1  ;;  %v4365_v52 = vsel %vm7799_vm5, %v5287_v60, 0.0  ;;  %vm7928_vm0 = vmand %vm4118_vm11, %vm4082_vm13  ;;  %v3553_v6 = vpop.f32.mrb[29].mxu0 }
 0x230   : > { %v5289_v22 = vadd.f32 %v3540_v55, %v7733_v42  ;;  %v7915_v20 = vsub.s32 %v7648_v26, %v4016_v28  ;;  %5753 = vtanh.f32 %v4365_v52  ;;  %v4368_v24 = vsel %vm7868_vm1, %v5288_v47, 0.0  ;;  %v5255_v30 = vpop.f32.mrb[30].mxu0 }
 0x231   : > { %v4228_v44 = vsel %vm7894_vm9, %v4192_v45, %v7824_v5  ;;  %v7933_v26 = vsub.s32 %v7655_v13, %v4049_v34  ;;  %v5744_v27 = vpop.eup %5743  ;;  %5755 = vtanh.f32 %v4368_v24  ;;  %vm7937_vm5 = vcmp.lt.s32.totalorder %v4227_v50, 16  ;;  %vm8324_vm9 = vmmov %vm8317_vm4  ;;  %v3556_v63 = vpop.f32.mrb[31].mxu0 }
 0x232   : > { %v4366_v41 = vsel %vm7872_vm10, %v5289_v22, 0.0  ;;  %v7944_v7 = vsub.s32 %v7686_v9, %v4027_v3  ;;  %v5746_v49 = vpop.eup %5745  ;;  %4436 = vst.msk [vmem:[%s7380_s11 + $0xb0] sm:$0xff] %vm8317_vm4, %v5744_v27  ;;  %vm7948_vm2 = vcmp.lt.s32.totalorder %v4225_v51, 16  ;;  %vm4087_vm3 = vcmp.ne.s32.totalorder %v7907_v46, 0  ;;  %vm8323_vm10 = vmmov %vm8317_vm4 }
 0x233   : > { %5757 = vtanh.f32 %v4366_v41  ;;  %vm4123_vm7 = vcmp.lt.s32.totalorder %v7907_v46, 0  ;;  %v5748_v33 = vpop.eup %5747  ;;  %4434 = vst.msk [vmem:[%s7380_s11 + $0xa0] sm:$0xff] %vm8320_vm8, %v5746_v49  ;;  %vm7956_vm6 = vcmp.lt.s32.totalorder %v4228_v44, 16  ;;  %v4226_v36 = vsel %vm7928_vm0, %v4190_v38, %v7859_v58 }
 0x234   : > { %vm4085_vm14 = vcmp.ne.s32.totalorder %v7915_v20, 0  ;;  %vm4121_vm1 = vcmp.lt.s32.totalorder %v7915_v20, 0  ;;  %4437 = vst.msk [vmem:[%s7380_s11 + $0xb8] sm:$0xff] %vm8323_vm10, %v5748_v33  ;;  %v5290_v43 = vadd.f32 %v5254_v48, %v7820_v17  ;;  %v4195_v5 = vadd.s32 18, %v7907_v46  ;;  %vm7978_vm13 = vmand %vm4123_vm7, %vm4087_vm3  ;;  %v5258_v28 = vpop.f32.mrb[32].mxu0 }
 0x235   : > { %v5750_v31 = vpop.eup %5749  ;;  %vm4088_vm15 = vcmp.ne.s32.totalorder %v7933_v26, 0  ;;  %vm4124_vm12 = vcmp.lt.s32.totalorder %v7933_v26, 0  ;;  %v5291_v19 = vadd.f32 %v3553_v6, %v7829_v29  ;;  %v4193_v17 = vadd.s32 18, %v7915_v20  ;;  %vm7996_vm3 = vmand %vm4121_vm1, %vm4085_vm14  ;;  %v3569_v51 = vpop.f32.mrb[33].mxu0 }
 0x236   : > { %4435 = vst.msk [vmem:[%s7380_s11 + $0xa8] sm:$0xff] %vm8324_vm9, %v5750_v31  ;;  %vm4086_vm11 = vcmp.ne.s32.totalorder %v7944_v7, 0  ;;  %vm4122_vm0 = vcmp.lt.s32.totalorder %v7944_v7, 0  ;;  %v4371_v62 = vsel %vm7937_vm5, %v5290_v43, 0.0  ;;  %v5292_v29 = vadd.f32 %v5255_v30, %v7834_v59  ;;  %vm8008_vm5 = vmand %vm4124_vm12, %vm4088_vm15  ;;  %v5259_v34 = vpop.f32.mrb[34].mxu0 }
 0x237   : > { %vm7988_vm4 = vcmp.lt.s32.totalorder %v4226_v36, 16  ;;  %v4196_v39 = vadd.s32 18, %v7933_v26  ;;  %5759 = vtanh.f32 %v4371_v62  ;;  %v4369_v59 = vsel %vm7948_vm2, %v5291_v19, 0.0  ;;  %vm8022_vm2 = vmand %vm4122_vm0, %vm4086_vm11  ;;  %v3572_v21 = vpop.f32.mrb[35].mxu0 }
 0x238   : > { %v5293_v4 = vadd.f32 %v3556_v63, %v7848_v61  ;;  %v4194_v58 = vadd.s32 18, %v7944_v7  ;;  %5761 = vtanh.f32 %v4369_v59  ;;  %v4372_v32 = vsel %vm7956_vm6, %v5292_v29, 0.0  ;;  %vm8335_vm7 = vmmov %vm8320_vm8 }
 0x239   : > { %v4231_v57 = vsel %vm7978_vm13, %v4195_v5, %v7907_v46  ;;  %v5752_v53 = vpop.eup %5751  ;;  %5763 = vtanh.f32 %v4372_v32  ;;  %v4229_v37 = vsel %vm7996_vm3, %v4193_v17, %v7915_v20  ;;  %v4232_v56 = vsel %vm8008_vm5, %v4196_v39, %v7933_v26  ;;  %vm8336_vm8 = vmmov %vm8335_vm7 }
 0x23a   : > { %v4370_v40 = vsel %vm7988_vm4, %v5293_v4, 0.0  ;;  %v5754_v0 = vpop.eup %5753  ;;  %4440 = vst.msk [vmem:[%s7380_s11 + $0xd0] sm:$0xff] %vm8335_vm7, %v5752_v53  ;;  %vm4267_vm6 = vcmp.lt.s32.totalorder %v4231_v57, 16  ;;  %v4230_v16 = vsel %vm8022_vm2, %v4194_v58, %v7944_v7  ;;  %vm8337_vm14 = vmmov %vm8335_vm7  ;;  %v5294_v54 = vadd.f32 %v5258_v28, %v7903_v11 }
 0x23b   : > { %5765 = vtanh.f32 %v4370_v40  ;;  %v5756_v50 = vpop.eup %5755  ;;  %4438 = vst.msk [vmem:[%s7380_s11 + $0xc0] sm:$0xff] %vm8336_vm8, %v5754_v0  ;;  %vm4265_vm1 = vcmp.lt.s32.totalorder %v4229_v37, 16  ;;  %vm8338_vm10 = vmmov %vm8335_vm7  ;;  %v5295_v45 = vadd.f32 %v3569_v51, %v7912_v2  ;;  %vm4268_vm15 = vcmp.lt.s32.totalorder %v4232_v56, 16 }
 0x23c   : > { %4441 = vst.msk [vmem:[%s7380_s11 + $0xd8] sm:$0xff] %vm8337_vm14, %v5756_v50  ;;  %v4375_v60 = vsel %vm4267_vm6, %v5294_v54, 0.0  ;;  %v5296_v25 = vadd.f32 %v5259_v34, %v7919_v23  ;;  %vm4266_vm12 = vcmp.lt.s32.totalorder %v4230_v16, 16  ;;  %v5297_v1 = vadd.f32 %v3572_v21, %v7941_v8  ;;  %vm8339_vm9 = vmmov %vm8335_vm7 }
 0x23d   : > { %v5758_v10 = vpop.eup %5757  ;;  %5767 = vtanh.f32 %v4375_v60  ;;  %v4373_v3 = vsel %vm4265_vm1, %v5295_v45, 0.0  ;;  %vm8340_vm13 = vmmov %vm8335_vm7 }
 0x23e   : > { %4439 = vst.msk [vmem:[%s7380_s11 + $0xc8] sm:$0xff] %vm8338_vm10, %v5758_v10  ;;  %5769 = vtanh.f32 %v4373_v3  ;;  %v4376_v47 = vsel %vm4268_vm15, %v5296_v25, 0.0  ;;  %v4374_v11 = vsel %vm4266_vm12, %v5297_v1, 0.0  ;;  %vm8341_vm11 = vmmov %vm8335_vm7 }
 0x23f   : > { %5771 = vtanh.f32 %v4376_v47  ;;  %vm8342_vm0 = vmmov %vm8335_vm7 }
 0x240   : > { %5773 = vtanh.f32 %v4374_v11  ;;  %vm8343_vm4 = vmmov %vm8342_vm0 }
 0x241   : > { %v5760_v55 = vpop.eup %5759  ;;  %vm8344_vm3 = vmmov %vm8342_vm0 }
 0x242   : > { %v5762_v38 = vpop.eup %5761  ;;  %4444 = vst.msk [vmem:[%s7380_s11 + $0xf0] sm:$0xff] %vm8339_vm9, %v5760_v55  ;;  %vm8345_vm5 = vmmov %vm8342_vm0 }
 0x243   : > { %v5764_v46 = vpop.eup %5763  ;;  %4442 = vst.msk [vmem:[%s7380_s11 + $0xe0] sm:$0xff] %vm8340_vm13, %v5762_v38  ;;  %vm8346_vm2 = vmmov %vm8342_vm0 }
 0x244   : > { %4445 = vst.msk [vmem:[%s7380_s11 + $0xf8] sm:$0xff] %vm8341_vm11, %v5764_v46 }
 0x245   : > { %v5766_v52 = vpop.eup %5765 }
 0x246   : > { %4443 = vst.msk [vmem:[%s7380_s11 + $0xe8] sm:$0xff] %vm8342_vm0, %v5766_v52 }
 0x247   : > { %v5768_v22 = vpop.eup %5767 }
 0x248   : > { %v5770_v2 = vpop.eup %5769  ;;  %4448 = vst.msk [vmem:[%s7380_s11 + $0x110] sm:$0xff] %vm8343_vm4, %v5768_v22 }
 0x249   : > { %v5772_v20 = vpop.eup %5771  ;;  %4446 = vst.msk [vmem:[%s7380_s11 + $0x100] sm:$0xff] %vm8344_vm3, %v5770_v2 }
 0x24a   : > { %v5774_v24 = vpop.eup %5773  ;;  %4449 = vst.msk [vmem:[%s7380_s11 + $0x118] sm:$0xff] %vm8345_vm5, %v5772_v20 }
 0x24b   : > { %4447 = vst.msk [vmem:[%s7380_s11 + $0x108] sm:$0xff] %vm8346_vm2, %v5774_v24 }
 0x24c PF: > { %s12_s9 = sadd.s32 1, %s5792_s9  }
 0x24d   : > { %p9_p4 = scmp.ge.s32.totalorder %s12_s9, 4  }
 0x24f   :  { %11 = sbr.rel (!%p9_p4) target bundleno = 1 (0x1), region = 58 }

</bundles_post_ra>
